<compile_context>
chip_gen: v6e
topology: v6e:2x2x1
jax: 0.10.0
libtpu: 0.0.40
codegen_flags: <defaults>
</compile_context>

<pallas_src>
import functools

import jax
import jax.numpy as jnp
from jax.experimental import pallas as pl
from jax.experimental.pallas import tpu as pltpu


def _time_attention_kernel(x_ref, wqkv_ref, bqkv_ref, gamma_ref, beta_ref, o_ref,
                           *, d, heads, eps):
    # x_ref block: [1, N, T, F] -- one batch element, all nodes and timesteps.
    x3 = x_ref[0]                      # [N, T, F] float32
    N, T, F = x3.shape

    # ---- fused QKV projection: one [N*T, F] x [F, 3F] MXU matmul --------------
    # wqkv is pre-transposed ([F, 3F]) and already carries the 1/sqrt(d) scale on
    # the Q columns, so no in-kernel weight transpose and no per-element score scale.
    x2d = x3.reshape(N * T, F)
    qkv = jnp.dot(x2d.astype(jnp.bfloat16), wqkv_ref[...],
                  preferred_element_type=jnp.float32) + bqkv_ref[...]     # [N*T, 3F] f32
    # Cast once (post-bias) for the attention matmuls; residual path keeps x3 in f32.
    qkv_bf = qkv.astype(jnp.bfloat16).reshape(N, T, 3 * F)

    # ---- multi-head attention over time, batched over nodes -------------------
    head_outs = []
    for h in range(heads):
        qh = qkv_bf[:, :, h * d:(h + 1) * d]                     # [N, T, d] bf16
        kh = qkv_bf[:, :, F + h * d:F + (h + 1) * d]             # [N, T, d] bf16
        vh = qkv_bf[:, :, 2 * F + h * d:2 * F + (h + 1) * d]     # [N, T, d] bf16

        s = jnp.einsum('ntd,nsd->nts', qh, kh,
                       preferred_element_type=jnp.float32)       # [N, T, T] f32
        s = s - jnp.max(s, axis=-1, keepdims=True)
        p = jnp.exp(s)
        p = p * pl.reciprocal(jnp.sum(p, axis=-1, keepdims=True), approx=True)

        head_outs.append(jnp.einsum('nts,nsd->ntd', p.astype(jnp.bfloat16), vh,
                                    preferred_element_type=jnp.float32))  # [N, T, d]

    attn = jnp.concatenate(head_outs, axis=-1)   # [N, T, F] float32

    # ---- residual + LayerNorm over the feature dim (eps = nn.LayerNorm default) ----
    y = attn + x3
    mean = jnp.mean(y, axis=-1, keepdims=True)
    var = jnp.mean(y * y, axis=-1, keepdims=True) - mean * mean
    y_norm = (y - mean) * jax.lax.rsqrt(var + eps)
    out = y_norm * gamma_ref[...] + beta_ref[...]

    o_ref[0] = out.astype(o_ref.dtype)


def time_attention(x, params, d):
    """x: [B, T, N, F] float32. Returns [B, T, N, F]."""
    wq, bq, wk, bk, wv, bv, gamma, beta = params
    B, T, N, F = x.shape
    heads = F // d
    assert heads * d == F, "outfea must be divisible by d"

    scale = 1.0 / (d ** 0.5)
    # Fuse Q/K/V into one pre-transposed weight (nn.Linear: y = x @ W^T + b) and fold
    # the 1/sqrt(d) attention scale into the Q weight/bias. Weight in bf16 for the MXU,
    # bias / LN params stay f32.
    wqkv = jnp.concatenate([wq.T * scale, wk.T, wv.T], axis=1).astype(jnp.bfloat16)  # [F, 3F]
    bqkv = jnp.concatenate([bq * scale, bk, bv]).reshape(1, 3 * F).astype(jnp.float32)
    gamma2 = gamma.reshape(1, F).astype(jnp.float32)
    beta2 = beta.reshape(1, F).astype(jnp.float32)

    # [B, T, N, F] -> [B, N, T, F]: node-major view so the kernel's attention batch dim
    # (nodes) is leading and the QKV matmul sees N*T contiguous rows.
    x_r = jnp.transpose(x, (0, 2, 1, 3))

    kernel = functools.partial(_time_attention_kernel, d=d, heads=heads, eps=1e-5)

    out_r = pl.pallas_call(
        kernel,
        out_shape=jax.ShapeDtypeStruct((B, N, T, F), jnp.float32),
        grid_spec=pltpu.PrefetchScalarGridSpec(
            num_scalar_prefetch=0,
            grid=(B,),
            in_specs=[
                pl.BlockSpec((1, N, T, F), lambda b: (b, 0, 0, 0)),   # x (node-major)
                pl.BlockSpec((F, 3 * F), lambda b: (0, 0)),           # fused Wqkv (bf16)
                pl.BlockSpec((1, 3 * F), lambda b: (0, 0)),           # fused bias
                pl.BlockSpec((1, F), lambda b: (0, 0)),               # LN gamma
                pl.BlockSpec((1, F), lambda b: (0, 0)),               # LN beta
            ],
            out_specs=pl.BlockSpec((1, N, T, F), lambda b: (b, 0, 0, 0)),
        ),
        compiler_params=pltpu.CompilerParams(
            dimension_semantics=("parallel",)),
    )(x_r, wqkv, bqkv, gamma2, beta2)

    # [B, N, T, F] -> [B, T, N, F]
    return jnp.transpose(out_r, (0, 2, 1, 3))


def time_attention_ref(x, params, d):
    """Pure-JAX mirror of the PyTorch forward (for correctness checking)."""
    wq, bq, wk, bk, wv, bv, gamma, beta = params
    F = x.shape[-1]
    heads = F // d

    q = x @ wq.T + bq
    k = x @ wk.T + bk
    v = x @ wv.T + bv

    # torch.cat(torch.split(., d, -1), 0)
    q = jnp.concatenate(jnp.split(q, heads, axis=-1), axis=0)   # [hB, T, N, d]
    k = jnp.concatenate(jnp.split(k, heads, axis=-1), axis=0)
    v = jnp.concatenate(jnp.split(v, heads, axis=-1), axis=0)

    q = jnp.transpose(q, (0, 2, 1, 3))   # [hB, N, T, d]
    k = jnp.transpose(k, (0, 2, 3, 1))   # [hB, N, d, T]
    v = jnp.transpose(v, (0, 2, 1, 3))   # [hB, N, T, d]

    a = jnp.matmul(q, k) / (d ** 0.5)    # [hB, N, T, T]
    a = jax.nn.softmax(a, axis=-1)
    out = jnp.matmul(a, v)               # [hB, N, T, d]

    out = jnp.concatenate(jnp.split(out, heads, axis=0), axis=-1)  # [B, N, T, F]
    out = jnp.transpose(out, (0, 2, 1, 3))                         # [B, T, N, F]
    out = out + x

    mean = jnp.mean(out, axis=-1, keepdims=True)
    var = jnp.mean((out - mean) ** 2, axis=-1, keepdims=True)
    return (out - mean) / jnp.sqrt(var + 1e-5) * gamma + beta


if __name__ == "__main__":
    # Small shapes: batch=2, time=8, nodes=16, outfea=32, d=8 (-> 4 heads)
    B, T, N, F, d = 2, 8, 16, 32, 8

    key = jax.random.PRNGKey(0)
    ks = jax.random.split(key, 8)
    x = jax.random.normal(ks[0], (B, T, N, F), dtype=jnp.float32)

    wq = 0.1 * jax.random.normal(ks[1], (F, F), dtype=jnp.float32)
    wk = 0.1 * jax.random.normal(ks[2], (F, F), dtype=jnp.float32)
    wv = 0.1 * jax.random.normal(ks[3], (F, F), dtype=jnp.float32)
    bq = 0.1 * jax.random.normal(ks[4], (F,), dtype=jnp.float32)
    bk = 0.1 * jax.random.normal(ks[5], (F,), dtype=jnp.float32)
    bv = 0.1 * jax.random.normal(ks[6], (F,), dtype=jnp.float32)
    gamma = jnp.ones((F,), dtype=jnp.float32)   # LayerNorm weight (default init)
    beta = jnp.zeros((F,), dtype=jnp.float32)   # LayerNorm bias (default init)
    params = (wq, bq, wk, bk, wv, bv, gamma, beta)

    out = time_attention(x, params, d)
    out = jax.block_until_ready(out)

    ref = jax.block_until_ready(time_attention_ref(x, params, d))
    assert out.shape == (B, T, N, F)
    if not bool(jnp.allclose(out, ref, atol=1e-2, rtol=1e-2)):
        raise AssertionError("Pallas kernel output mismatch vs reference")

    print("KERNEL_OK")
</pallas_src>

<mosaic_0001>
module attributes {stable_mosaic.version = 11 : i64} {
  func.func @_time_attention_kernel(%arg0: i32, %arg1: memref<1x16x8x32xf32, #tpu.memory_space<vmem>>, %arg2: memref<32x96xbf16, #tpu.memory_space<vmem>>, %arg3: memref<1x96xf32, #tpu.memory_space<vmem>>, %arg4: memref<1x32xf32, #tpu.memory_space<vmem>>, %arg5: memref<1x32xf32, #tpu.memory_space<vmem>>, %arg6: memref<1x16x8x32xf32, #tpu.memory_space<vmem>>) attributes {dimension_semantics = [#tpu.dimension_semantics<parallel>], iteration_bounds = array<i64: 2>, scalar_prefetch = 0 : i64, scratch_operands = 0 : i64, tpu.core_type = #tpu.core_type<tc>, window_params = [{transform_indices = @transform_0, window_bounds = array<i64: 1, 16, 8, 32>}, {pipeline_mode = #tpu.pipeline_mode<synchronous>, transform_indices = @transform_1, window_bounds = array<i64: 32, 96>}, {pipeline_mode = #tpu.pipeline_mode<synchronous>, transform_indices = @transform_2, window_bounds = array<i64: 1, 96>}, {pipeline_mode = #tpu.pipeline_mode<synchronous>, transform_indices = @transform_3, window_bounds = array<i64: 1, 32>}, {pipeline_mode = #tpu.pipeline_mode<synchronous>, transform_indices = @transform_4, window_bounds = array<i64: 1, 32>}, {transform_indices = @transform_5, window_bounds = array<i64: 1, 16, 8, 32>}]} {
    %c0 = arith.constant 0 : index
    %c0_0 = arith.constant 0 : index
    %c0_1 = arith.constant 0 : index
    %c0_2 = arith.constant 0 : index
    %0 = vector.load %arg1[%c0, %c0_0, %c0_1, %c0_2] : memref<1x16x8x32xf32, #tpu.memory_space<vmem>>, vector<1x16x8x32xf32>
    %1 = vector.shape_cast %0 : vector<1x16x8x32xf32> to vector<16x8x32xf32>
    %2 = vector.shape_cast %1 : vector<16x8x32xf32> to vector<128x32xf32>
    %3 = arith.truncf %2 : vector<128x32xf32> to vector<128x32xbf16>
    %c0_3 = arith.constant 0 : index
    %c0_4 = arith.constant 0 : index
    %4 = vector.load %arg2[%c0_3, %c0_4] : memref<32x96xbf16, #tpu.memory_space<vmem>>, vector<32x96xbf16>
    %cst = arith.constant dense<0.000000e+00> : vector<128x96xf32>
    %5 = tpu.matmul %3, %4, %cst {dimension_numbers = #tpu.dot_dimension_numbers<[1], [0], [0], [1], [0, 0, 1, 1], [], []>} : vector<128x32xbf16>, vector<32x96xbf16>, vector<128x96xf32> -> vector<128x96xf32>
    %c0_5 = arith.constant 0 : index
    %c0_6 = arith.constant 0 : index
    %6 = vector.load %arg3[%c0_5, %c0_6] : memref<1x96xf32, #tpu.memory_space<vmem>>, vector<1x96xf32>
    %7 = vector.broadcast %6 : vector<1x96xf32> to vector<128x96xf32>
    %8 = arith.addf %5, %7 : vector<128x96xf32>
    %9 = arith.truncf %8 : vector<128x96xf32> to vector<128x96xbf16>
    %10 = vector.shape_cast %9 : vector<128x96xbf16> to vector<16x8x96xbf16>
    %11 = vector.extract_strided_slice %10 {offsets = [0, 0, 0], sizes = [16, 8, 8], strides = [1, 1, 1]} : vector<16x8x96xbf16> to vector<16x8x8xbf16>
    %12 = vector.extract_strided_slice %10 {offsets = [0, 0, 32], sizes = [16, 8, 8], strides = [1, 1, 1]} : vector<16x8x96xbf16> to vector<16x8x8xbf16>
    %13 = vector.extract_strided_slice %10 {offsets = [0, 0, 64], sizes = [16, 8, 8], strides = [1, 1, 1]} : vector<16x8x96xbf16> to vector<16x8x8xbf16>
    "tpu.trace_start"() <{level = 10 : i32, message = "ntd,nsd->nts"}> : () -> ()
    %cst_7 = arith.constant dense<0.000000e+00> : vector<16x8x8xf32>
    %14 = tpu.matmul %11, %12, %cst_7 {dimension_numbers = #tpu.dot_dimension_numbers<[2], [2], [1], [1], [0, 0, 0, 1, 1, 1], [0], [0]>} : vector<16x8x8xbf16>, vector<16x8x8xbf16>, vector<16x8x8xf32> -> vector<16x8x8xf32>
    "tpu.trace_stop"() : () -> ()
    %cst_8 = arith.constant dense<0xFF800000> : vector<16x8xf32>
    %15 = vector.multi_reduction <maximumf>, %14, %cst_8 [2] : vector<16x8x8xf32> to vector<16x8xf32>
    %16 = vector.shape_cast %15 : vector<16x8xf32> to vector<16x8x1xf32>
    %17 = vector.broadcast %16 : vector<16x8x1xf32> to vector<16x8x8xf32>
    %18 = arith.subf %14, %17 : vector<16x8x8xf32>
    %19 = math.exp %18 : vector<16x8x8xf32>
    %cst_9 = arith.constant dense<0.000000e+00> : vector<16x8xf32>
    %20 = vector.multi_reduction <add>, %19, %cst_9 [2] : vector<16x8x8xf32> to vector<16x8xf32>
    %21 = vector.shape_cast %20 : vector<16x8xf32> to vector<16x8x1xf32>
    %22 = tpu.reciprocal %21 {approx = true} : vector<16x8x1xf32> -> vector<16x8x1xf32>
    %23 = vector.broadcast %22 : vector<16x8x1xf32> to vector<16x8x8xf32>
    %24 = arith.mulf %19, %23 : vector<16x8x8xf32>
    %25 = arith.truncf %24 : vector<16x8x8xf32> to vector<16x8x8xbf16>
    "tpu.trace_start"() <{level = 10 : i32, message = "nts,nsd->ntd"}> : () -> ()
    %cst_10 = arith.constant dense<0.000000e+00> : vector<16x8x8xf32>
    %26 = tpu.matmul %25, %13, %cst_10 {dimension_numbers = #tpu.dot_dimension_numbers<[2], [1], [1], [2], [0, 0, 0, 1, 1, 2], [0], [0]>} : vector<16x8x8xbf16>, vector<16x8x8xbf16>, vector<16x8x8xf32> -> vector<16x8x8xf32>
    "tpu.trace_stop"() : () -> ()
    %27 = vector.extract_strided_slice %10 {offsets = [0, 0, 8], sizes = [16, 8, 8], strides = [1, 1, 1]} : vector<16x8x96xbf16> to vector<16x8x8xbf16>
    %28 = vector.extract_strided_slice %10 {offsets = [0, 0, 40], sizes = [16, 8, 8], strides = [1, 1, 1]} : vector<16x8x96xbf16> to vector<16x8x8xbf16>
    %29 = vector.extract_strided_slice %10 {offsets = [0, 0, 72], sizes = [16, 8, 8], strides = [1, 1, 1]} : vector<16x8x96xbf16> to vector<16x8x8xbf16>
    "tpu.trace_start"() <{level = 10 : i32, message = "ntd,nsd->nts"}> : () -> ()
    %cst_11 = arith.constant dense<0.000000e+00> : vector<16x8x8xf32>
    %30 = tpu.matmul %27, %28, %cst_11 {dimension_numbers = #tpu.dot_dimension_numbers<[2], [2], [1], [1], [0, 0, 0, 1, 1, 1], [0], [0]>} : vector<16x8x8xbf16>, vector<16x8x8xbf16>, vector<16x8x8xf32> -> vector<16x8x8xf32>
    "tpu.trace_stop"() : () -> ()
    %cst_12 = arith.constant dense<0xFF800000> : vector<16x8xf32>
    %31 = vector.multi_reduction <maximumf>, %30, %cst_12 [2] : vector<16x8x8xf32> to vector<16x8xf32>
    %32 = vector.shape_cast %31 : vector<16x8xf32> to vector<16x8x1xf32>
    %33 = vector.broadcast %32 : vector<16x8x1xf32> to vector<16x8x8xf32>
    %34 = arith.subf %30, %33 : vector<16x8x8xf32>
    %35 = math.exp %34 : vector<16x8x8xf32>
    %cst_13 = arith.constant dense<0.000000e+00> : vector<16x8xf32>
    %36 = vector.multi_reduction <add>, %35, %cst_13 [2] : vector<16x8x8xf32> to vector<16x8xf32>
    %37 = vector.shape_cast %36 : vector<16x8xf32> to vector<16x8x1xf32>
    %38 = tpu.reciprocal %37 {approx = true} : vector<16x8x1xf32> -> vector<16x8x1xf32>
    %39 = vector.broadcast %38 : vector<16x8x1xf32> to vector<16x8x8xf32>
    %40 = arith.mulf %35, %39 : vector<16x8x8xf32>
    %41 = arith.truncf %40 : vector<16x8x8xf32> to vector<16x8x8xbf16>
    "tpu.trace_start"() <{level = 10 : i32, message = "nts,nsd->ntd"}> : () -> ()
    %cst_14 = arith.constant dense<0.000000e+00> : vector<16x8x8xf32>
    %42 = tpu.matmul %41, %29, %cst_14 {dimension_numbers = #tpu.dot_dimension_numbers<[2], [1], [1], [2], [0, 0, 0, 1, 1, 2], [0], [0]>} : vector<16x8x8xbf16>, vector<16x8x8xbf16>, vector<16x8x8xf32> -> vector<16x8x8xf32>
    "tpu.trace_stop"() : () -> ()
    %43 = vector.extract_strided_slice %10 {offsets = [0, 0, 16], sizes = [16, 8, 8], strides = [1, 1, 1]} : vector<16x8x96xbf16> to vector<16x8x8xbf16>
    %44 = vector.extract_strided_slice %10 {offsets = [0, 0, 48], sizes = [16, 8, 8], strides = [1, 1, 1]} : vector<16x8x96xbf16> to vector<16x8x8xbf16>
    %45 = vector.extract_strided_slice %10 {offsets = [0, 0, 80], sizes = [16, 8, 8], strides = [1, 1, 1]} : vector<16x8x96xbf16> to vector<16x8x8xbf16>
    "tpu.trace_start"() <{level = 10 : i32, message = "ntd,nsd->nts"}> : () -> ()
    %cst_15 = arith.constant dense<0.000000e+00> : vector<16x8x8xf32>
    %46 = tpu.matmul %43, %44, %cst_15 {dimension_numbers = #tpu.dot_dimension_numbers<[2], [2], [1], [1], [0, 0, 0, 1, 1, 1], [0], [0]>} : vector<16x8x8xbf16>, vector<16x8x8xbf16>, vector<16x8x8xf32> -> vector<16x8x8xf32>
    "tpu.trace_stop"() : () -> ()
    %cst_16 = arith.constant dense<0xFF800000> : vector<16x8xf32>
    %47 = vector.multi_reduction <maximumf>, %46, %cst_16 [2] : vector<16x8x8xf32> to vector<16x8xf32>
    %48 = vector.shape_cast %47 : vector<16x8xf32> to vector<16x8x1xf32>
    %49 = vector.broadcast %48 : vector<16x8x1xf32> to vector<16x8x8xf32>
    %50 = arith.subf %46, %49 : vector<16x8x8xf32>
    %51 = math.exp %50 : vector<16x8x8xf32>
    %cst_17 = arith.constant dense<0.000000e+00> : vector<16x8xf32>
    %52 = vector.multi_reduction <add>, %51, %cst_17 [2] : vector<16x8x8xf32> to vector<16x8xf32>
    %53 = vector.shape_cast %52 : vector<16x8xf32> to vector<16x8x1xf32>
    %54 = tpu.reciprocal %53 {approx = true} : vector<16x8x1xf32> -> vector<16x8x1xf32>
    %55 = vector.broadcast %54 : vector<16x8x1xf32> to vector<16x8x8xf32>
    %56 = arith.mulf %51, %55 : vector<16x8x8xf32>
    %57 = arith.truncf %56 : vector<16x8x8xf32> to vector<16x8x8xbf16>
    "tpu.trace_start"() <{level = 10 : i32, message = "nts,nsd->ntd"}> : () -> ()
    %cst_18 = arith.constant dense<0.000000e+00> : vector<16x8x8xf32>
    %58 = tpu.matmul %57, %45, %cst_18 {dimension_numbers = #tpu.dot_dimension_numbers<[2], [1], [1], [2], [0, 0, 0, 1, 1, 2], [0], [0]>} : vector<16x8x8xbf16>, vector<16x8x8xbf16>, vector<16x8x8xf32> -> vector<16x8x8xf32>
    "tpu.trace_stop"() : () -> ()
    %59 = vector.extract_strided_slice %10 {offsets = [0, 0, 24], sizes = [16, 8, 8], strides = [1, 1, 1]} : vector<16x8x96xbf16> to vector<16x8x8xbf16>
    %60 = vector.extract_strided_slice %10 {offsets = [0, 0, 56], sizes = [16, 8, 8], strides = [1, 1, 1]} : vector<16x8x96xbf16> to vector<16x8x8xbf16>
    %61 = vector.extract_strided_slice %10 {offsets = [0, 0, 88], sizes = [16, 8, 8], strides = [1, 1, 1]} : vector<16x8x96xbf16> to vector<16x8x8xbf16>
    "tpu.trace_start"() <{level = 10 : i32, message = "ntd,nsd->nts"}> : () -> ()
    %cst_19 = arith.constant dense<0.000000e+00> : vector<16x8x8xf32>
    %62 = tpu.matmul %59, %60, %cst_19 {dimension_numbers = #tpu.dot_dimension_numbers<[2], [2], [1], [1], [0, 0, 0, 1, 1, 1], [0], [0]>} : vector<16x8x8xbf16>, vector<16x8x8xbf16>, vector<16x8x8xf32> -> vector<16x8x8xf32>
    "tpu.trace_stop"() : () -> ()
    %cst_20 = arith.constant dense<0xFF800000> : vector<16x8xf32>
    %63 = vector.multi_reduction <maximumf>, %62, %cst_20 [2] : vector<16x8x8xf32> to vector<16x8xf32>
    %64 = vector.shape_cast %63 : vector<16x8xf32> to vector<16x8x1xf32>
    %65 = vector.broadcast %64 : vector<16x8x1xf32> to vector<16x8x8xf32>
    %66 = arith.subf %62, %65 : vector<16x8x8xf32>
    %67 = math.exp %66 : vector<16x8x8xf32>
    %cst_21 = arith.constant dense<0.000000e+00> : vector<16x8xf32>
    %68 = vector.multi_reduction <add>, %67, %cst_21 [2] : vector<16x8x8xf32> to vector<16x8xf32>
    %69 = vector.shape_cast %68 : vector<16x8xf32> to vector<16x8x1xf32>
    %70 = tpu.reciprocal %69 {approx = true} : vector<16x8x1xf32> -> vector<16x8x1xf32>
    %71 = vector.broadcast %70 : vector<16x8x1xf32> to vector<16x8x8xf32>
    %72 = arith.mulf %67, %71 : vector<16x8x8xf32>
    %73 = arith.truncf %72 : vector<16x8x8xf32> to vector<16x8x8xbf16>
    "tpu.trace_start"() <{level = 10 : i32, message = "nts,nsd->ntd"}> : () -> ()
    %cst_22 = arith.constant dense<0.000000e+00> : vector<16x8x8xf32>
    %74 = tpu.matmul %73, %61, %cst_22 {dimension_numbers = #tpu.dot_dimension_numbers<[2], [1], [1], [2], [0, 0, 0, 1, 1, 2], [0], [0]>} : vector<16x8x8xbf16>, vector<16x8x8xbf16>, vector<16x8x8xf32> -> vector<16x8x8xf32>
    "tpu.trace_stop"() : () -> ()
    %75 = tpu.concatenate %26, %42, %58, %74 in 2 : vector<16x8x8xf32>, vector<16x8x8xf32>, vector<16x8x8xf32>, vector<16x8x8xf32> -> vector<16x8x32xf32>
    %76 = arith.addf %75, %1 : vector<16x8x32xf32>
    %cst_23 = arith.constant dense<0.000000e+00> : vector<16x8xf32>
    %77 = vector.multi_reduction <add>, %76, %cst_23 [2] : vector<16x8x32xf32> to vector<16x8xf32>
    %78 = vector.shape_cast %77 : vector<16x8xf32> to vector<16x8x1xf32>
    %cst_24 = arith.constant 3.200000e+01 : f32
    %79 = vector.broadcast %cst_24 : f32 to vector<16x8x1xf32>
    %80 = arith.divf %78, %79 : vector<16x8x1xf32>
    %81 = arith.mulf %76, %76 : vector<16x8x32xf32>
    %cst_25 = arith.constant dense<0.000000e+00> : vector<16x8xf32>
    %82 = vector.multi_reduction <add>, %81, %cst_25 [2] : vector<16x8x32xf32> to vector<16x8xf32>
    %83 = vector.shape_cast %82 : vector<16x8xf32> to vector<16x8x1xf32>
    %cst_26 = arith.constant 3.200000e+01 : f32
    %84 = vector.broadcast %cst_26 : f32 to vector<16x8x1xf32>
    %85 = arith.divf %83, %84 : vector<16x8x1xf32>
    %86 = arith.mulf %80, %80 : vector<16x8x1xf32>
    %87 = arith.subf %85, %86 : vector<16x8x1xf32>
    %88 = vector.broadcast %80 : vector<16x8x1xf32> to vector<16x8x32xf32>
    %89 = arith.subf %76, %88 : vector<16x8x32xf32>
    %cst_27 = arith.constant 9.99999974E-6 : f32
    %90 = vector.broadcast %cst_27 : f32 to vector<16x8x1xf32>
    %91 = arith.addf %87, %90 : vector<16x8x1xf32>
    %92 = math.rsqrt %91 : vector<16x8x1xf32>
    %93 = vector.broadcast %92 : vector<16x8x1xf32> to vector<16x8x32xf32>
    %94 = arith.mulf %89, %93 : vector<16x8x32xf32>
    %c0_28 = arith.constant 0 : index
    %c0_29 = arith.constant 0 : index
    %95 = vector.load %arg4[%c0_28, %c0_29] : memref<1x32xf32, #tpu.memory_space<vmem>>, vector<1x32xf32>
    %96 = vector.shape_cast %95 : vector<1x32xf32> to vector<1x1x32xf32>
    %97 = vector.broadcast %96 : vector<1x1x32xf32> to vector<16x8x32xf32>
    %98 = arith.mulf %94, %97 : vector<16x8x32xf32>
    %c0_30 = arith.constant 0 : index
    %c0_31 = arith.constant 0 : index
    %99 = vector.load %arg5[%c0_30, %c0_31] : memref<1x32xf32, #tpu.memory_space<vmem>>, vector<1x32xf32>
    %100 = vector.shape_cast %99 : vector<1x32xf32> to vector<1x1x32xf32>
    %101 = vector.broadcast %100 : vector<1x1x32xf32> to vector<16x8x32xf32>
    %102 = arith.addf %98, %101 : vector<16x8x32xf32>
    %c0_32 = arith.constant 0 : index
    %c0_33 = arith.constant 0 : index
    %c0_34 = arith.constant 0 : index
    %c0_35 = arith.constant 0 : index
    %103 = vector.load %arg6[%c0_32, %c0_33, %c0_34, %c0_35] : memref<1x16x8x32xf32, #tpu.memory_space<vmem>>, vector<1x16x8x32xf32>
    %104 = vector.shape_cast %103 : vector<1x16x8x32xf32> to vector<16x8x32xf32>
    %105 = vector.shape_cast %102 : vector<16x8x32xf32> to vector<1x16x8x32xf32>
    tpu.vector_store %arg6[%c0_32, %c0_33, %c0_34, %c0_35], %105 {strides = array<i32>} : memref<1x16x8x32xf32, #tpu.memory_space<vmem>>, vector<1x16x8x32xf32>,
    return
  }
  func.func @transform_0(%arg0: i32) -> (i32, i32, i32, i32) {
    %c0_i32 = arith.constant 0 : i32
    %c0_i32_0 = arith.constant 0 : i32
    %c0_i32_1 = arith.constant 0 : i32
    %c0_i32_2 = arith.constant 0 : i32
    return %arg0, %c0_i32, %c0_i32_0, %c0_i32_1 : i32, i32, i32, i32
  }
  func.func @transform_1(%arg0: i32) -> (i32, i32) {
    %c0_i32 = arith.constant 0 : i32
    %c0_i32_0 = arith.constant 0 : i32
    %c0_i32_1 = arith.constant 0 : i32
    return %c0_i32, %c0_i32_0 : i32, i32
  }
  func.func @transform_2(%arg0: i32) -> (i32, i32) {
    %c0_i32 = arith.constant 0 : i32
    %c0_i32_0 = arith.constant 0 : i32
    %c0_i32_1 = arith.constant 0 : i32
    return %c0_i32, %c0_i32_0 : i32, i32
  }
  func.func @transform_3(%arg0: i32) -> (i32, i32) {
    %c0_i32 = arith.constant 0 : i32
    %c0_i32_0 = arith.constant 0 : i32
    %c0_i32_1 = arith.constant 0 : i32
    return %c0_i32, %c0_i32_0 : i32, i32
  }
  func.func @transform_4(%arg0: i32) -> (i32, i32) {
    %c0_i32 = arith.constant 0 : i32
    %c0_i32_0 = arith.constant 0 : i32
    %c0_i32_1 = arith.constant 0 : i32
    return %c0_i32, %c0_i32_0 : i32, i32
  }
  func.func @transform_5(%arg0: i32) -> (i32, i32, i32, i32) {
    %c0_i32 = arith.constant 0 : i32
    %c0_i32_0 = arith.constant 0 : i32
    %c0_i32_1 = arith.constant 0 : i32
    %c0_i32_2 = arith.constant 0 : i32
    return %arg0, %c0_i32, %c0_i32_0, %c0_i32_1 : i32, i32, i32, i32
  }
}

</mosaic_0001>

<bundles_post_ra>
// kernel: tpu_custom_call.1
= control target key start
LH: loop header
LB: loop body
LE: loop exit
PB: predicated region body
PF: predicated region fallthrough
CT: control target
= control target key end

     0   :  { %10 = vsyncpa [#allocation3], 0  ;;  %s12562_s0 = inlined_call_operand.hbm [shape: f32[2,16,8,32], index: 0, kind: input, shape index: {}]   ;;  %s12563_s1 = inlined_call_operand.hbm [shape: bf16[32,96], index: 1, kind: input, shape index: {}]   ;;  %s12564_s2 = inlined_call_operand.vmem [shape: f32[1,96], index: 2, kind: input, shape index: {}]   ;;  %s12565_s3 = inlined_call_operand.vmem [shape: f32[1,32], index: 3, kind: input, shape index: {}]   ;;  %s12566_s4 = inlined_call_operand.vmem [shape: f32[1,32], index: 4, kind: input, shape index: {}]   ;;  %s12567_s5 = inlined_call_operand.hbm [shape: f32[2,16,8,32], index: 5, kind: output, shape index: {}]  }
   0x1   :  { %12 = vsyncpa [#allocation3 + $0x1], 0 }
   0x2   :  { %13 = vsyncpa [#allocation6], 0 }
   0x3   :  { %14 = vsyncpa [#allocation4], 0 }
   0x4   :  { %16 = vsyncpa [#allocation4 + $0x1], 0  ;;  %s9951_s18 = smov 0   ;;  %s9953_s19 = smov 0  }
   0x5   :  { %s9955_s20 = smov 0   ;;  %s9957_s21 = smov 0  }
   0x6 LB: > { %s9972_s22 = sadd.s32 4294967295, %s9895_s21   ;;  %s8144_s23 = sadd.s32 4294967294, %s9895_s21   ;;  %s9895_s21 = sphi %s9957_s21, %s12638_s21   ;;  %s9891_s20 = sphi %s9955_s20, %s12637_s20   ;;  %s9887_s19 = sphi %s9953_s19, %s12636_s19   ;;  %s9883_s18 = sphi %s9951_s18, %s12635_s18  }
   0x7   : > { %p42_p0 = scmp.ne.s32.totalorder %s9887_s19, %s9883_s18  ;;  %p12568_p1 = scmp.eq.s32.totalorder %s9972_s22, 0 }
   0x8   : > { %p156_p3 = scmp.eq.s32.totalorder %s8144_s23, 1  ;;  %p8145_p5 = scmp.ge.s32.totalorder %s9895_s21, 1 }
   0x9   : > { %p9981_p4 = por %p12568_p1, %p42_p0  ;;  %p163_p7 = scmp.lt.s32.totalorder %s9895_s21, 3 }
   0xa   : > { %p9986_p6 = por %p156_p3, %p42_p0  ;;  %s9897_s27 = smov [#allocation5]  }
   0xb   : > { %s12574_s24 = scalar_select %p9981_p4, 1, 0 }
   0xc   : > { %s12575_s25 = scalar_select %p9986_p6, 1, 0 }
   0xd   : > { %p9991_p8 = pnand %p8145_p5, %p163_p7  ;;  %s175_s28 = sshll.u32 %s9897_s27, 4  ;;  %s176_s28 = int_to_ptr.vmem [resolvable:$true] %s175_s28 }
   0xe   : > { %s10005_s30 = sadd.s32 1, %s9895_s21   ;;  %s29_s6 = sadd.s32 1, %s9891_s20 }
   0xf   : > { %s12576_s26 = scalar_select %p9991_p8, 1, 0 }
  0x10   : > { %p9397_p9 = pneg %p9991_p8  ;;  %s26_s7 = ssub.s32 %s9895_s21, %s10005_s30 }
  0x11   : > { %s9784_s8 = scalar_lea.vmem %s176_s28, 256  ;;  %p9792_p5 = scmp.lt.s32.totalorder %s176_s28, %s176_s28 }
  0x12   : > { %p10000_p11 = pnand %p9397_p9, %p12568_p1  ;;  %p9785_p13 = scmp.ne.s32.totalorder %s176_s28, %s9784_s8 }
  0x13   : > { %p9793_p7 = scmp.lt.s32.totalorder %s9784_s8, %s9784_s8 }
  0x14   : > { %p9775_p12 = pneg %p10000_p11 }
  0x15   : > { %p9794_p10 = por %p9793_p7, %p9792_p5 }
  0x16   : > { %p9787_p0 = pnand %p9785_p13, %p9775_p12 }
  0x18   : > { %p9788_p3 = pneg %p9787_p0 }
  0x1a   : > { %p9795_p2 = pnand %p9794_p10, %p9788_p3 }
  0x1c   : > { %9798 = shalt.err (!%p9795_p2)
}
  0x1d   : > { %s9898_s9 = smov 64   ;;  %s9899_s10 = smov 4  }
  0x1e   : > { %9400 = dma.hbm_to_vmem [thread:$0]  (!%p10000_p11), %s12563_s1, 256, %s176_s28, [#allocation6], %s9898_s9, %s9898_s9, %s9899_s10  }
  0x1f   : > { %p27_p9 = scmp.eq.s32.totalorder %s26_s7, 0  ;;  %p36_p12 = scmp.ne.s32.totalorder %s9891_s20, %s9887_s19 }
  0x20   : > { %p37_p10 = scmp.eq.s32.totalorder %s9895_s21, 0  ;;  %p9410_p2 = scmp.lt.s32.totalorder %s9895_s21, 2 }
  0x21   : > { %s10022_s13 = scalar_select %p27_p9, %s9891_s20, %s29_s6  }
  0x22   : > { %p38_p13 = por %p37_p10, %p36_p12  ;;  %p12578_p0 = scmp.eq.s32.totalorder %s9972_s22, 1 }
  0x23   : > { %s198_s15 = sand.u32 1, %s9891_s20   ;;  %s8317_s16 = sshll.u32 %s9895_s21, 11 }
  0x24   : > { %p10026_p3 = por %p12578_p0, %p36_p12  ;;  %s8148_s17 = sshll.u32 %s198_s15, 7 }
  0x25   : > { %s10035_s29 = scalar_lea.hbm %s12562_s0, %s8317_s16  ;;  %s202_s28 = scalar_lea.vmem [#allocation2], %s8148_s17 }
  0x26   : > { %s12579_s14 = scalar_select %p10026_p3, 1, 0 }
  0x27   : > { %s209_s6 = sshll.u32 %s202_s28, 4  ;;  %p10037_p11 = pnand %p9410_p2, %p38_p13  ;;  %s10041_s6 = int_to_ptr.vmem [resolvable:$true] %s209_s6 }
  0x28   : > { %s10043_s8 = scalar_lea.sflag [#allocation3], %s198_s15  ;;  %s9799_s9 = scalar_lea.hbm %s10035_s29, 2048 }
  0x29   : > { %p9800_p5 = scmp.ne.s32.totalorder %s10035_s29, %s9799_s9  ;;  %p9801_p7 = pneg %p10037_p11 }
  0x2a   : > { %s9804_s12 = scalar_lea.hbm %s12562_s0, 4096  ;;  %p9805_p10 = scmp.lt.s32.totalorder %s10035_s29, %s12562_s0 }
  0x2b   : > { %p9802_p9 = pnand %p9801_p7, %p9800_p5  ;;  %p9806_p2 = scmp.lt.s32.totalorder %s9804_s12, %s9799_s9 }
  0x2d   : > { %p9803_p12 = pneg %p9802_p9  ;;  %p9807_p13 = por %p9806_p2, %p9805_p10 }
  0x2f   : > { %p9808_p0 = pnand %p9807_p13, %p9803_p12 }
  0x31   : > { %9811 = shalt.err (!%p9808_p0)
}
  0x32   : > { %s9812_s15 = scalar_lea.vmem %s10041_s6, 2048  ;;  %s9900_s23 = smov [#allocation2]  }
  0x33   : > { %p9813_p1 = scmp.ne.s32.totalorder %s10041_s6, %s9812_s15  ;;  %s9817_s27 = sshll.u32 %s9900_s23, 4  ;;  %s9818_s27 = int_to_ptr.vmem [resolvable:$false] %s9817_s27 }
  0x34   : > { %s9819_s28 = scalar_lea.vmem %s9818_s27, 4096  ;;  %p9820_p9 = scmp.lt.s32.totalorder %s10041_s6, %s9818_s27 }
  0x35   : > { %p9815_p6 = pnand %p9813_p1, %p9801_p7  ;;  %p9821_p3 = scmp.lt.s32.totalorder %s9819_s28, %s9812_s15 }
  0x37   : > { %p9816_p5 = pneg %p9815_p6  ;;  %p9822_p4 = por %p9821_p3, %p9820_p9 }
  0x39   : > { %p9823_p8 = pnand %p9822_p4, %p9816_p5 }
  0x3b   : > { %9826 = shalt.err (!%p9823_p8)
}
  0x3c   : > { %s9901_s9 = smov 128   ;;  %s9902_s10 = smov 8  }
  0x3d   : > { %9404 = dma.hbm_to_vmem [thread:$0]  (!%p10037_p11), %s10035_s29, 2048, %s10041_s6, %s10043_s8, %s9901_s9, %s9901_s9, %s9902_s10  }
  0x3e   : > { %p12581_p1 = scmp.ne.s32.totalorder %s12576_s26, 0 }
  0x40   : > { %221 = sbr.rel (%p12581_p1) target bundleno = 3373 (0xd2d), region = 40 }
  0x45   : > { %s10067_s11 = sand.u32 1, %s9887_s19   ;;  %p12582_p4 = scmp.ne.s32.totalorder %s12574_s24, 0 }
  0x46   : > { %s8152_s12 = sshll.u32 %s10067_s11, 7  ;;  %s224_s16 = scalar_lea.sflag [#allocation3], %s10067_s11 }
  0x47   : > { %s10073_s17 = scalar_lea.vmem [#allocation2], %s8152_s12 }
  0x48   : > { %9870 = dma.done.wait (%p12582_p4), %s224_s16, 2048  }
  0x49   : > { %9872 = vsyncadd (%p12582_p4), %s224_s16, 4294965248  ;;  %p12583_p6 = scmp.eq.s32.totalorder %s9972_s22, 0 }
  0x4b   : > { %9874 = dma.done.wait (%p12583_p6), [#allocation6], 256   ;;  %p12584_p8 = pmov %p12583_p6 }
  0x4c   : > { %v9467_v0 = vld [vmem:[#allocation5 + $0x8] sm:$0xff]   ;;  %v9468_v1 = vld [vmem:[#allocation5] sm:$0xff]   ;;  %vm306_vm0 = vcmask 261120   ;;  %v261_v5 = vld [vmem:[%s10073_s17 + $0x10] sm:$0xff]  ;;  %v12572_v26 = vmov 0.0   ;;  %vm9904_vm1 = vmmov 0  }
  0x4d   : > { %9876 = vsyncadd (%p12584_p8), [#allocation6], 4294967040  ;;  %8601 = vmatprep.subr.bf16.mxu0 %v9467_v0  ;;  %v259_v2 = vld [vmem:[%s10073_s17] sm:$0xff]  ;;  %v260_v3 = vld [vmem:[%s10073_s17 + $0x8] sm:$0xff]  ;;  %8621 = vmatprep.subr.bf16.mxu1 %v12572_v26  ;;  %s9905_s29 = smov 96   ;;  %s9906_s6 = smov 64  }
  0x4e   : > { %8602 = vmatpush3.bf16.msra.mxu0 %v9467_v0  ;;  %v275_v4 = vpack.c.bf16 %v260_v3, %v259_v2  ;;  %v262_v6 = vld [vmem:[%s10073_s17 + $0x18] sm:$0xff]  ;;  %v263_v7 = vld [vmem:[%s10073_s17 + $0x20] sm:$0xff]  ;;  %v264_v8 = vld [vmem:[%s10073_s17 + $0x28] sm:$0xff]  ;;  %8623 = vmatprep.mubr.msk.bf16.mxu1 %vm9904_vm1, %v12572_v26  ;;  %vm478_vm2 = vcmask 64512   ;;  %vm1442_vm3 = vcmask 1043456   ;;  %s9907_s7 = smov 88  }
  0x4f   : > { %8603 = vmatprep.subr.bf16.mxu0 %v9468_v1  ;;  %v276_v9 = vpack.c.bf16 %v262_v6, %v261_v5  ;;  %v277_v10 = vpack.c.bf16 %v264_v8, %v263_v7  ;;  %v265_v11 = vld [vmem:[%s10073_s17 + $0x30] sm:$0xff]  ;;  %v266_v12 = vld [vmem:[%s10073_s17 + $0x38] sm:$0xff]  ;;  %v267_v13 = vld [vmem:[%s10073_s17 + $0x40] sm:$0xff]  ;;  %s9908_s8 = smov 120   ;;  %s9909_s15 = smov 56   ;;  %vm7694_vm4 = vcmask 130048  }
  0x50   : > { %8605 = vmatprep.mubr.msk.bf16.mxu0 %vm306_vm0, %v275_v4  ;;  %v268_v14 = vld [vmem:[%s10073_s17 + $0x48] sm:$0xff]  ;;  %v278_v15 = vpack.c.bf16 %v266_v12, %v265_v11  ;;  %v269_v17 = vld [vmem:[%s10073_s17 + $0x50] sm:$0xff]  ;;  %v270_v18 = vld [vmem:[%s10073_s17 + $0x58] sm:$0xff]  ;;  %s9910_s23 = smov 80   ;;  %s9911_s27 = smov 112   ;;  %vm7711_vm5 = vcmask 195584  }
  0x51   : > { %v279_v16 = vpack.c.bf16 %v268_v14, %v267_v13  ;;  %v271_v19 = vld [vmem:[%s10073_s17 + $0x60] sm:$0xff]  ;;  %v272_v20 = vld [vmem:[%s10073_s17 + $0x68] sm:$0xff]  ;;  %v280_v21 = vpack.c.bf16 %v270_v18, %v269_v17  ;;  %v273_v23 = vld [vmem:[%s10073_s17 + $0x70] sm:$0xff]  ;;  %s9912_s28 = smov 48   ;;  %s9913_s9 = smov 72  }
  0x52   : > { %8604 = vmatpush3.bf16.msra.mxu0 %v9468_v1  ;;  %v281_v22 = vpack.c.bf16 %v272_v20, %v271_v19  ;;  %v274_v24 = vld [vmem:[%s10073_s17 + $0x78] sm:$0xff]  ;;  %v8155_v27 = vld [vmem:[%s12564_s2] ss:$0 sm:$0xff]  ;;  %s9914_s10 = smov 104   ;;  %s9915_s16 = smov 40  }
  0x53   : > { %v282_v25 = vpack.c.bf16 %v274_v24, %v273_v23  ;;  %8645 = vmatprep.subr.bf16.mxu0 %v12572_v26  ;;  %s9916_s24 = smov 8   ;;  %s9917_s26 = smov 16  }
  0x54   : > { %p12632_p11 = scmp.ne.s32.totalorder %s12579_s14, 0 }
  0x55   : > { %8606 = vmatmul.mubr.msk.bf16.vlgmr.msra.gmra.mxu0 %vm306_vm0, %v276_v9 }
  0x56   : > { %8609 = vmatprep.mubr.msk.bf16.mxu0 %vm306_vm0, %v277_v10 }
  0x5d   : > { %8610 = vmatmul.mubr.msk.bf16.gmra.mxu0 %vm306_vm0, %v278_v15 }
  0x5e   : > { %8613 = vmatprep.mubr.msk.bf16.mxu0 %vm306_vm0, %v279_v16 }
  0x65   : > { %8614 = vmatmul.mubr.msk.bf16.gmra.mxu0 %vm306_vm0, %v280_v21 }
  0x66   : > { %8617 = vmatprep.mubr.msk.bf16.mxu0 %vm306_vm0, %v281_v22 }
  0x6d   : > { %8618 = vmatmul.mubr.msk.bf16.gmra.mxu0 %vm306_vm0, %v282_v25 }
  0x6e   : > { %8647 = vmatprep.mubr.msk.bf16.mxu0 %vm9904_vm1, %v12572_v26 }
 0x115   : > { %v8607_v28 = vpop.f32.mrf.mxu0 }
 0x116   : > { %v374_v29 = vadd.f32 %v8607_v28, %v8155_v27 }
 0x117   : > { %v365_v30 = vpop.f32.mrf.mxu0 }
 0x118   : > { %v10116_v31 = vpack.c.bf16 %v374_v29, %v374_v29  ;;  %v366_v32 = vadd.f32 %v8155_v27, %v365_v30 }
 0x119   : > { %v8608_v33 = vpop.f32.mrf.mxu0 }
 0x11a   : > { %v10118_v34 = vpack.c.bf16 %v366_v32, %v366_v32  ;;  %v377_v35 = vadd.f32 %v8608_v33, %v8155_v27  ;;  %573 = vrot.lane.b32.xlu1 %v10116_v31, %s9905_s29 }
 0x11b   : > { %v368_v36 = vpop.f32.mrf.mxu0 }
 0x11c   : > { %v10122_v37 = vpack.c.bf16 %v377_v35, %v377_v35  ;;  %v369_v38 = vadd.f32 %v8155_v27, %v368_v36  ;;  %476 = vrot.lane.b32.xlu0 %v10118_v34, %s9905_s29 }
 0x11d   : > { %v8611_v39 = vpop.f32.mrf.mxu0 }
 0x11e   : > { %v10126_v40 = vpack.c.bf16 %v369_v38, %v369_v38  ;;  %621 = vrot.lane.b32.xlu1 %v10122_v37, %s9905_s29  ;;  %v390_v42 = vadd.f32 %v8611_v39, %v8155_v27 }
 0x11f   : > { %v381_v41 = vpop.f32.mrf.mxu0 }
 0x120   : > { %v382_v43 = vadd.f32 %v8155_v27, %v381_v41  ;;  %525 = vrot.lane.b32.xlu0 %v10126_v40, %s9905_s29  ;;  %v10134_v47 = vpack.c.bf16 %v390_v42, %v390_v42 }
 0x121   : > { %v8612_v44 = vpop.f32.mrf.mxu0 }
 0x122   : > { %v10132_v45 = vpack.c.bf16 %v382_v43, %v382_v43  ;;  %v393_v48 = vadd.f32 %v8612_v44, %v8155_v27 }
 0x123   : > { %v384_v46 = vpop.f32.mrf.mxu0 }
 0x124   : > { %v385_v49 = vadd.f32 %v8155_v27, %v384_v46  ;;  %669 = vrot.lane.b32.xlu0 %v10132_v45, %s9905_s29  ;;  %v10140_v53 = vpack.c.bf16 %v393_v48, %v393_v48 }
 0x125   : > { %v8615_v50 = vpop.f32.mrf.mxu0 }
 0x126   : > { %v10138_v51 = vpack.c.bf16 %v385_v49, %v385_v49  ;;  %v406_v54 = vadd.f32 %v8615_v50, %v8155_v27 }
 0x127   : > { %v397_v52 = vpop.f32.mrf.mxu0 }
 0x128   : > { %v398_v55 = vadd.f32 %v8155_v27, %v397_v52  ;;  %717 = vrot.lane.b32.xlu1 %v10138_v51, %s9905_s29  ;;  %765 = vrot.lane.b32.xlu0 %v10134_v47, %s9905_s29  ;;  %v10148_v59 = vpack.c.bf16 %v406_v54, %v406_v54 }
 0x129   : > { %v8616_v56 = vpop.f32.mrf.mxu0 }
 0x12a   : > { %v10146_v57 = vpack.c.bf16 %v398_v55, %v398_v55  ;;  %v409_v60 = vadd.f32 %v8616_v56, %v8155_v27 }
 0x12b   : > { %v400_v58 = vpop.f32.mrf.mxu0 }
 0x12c   : > { %v401_v61 = vadd.f32 %v8155_v27, %v400_v58  ;;  %813 = vrot.lane.b32.xlu1 %v10140_v53, %s9905_s29  ;;  %861 = vrot.lane.b32.xlu0 %v10146_v57, %s9905_s29  ;;  %v10156_v1 = vpack.c.bf16 %v409_v60, %v409_v60 }
 0x12d   : > { %v8619_v62 = vpop.f32.mrf.mxu0 }
 0x12e   : > { %v10154_v63 = vpack.c.bf16 %v401_v61, %v401_v61  ;;  %v422_v2 = vadd.f32 %v8619_v62, %v8155_v27 }
 0x12f   : > { %v413_v0 = vpop.f32.mrf.mxu0 }
 0x130   : > { %v414_v3 = vadd.f32 %v8155_v27, %v413_v0  ;;  %909 = vrot.lane.b32.xlu1 %v10154_v63, %s9905_s29  ;;  %957 = vrot.lane.b32.xlu0 %v10148_v59, %s9905_s29  ;;  %v10164_v7 = vpack.c.bf16 %v422_v2, %v422_v2 }
 0x131   : > { %v8620_v4 = vpop.f32.mrf.mxu0 }
 0x132   : > { %v10162_v5 = vpack.c.bf16 %v414_v3, %v414_v3  ;;  %v425_v8 = vadd.f32 %v8620_v4, %v8155_v27 }
 0x133   : > { %v416_v6 = vpop.f32.mrf.mxu0 }
 0x134   : > { %v417_v9 = vadd.f32 %v8155_v27, %v416_v6  ;;  %1005 = vrot.lane.b32.xlu1 %v10156_v1, %s9905_s29  ;;  %1053 = vrot.lane.b32.xlu0 %v10162_v5, %s9905_s29  ;;  %v10172_v11 = vpack.c.bf16 %v425_v8, %v425_v8 }
 0x136   : > { %v10170_v10 = vpack.c.bf16 %v417_v9, %v417_v9 }
 0x138   : > { %1101 = vrot.lane.b32.xlu1 %v10170_v10, %s9905_s29  ;;  %1149 = vrot.lane.b32.xlu0 %v10164_v7, %s9905_s29 }
 0x13c   : > { %1197 = vrot.lane.b32.xlu1 %v10172_v11, %s9905_s29  ;;  %1486 = vrot.lane.b32.xlu0 %v10126_v40, %s9906_s6  ;;  %s9918_s29 = smov 24  }
 0x140   : > { %1437 = vrot.lane.b32.xlu1 %v10118_v34, %s9906_s6  ;;  %1582 = vrot.lane.b32.xlu0 %v10122_v37, %s9906_s6 }
 0x144   : > { %1534 = vrot.lane.b32.xlu1 %v10116_v31, %s9906_s6  ;;  %1678 = vrot.lane.b32.xlu0 %v10138_v51, %s9906_s6 }
 0x148   : > { %1630 = vrot.lane.b32.xlu1 %v10132_v45, %s9906_s6  ;;  %1774 = vrot.lane.b32.xlu0 %v10140_v53, %s9906_s6 }
 0x14c   : > { %1726 = vrot.lane.b32.xlu1 %v10134_v47, %s9906_s6  ;;  %1870 = vrot.lane.b32.xlu0 %v10154_v63, %s9906_s6 }
 0x150   : > { %1822 = vrot.lane.b32.xlu1 %v10146_v57, %s9906_s6 }
 0x154   : > { %1918 = vrot.lane.b32.xlu1 %v10148_v59, %s9906_s6 }
 0x18c   : > { %v574_v15 = vpop.permute.xlu1 %573 }
 0x18d   : > { %v579_v22 = vsel %vm478_vm2, %v574_v15, 0 }
 0x18e   : > { %v477_v12 = vpop.permute.xlu0 %476 }
 0x18f   : > { %v483_v13 = vsel %vm478_vm2, %v477_v12, 0 }
 0x190   : > { %8622 = vmatpush3.bf16.xpose.msra.mxu1 %v483_v13  ;;  %v622_v19 = vpop.permute.xlu1 %621 }
 0x191   : > { %8627 = vmatprep.subr.bf16.mxu1 %v12572_v26  ;;  %v627_v28 = vsel %vm478_vm2, %v622_v19, 0 }
 0x192   : > { %v526_v14 = vpop.permute.xlu0 %525 }
 0x193   : > { %v531_v17 = vsel %vm478_vm2, %v526_v14, 0 }
 0x196   : > { %v670_v16 = vpop.permute.xlu0 %669 }
 0x197   : > { %v675_v18 = vsel %vm478_vm2, %v670_v16, 0  ;;  %8624 = vmatmul.mubr.msk.bf16.vlgmr.msra.gmra.mxu1 %vm478_vm2, %v10118_v34 }
 0x198   : > { %8628 = vmatpush3.bf16.xpose.msra.mxu1 %v531_v17  ;;  %8646 = vmatpush3.bf16.xpose.msra.mxu0 %v675_v18 }
 0x199   : > { %8629 = vmatprep.mubr.msk.bf16.mxu1 %vm9904_vm1, %v12572_v26  ;;  %8633 = vmatprep.subr.bf16.mxu1 %v12572_v26 }
 0x19a   : > { %8657 = vmatprep.subr.bf16.mxu0 %v12572_v26  ;;  %v766_v20 = vpop.permute.xlu0 %765  ;;  %v718_v23 = vpop.permute.xlu1 %717 }
 0x19b   : > { %v771_v21 = vsel %vm478_vm2, %v766_v20, 0  ;;  %v723_v33 = vsel %vm478_vm2, %v718_v23, 0 }
 0x19e   : > { %v862_v24 = vpop.permute.xlu0 %861  ;;  %v814_v27 = vpop.permute.xlu1 %813 }
 0x19f   : > { %8630 = vmatmul.mubr.msk.bf16.vlgmr.msra.gmra.mxu1 %vm478_vm2, %v10126_v40  ;;  %8648 = vmatmul.mubr.msk.bf16.vlgmr.msra.gmra.mxu0 %vm478_vm2, %v10132_v45  ;;  %v867_v25 = vsel %vm478_vm2, %v862_v24, 0  ;;  %v819_v39 = vsel %vm478_vm2, %v814_v27, 0 }
 0x1a0   : > { %8634 = vmatpush3.bf16.xpose.msra.mxu1 %v579_v22  ;;  %8658 = vmatpush3.bf16.xpose.msra.mxu0 %v771_v21 }
 0x1a1   : > { %8635 = vmatprep.mubr.msk.bf16.mxu1 %vm9904_vm1, %v12572_v26  ;;  %8659 = vmatprep.mubr.msk.bf16.mxu0 %vm9904_vm1, %v12572_v26 }
 0x1a2   : > { %8639 = vmatprep.subr.bf16.mxu1 %v12572_v26  ;;  %8669 = vmatprep.subr.bf16.mxu0 %v12572_v26  ;;  %v910_v29 = vpop.permute.xlu1 %909  ;;  %v958_v30 = vpop.permute.xlu0 %957 }
 0x1a3   : > { %v963_v32 = vsel %vm478_vm2, %v958_v30, 0  ;;  %v915_v46 = vsel %vm478_vm2, %v910_v29, 0 }
 0x1a6   : > { %v1006_v35 = vpop.permute.xlu1 %1005  ;;  %v1054_v36 = vpop.permute.xlu0 %1053 }
 0x1a7   : > { %8636 = vmatmul.mubr.msk.bf16.vlgmr.msra.gmra.mxu1 %vm478_vm2, %v10116_v31  ;;  %8660 = vmatmul.mubr.msk.bf16.vlgmr.msra.gmra.mxu0 %vm478_vm2, %v10134_v47  ;;  %v1059_v38 = vsel %vm478_vm2, %v1054_v36, 0  ;;  %v1011_v49 = vsel %vm478_vm2, %v1006_v35, 0 }
 0x1a8   : > { %8640 = vmatpush3.bf16.xpose.msra.mxu1 %v627_v28  ;;  %8670 = vmatpush3.bf16.xpose.msra.mxu0 %v867_v25 }
 0x1a9   : > { %8641 = vmatprep.mubr.msk.bf16.mxu1 %vm9904_vm1, %v12572_v26  ;;  %8671 = vmatprep.mubr.msk.bf16.mxu0 %vm9904_vm1, %v12572_v26 }
 0x1aa   : > { %8651 = vmatprep.subr.bf16.mxu1 %v12572_v26  ;;  %8681 = vmatprep.subr.bf16.mxu0 %v12572_v26  ;;  %v1102_v41 = vpop.permute.xlu1 %1101  ;;  %v1150_v42 = vpop.permute.xlu0 %1149 }
 0x1ab   : > { %v1155_v43 = vsel %vm478_vm2, %v1150_v42, 0  ;;  %v1107_v52 = vsel %vm478_vm2, %v1102_v41, 0 }
 0x1ae   : > { %v1198_v44 = vpop.permute.xlu1 %1197  ;;  %v1487_v55 = vpop.permute.xlu0 %1486 }
 0x1af   : > { %8642 = vmatmul.mubr.msk.bf16.vlgmr.msra.gmra.mxu1 %vm478_vm2, %v10122_v37  ;;  %8672 = vmatmul.mubr.msk.bf16.vlgmr.msra.gmra.mxu0 %vm478_vm2, %v10146_v57  ;;  %v1203_v54 = vsel %vm478_vm2, %v1198_v44, 0  ;;  %v1492_v56 = vsel %vm1442_vm3, %v1487_v55, 0 }
 0x1b0   : > { %8652 = vmatpush3.bf16.xpose.msra.mxu1 %v723_v33  ;;  %8682 = vmatpush3.bf16.xpose.msra.mxu0 %v963_v32 }
 0x1b1   : > { %8653 = vmatprep.mubr.msk.bf16.mxu1 %vm9904_vm1, %v12572_v26  ;;  %8683 = vmatprep.mubr.msk.bf16.mxu0 %vm9904_vm1, %v12572_v26 }
 0x1b2   : > { %8663 = vmatprep.subr.bf16.mxu1 %v12572_v26  ;;  %8693 = vmatprep.subr.bf16.mxu0 %v12572_v26  ;;  %v1438_v48 = vpop.permute.xlu1 %1437 }
 0x1b3   : > { %v1444_v50 = vsel %vm1442_vm3, %v1438_v48, 0 }
 0x1b7   : > { %8654 = vmatmul.mubr.msk.bf16.vlgmr.msra.gmra.mxu1 %vm478_vm2, %v10138_v51  ;;  %8684 = vmatmul.mubr.msk.bf16.vlgmr.msra.gmra.mxu0 %vm478_vm2, %v10148_v59 }
 0x1b8   : > { %8664 = vmatpush3.bf16.xpose.msra.mxu1 %v819_v39  ;;  %8694 = vmatpush3.bf16.xpose.msra.mxu0 %v1059_v38 }
 0x1b9   : > { %8665 = vmatprep.mubr.msk.bf16.mxu1 %vm9904_vm1, %v12572_v26  ;;  %8695 = vmatprep.mubr.msk.bf16.mxu0 %vm9904_vm1, %v12572_v26 }
 0x1ba   : > { %8675 = vmatprep.subr.bf16.mxu1 %v12572_v26  ;;  %8705 = vmatprep.subr.bf16.mxu0 %v12572_v26 }
 0x1bf   : > { %8666 = vmatmul.mubr.msk.bf16.vlgmr.msra.gmra.mxu1 %vm478_vm2, %v10140_v53  ;;  %8696 = vmatmul.mubr.msk.bf16.vlgmr.msra.gmra.mxu0 %vm478_vm2, %v10162_v5 }
 0x1c0   : > { %8676 = vmatpush3.bf16.xpose.msra.mxu1 %v915_v46  ;;  %8706 = vmatpush3.bf16.xpose.msra.mxu0 %v1155_v43 }
 0x1c1   : > { %8677 = vmatprep.mubr.msk.bf16.mxu1 %vm9904_vm1, %v12572_v26  ;;  %8707 = vmatprep.mubr.msk.bf16.mxu0 %vm9904_vm1, %v12572_v26 }
 0x1c2   : > { %8687 = vmatprep.subr.bf16.mxu1 %v12572_v26  ;;  %8717 = vmatprep.subr.bf16.mxu0 %v12572_v26 }
 0x1c7   : > { %8678 = vmatmul.mubr.msk.bf16.vlgmr.msra.gmra.mxu1 %vm478_vm2, %v10154_v63  ;;  %8708 = vmatmul.mubr.msk.bf16.vlgmr.msra.gmra.mxu0 %vm478_vm2, %v10164_v7 }
 0x1c8   : > { %8688 = vmatpush3.bf16.xpose.msra.mxu1 %v1011_v49  ;;  %8718 = vmatpush3.bf16.msra.mxu0 %v1444_v50 }
 0x1c9   : > { %8689 = vmatprep.mubr.msk.bf16.mxu1 %vm9904_vm1, %v12572_v26  ;;  %8699 = vmatprep.subr.bf16.mxu1 %v12572_v26 }
 0x1ca   : > { %8719 = vmatprep.mubr.msk.bf16.mxu0 %vm9904_vm1, %v12572_v26  ;;  %8729 = vmatprep.subr.bf16.mxu0 %v12572_v26 }
 0x1cf   : > { %8690 = vmatmul.mubr.msk.bf16.vlgmr.msra.gmra.mxu1 %vm478_vm2, %v10156_v1 }
 0x1d0   : > { %8700 = vmatpush3.bf16.xpose.msra.mxu1 %v1107_v52  ;;  %8701 = vmatprep.mubr.msk.bf16.mxu1 %vm9904_vm1, %v12572_v26 }
 0x1d1   : > { %8711 = vmatprep.subr.bf16.mxu1 %v12572_v26 }
 0x1d7   : > { %8702 = vmatmul.mubr.msk.bf16.vlgmr.msra.gmra.mxu1 %vm478_vm2, %v10170_v10 }
 0x1d8   : > { %8712 = vmatpush3.bf16.xpose.msra.mxu1 %v1203_v54  ;;  %8713 = vmatprep.mubr.msk.bf16.mxu1 %vm9904_vm1, %v12572_v26 }
 0x1d9   : > { %8723 = vmatprep.subr.bf16.mxu1 %v12572_v26 }
 0x1df   : > { %8714 = vmatmul.mubr.msk.bf16.vlgmr.msra.gmra.mxu1 %vm478_vm2, %v10172_v11 }
 0x1e0   : > { %8724 = vmatpush3.bf16.msra.mxu1 %v1492_v56  ;;  %8725 = vmatprep.mubr.msk.bf16.mxu1 %vm9904_vm1, %v12572_v26 }
 0x1e1   : > { %8735 = vmatprep.subr.bf16.mxu1 %v12572_v26 }
 0x257   : > { %v10302_v58 = vpop.f32.mrf.mxu1 }
 0x258   : > { %v1245_v60 = vsel %vm478_vm2, %v10302_v58, -inf }
 0x259   : > { %1246 = vmax.xlane.f32.xlu0 %v1245_v60  ;;  %v8625_v61 = vpop.f32.mrf.mxu1 }
 0x25b   : > { %v522_v62 = vpop.f32.mrf.mxu1 }
 0x25d   : > { %v8626_v0 = vpop.f32.mrf.mxu1 }
 0x25f   : > { %v10306_v2 = vpop.f32.mrf.mxu1  ;;  %v10308_v3 = vpop.f32.mrf.mxu0 }
 0x260   : > { %v1248_v4 = vsel %vm478_vm2, %v10306_v2, -inf  ;;  %v1257_v13 = vsel %vm478_vm2, %v10308_v3, -inf }
 0x261   : > { %1249 = vmax.xlane.f32.xlu1 %v1248_v4  ;;  %v8631_v6 = vpop.f32.mrf.mxu1  ;;  %v8649_v8 = vpop.f32.mrf.mxu0 }
 0x263   : > { %v570_v9 = vpop.f32.mrf.mxu1  ;;  %v714_v12 = vpop.f32.mrf.mxu0 }
 0x265   : > { %v8632_v14 = vpop.f32.mrf.mxu1  ;;  %1258 = vmax.xlane.f32.xlu1 %v1257_v13  ;;  %v8650_v15 = vpop.f32.mrf.mxu0 }
 0x267   : > { %v10314_v16 = vpop.f32.mrf.mxu1  ;;  %v10316_v17 = vpop.f32.mrf.mxu0 }
 0x268   : > { %v1251_v18 = vsel %vm478_vm2, %v10314_v16, -inf  ;;  %v1263_v19 = vsel %vm478_vm2, %v10316_v17, -inf }
 0x269   : > { %1252 = vmax.xlane.f32.xlu0 %v1251_v18  ;;  %v8637_v20 = vpop.f32.mrf.mxu1  ;;  %1264 = vmax.xlane.f32.xlu1 %v1263_v19  ;;  %v8661_v21 = vpop.f32.mrf.mxu0 }
 0x26b   : > { %v618_v22 = vpop.f32.mrf.mxu1  ;;  %v810_v23 = vpop.f32.mrf.mxu0 }
 0x26d   : > { %v8638_v24 = vpop.f32.mrf.mxu1  ;;  %v8662_v25 = vpop.f32.mrf.mxu0 }
 0x26f   : > { %v10322_v27 = vpop.f32.mrf.mxu1  ;;  %v10324_v28 = vpop.f32.mrf.mxu0 }
 0x270   : > { %v1254_v29 = vsel %vm478_vm2, %v10322_v27, -inf  ;;  %v1269_v30 = vsel %vm478_vm2, %v10324_v28, -inf }
 0x271   : > { %1255 = vmax.xlane.f32.xlu0 %v1254_v29  ;;  %v8643_v32 = vpop.f32.mrf.mxu1  ;;  %1270 = vmax.xlane.f32.xlu1 %v1269_v30  ;;  %v8673_v33 = vpop.f32.mrf.mxu0 }
 0x273   : > { %v666_v35 = vpop.f32.mrf.mxu1  ;;  %v906_v36 = vpop.f32.mrf.mxu0 }
 0x275   : > { %v8644_v38 = vpop.f32.mrf.mxu1  ;;  %v8674_v39 = vpop.f32.mrf.mxu0 }
 0x277   : > { %v10330_v41 = vpop.f32.mrf.mxu1  ;;  %v10332_v42 = vpop.f32.mrf.mxu0 }
 0x278   : > { %v1260_v43 = vsel %vm478_vm2, %v10330_v41, -inf  ;;  %v1275_v44 = vsel %vm478_vm2, %v10332_v42, -inf }
 0x279   : > { %1261 = vmax.xlane.f32.xlu0 %v1260_v43  ;;  %v8655_v46 = vpop.f32.mrf.mxu1  ;;  %1276 = vmax.xlane.f32.xlu1 %v1275_v44  ;;  %v8685_v48 = vpop.f32.mrf.mxu0 }
 0x27b   : > { %v762_v49 = vpop.f32.mrf.mxu1  ;;  %v1002_v50 = vpop.f32.mrf.mxu0 }
 0x27c   : > { %v10370_v50 = vpop.permute.xlu0 %1582 }
 0x27d   : > { %v8656_v52 = vpop.f32.mrf.mxu1  ;;  %v8686_v54 = vpop.f32.mrf.mxu0 }
 0x27e   : > { %v10372_v52 = vpop.permute.xlu1 %1534 }
 0x27f   : > { %v10338_v55 = vpop.f32.mrf.mxu1  ;;  %v10340_v56 = vpop.f32.mrf.mxu0 }
 0x280   : > { %v1266_v60 = vsel %vm478_vm2, %v10338_v55, -inf  ;;  %v1281_v61 = vsel %vm478_vm2, %v10340_v56, -inf  ;;  %v10374_v54 = vpop.permute.xlu0 %1678 }
 0x281   : > { %1267 = vmax.xlane.f32.xlu0 %v1266_v60  ;;  %v8667_v62 = vpop.f32.mrf.mxu1  ;;  %1282 = vmax.xlane.f32.xlu1 %v1281_v61  ;;  %v8697_v0 = vpop.f32.mrf.mxu0 }
 0x282   : > { %v10376_v60 = vpop.permute.xlu1 %1630 }
 0x283   : > { %v858_v4 = vpop.f32.mrf.mxu1  ;;  %v1098_v6 = vpop.f32.mrf.mxu0 }
 0x284   : > { %v10378_v61 = vpop.permute.xlu0 %1774 }
 0x285   : > { %v8668_v8 = vpop.f32.mrf.mxu1  ;;  %v8698_v9 = vpop.f32.mrf.mxu0 }
 0x286   : > { %v10380_v62 = vpop.permute.xlu1 %1726 }
 0x287   : > { %v10346_v12 = vpop.f32.mrf.mxu1  ;;  %v10348_v13 = vpop.f32.mrf.mxu0 }
 0x288   : > { %v1272_v14 = vsel %vm478_vm2, %v10346_v12, -inf  ;;  %v1287_v49 = vsel %vm478_vm2, %v10348_v13, -inf  ;;  %v10382_v0 = vpop.permute.xlu0 %1870 }
 0x289   : > { %1273 = vmax.xlane.f32.xlu0 %v1272_v14  ;;  %v8679_v15 = vpop.f32.mrf.mxu1  ;;  %v8709_v18 = vpop.f32.mrf.mxu0 }
 0x28a   : > { %v10384_v4 = vpop.permute.xlu1 %1822 }
 0x28b   : > { %v954_v19 = vpop.f32.mrf.mxu1  ;;  %v1194_v20 = vpop.f32.mrf.mxu0 }
 0x28d   : > { %v8680_v21 = vpop.f32.mrf.mxu1  ;;  %v8710_v22 = vpop.f32.mrf.mxu0 }
 0x28e   : > { %v10387_v14 = vpop.permute.xlu1 %1918 }
 0x28f   : > { %v10352_v23 = vpop.f32.mrf.mxu1 }
 0x290   : > { %v1278_v24 = vsel %vm478_vm2, %v10352_v23, -inf }
 0x291   : > { %1279 = vmax.xlane.f32.xlu0 %v1278_v24  ;;  %v8691_v25 = vpop.f32.mrf.mxu1 }
 0x292   : > { %1966 = vrot.lane.b32.xlu1 %v10156_v1, %s9906_s6 }
 0x293   : > { %v1050_v29 = vpop.f32.mrf.mxu1 }
 0x295   : > { %v8692_v30 = vpop.f32.mrf.mxu1 }
 0x297   : > { %v10358_v32 = vpop.f32.mrf.mxu1 }
 0x298   : > { %v1284_v33 = vsel %vm478_vm2, %v10358_v32, -inf }
 0x299   : > { %1285 = vmax.xlane.f32.xlu0 %v1284_v33  ;;  %v8703_v35 = vpop.f32.mrf.mxu1 }
 0x29b   : > { %v1146_v36 = vpop.f32.mrf.mxu1 }
 0x29d   : > { %v8704_v38 = vpop.f32.mrf.mxu1 }
 0x29f   : > { %v10362_v39 = vpop.f32.mrf.mxu1 }
 0x2a0   : > { %v1290_v43 = vsel %vm478_vm2, %v10362_v39, -inf }
 0x2a1   : > { %1291 = vmax.xlane.f32.xlu0 %v1290_v43  ;;  %v8715_v44 = vpop.f32.mrf.mxu1 }
 0x2a3   : > { %v1242_v46 = vpop.f32.mrf.mxu1 }
 0x2a5   : > { %v8716_v48 = vpop.f32.mrf.mxu1 }
 0x2b6   : > { %1288 = vmax.xlane.f32.xlu1 %v1287_v49 }
 0x2b7   : > { %2014 = vrot.lane.b32.xlu0 %v10162_v5, %s9906_s6 }
 0x2e2   : > { %v1247_v6 = vpop.xlane.xlu0 %1246 }
 0x2e3   : > { %v1293_v8 = vsub.f32 %v10302_v58, %v1247_v6 }
 0x2e5   : > { %v1309_v9 = vmul.f32 1.442695, %v1293_v8 }
 0x2e7   : > { %9469 = vpow2.f32 %v1309_v9 }
 0x2ea   : > { %v1250_v15 = vpop.xlane.xlu1 %1249 }
 0x2eb   : > { %v1294_v18 = vsub.f32 %v10306_v2, %v1250_v15 }
 0x2ed   : > { %v1311_v19 = vmul.f32 1.442695, %v1294_v18 }
 0x2ee   : > { %v1259_v20 = vpop.xlane.xlu1 %1258 }
 0x2ef   : > { %9471 = vpow2.f32 %v1311_v19  ;;  %v1297_v21 = vsub.f32 %v10308_v3, %v1259_v20 }
 0x2f1   : > { %v1317_v22 = vmul.f32 1.442695, %v1297_v21 }
 0x2f2   : > { %v1265_v24 = vpop.xlane.xlu1 %1264  ;;  %v1253_v25 = vpop.xlane.xlu0 %1252 }
 0x2f3   : > { %9473 = vpow2.f32 %v1317_v22  ;;  %v1299_v29 = vsub.f32 %v10316_v17, %v1265_v24  ;;  %v1295_v58 = vsub.f32 %v10314_v16, %v1253_v25 }
 0x2f4   : > { %v10393_v30 = vpop.eup %9469 }
 0x2f5   : > { %v1313_v33 = vmul.f32 1.442695, %v1295_v58  ;;  %v1341_v35 = vsel %vm478_vm2, %v10393_v30, 0.0  ;;  %v1321_v2 = vmul.f32 1.442695, %v1299_v29 }
 0x2f6   : > { %1342 = vadd.xlane.f32.xlu1 %v1341_v35 }
 0x2f7   : > { %9475 = vpow2.f32 %v1313_v33 }
 0x2f8   : > { %9477 = vpow2.f32 %v1321_v2 }
 0x2fa   : > { %v1271_v36 = vpop.xlane.xlu1 %1270  ;;  %v1256_v3 = vpop.xlane.xlu0 %1255 }
 0x2fb   : > { %v1301_v38 = vsub.f32 %v10324_v28, %v1271_v36  ;;  %v1296_v43 = vsub.f32 %v10322_v27, %v1256_v3 }
 0x2fc   : > { %v10399_v44 = vpop.eup %9471 }
 0x2fd   : > { %v1325_v17 = vmul.f32 1.442695, %v1301_v38  ;;  %v1315_v16 = vmul.f32 1.442695, %v1296_v43  ;;  %v1344_v46 = vsel %vm478_vm2, %v10399_v44, 0.0 }
 0x2fe   : > { %1345 = vadd.xlane.f32.xlu0 %v1344_v46 }
 0x2ff   : > { %9479 = vpow2.f32 %v1325_v17 }
 0x300   : > { %v10403_v48 = vpop.eup %9473  ;;  %9481 = vpow2.f32 %v1315_v16 }
 0x301   : > { %v1353_v49 = vsel %vm478_vm2, %v10403_v48, 0.0 }
 0x302   : > { %1354 = vadd.xlane.f32.xlu1 %v1353_v49  ;;  %v1262_v6 = vpop.xlane.xlu0 %1261  ;;  %v1277_v49 = vpop.xlane.xlu1 %1276 }
 0x303   : > { %v1298_v28 = vsub.f32 %v10330_v41, %v1262_v6  ;;  %v1303_v6 = vsub.f32 %v10332_v42, %v1277_v49 }
 0x304   : > { %v10408_v27 = vpop.eup %9475 }
 0x305   : > { %v1319_v8 = vmul.f32 1.442695, %v1298_v28  ;;  %v1347_v9 = vsel %vm478_vm2, %v10408_v27, 0.0  ;;  %v10412_v15 = vpop.eup %9477 }
 0x306   : > { %1348 = vadd.xlane.f32.xlu1 %v1347_v9  ;;  %v1359_v18 = vsel %vm478_vm2, %v10412_v15, 0.0 }
 0x307   : > { %9483 = vpow2.f32 %v1319_v8 }
 0x30a   : > { %v1268_v19 = vpop.xlane.xlu0 %1267  ;;  %1360 = vadd.xlane.f32.xlu1 %v1359_v18  ;;  %v1283_v8 = vpop.xlane.xlu1 %1282  ;;  %v1329_v18 = vmul.f32 1.442695, %v1303_v6 }
 0x30b   : > { %v1300_v20 = vsub.f32 %v10338_v55, %v1268_v19 }
 0x30c   : > { %v10417_v21 = vpop.eup %9479 }
 0x30d   : > { %v10419_v41 = vpop.eup %9481  ;;  %v1323_v22 = vmul.f32 1.442695, %v1300_v20  ;;  %v1365_v24 = vsel %vm478_vm2, %v10417_v21, 0.0 }
 0x30e   : > { %v1350_v25 = vsel %vm478_vm2, %v10419_v41, 0.0  ;;  %1366 = vadd.xlane.f32.xlu1 %v1365_v24  ;;  %v10452_v42 = vpop.permute.xlu1 %1966 }
 0x30f   : > { %1351 = vadd.xlane.f32.xlu0 %v1350_v25  ;;  %9485 = vpow2.f32 %v1323_v22 }
 0x312   : > { %v1274_v29 = vpop.xlane.xlu0 %1273 }
 0x313   : > { %v1302_v58 = vsub.f32 %v10346_v12, %v1274_v29 }
 0x314   : > { %v10426_v33 = vpop.eup %9483 }
 0x315   : > { %v1327_v55 = vmul.f32 1.442695, %v1302_v58  ;;  %v1356_v35 = vsel %vm478_vm2, %v10426_v33, 0.0 }
 0x316   : > { %1357 = vadd.xlane.f32.xlu0 %v1356_v35 }
 0x317   : > { %9487 = vpow2.f32 %v1327_v55 }
 0x31a   : > { %v1280_v2 = vpop.xlane.xlu0 %1279 }
 0x31b   : > { %v1304_v36 = vsub.f32 %v10352_v23, %v1280_v2 }
 0x31c   : > { %v10431_v3 = vpop.eup %9485 }
 0x31d   : > { %v1331_v38 = vmul.f32 1.442695, %v1304_v36  ;;  %v1362_v43 = vsel %vm478_vm2, %v10431_v3, 0.0 }
 0x31e   : > { %1363 = vadd.xlane.f32.xlu0 %v1362_v43 }
 0x31f   : > { %9489 = vpow2.f32 %v1331_v38  ;;  %2062 = vrot.lane.b32.xlu1 %v10170_v10, %s9906_s6 }
 0x322   : > { %v1286_v12 = vpop.xlane.xlu0 %1285 }
 0x323   : > { %v1306_v17 = vsub.f32 %v10358_v32, %v1286_v12  ;;  %v1305_v32 = vsub.f32 %v10340_v56, %v1283_v8 }
 0x324   : > { %v10438_v16 = vpop.eup %9487 }
 0x325   : > { %v1335_v46 = vmul.f32 1.442695, %v1306_v17  ;;  %v1368_v23 = vsel %vm478_vm2, %v10438_v16, 0.0  ;;  %v1333_v19 = vmul.f32 1.442695, %v1305_v32  ;;  %v1540_v32 = vsel %vm1442_vm3, %v10372_v52, 0 }
 0x326   : > { %1369 = vadd.xlane.f32.xlu0 %v1368_v23 }
 0x327   : > { %9491 = vpow2.f32 %v1335_v46 }
 0x328   : > { %9493 = vpow2.f32 %v1329_v18 }
 0x329   : > { %9495 = vpow2.f32 %v1333_v19 }
 0x32a   : > { %v1292_v2 = vpop.xlane.xlu0 %1291 }
 0x32c   : > { %v10443_v28 = vpop.eup %9489 }
 0x32d   : > { %v1374_v9 = vsel %vm478_vm2, %v10443_v28, 0.0 }
 0x32e   : > { %1375 = vadd.xlane.f32.xlu0 %v1374_v9  ;;  %v10492_v46 = vpop.permute.xlu0 %2014 }
 0x334   : > { %v10448_v20 = vpop.eup %9491 }
 0x335   : > { %v1380_v22 = vsel %vm478_vm2, %v10448_v20, 0.0  ;;  %v10454_v25 = vpop.eup %9493 }
 0x336   : > { %1381 = vadd.xlane.f32.xlu0 %v1380_v22  ;;  %v1371_v56 = vsel %vm478_vm2, %v10454_v25, 0.0  ;;  %v10459_v55 = vpop.eup %9495 }
 0x337   : > { %v1377_v35 = vsel %vm478_vm2, %v10459_v55, 0.0 }
 0x33f   : > { %v1289_v24 = vpop.xlane.xlu1 %1288 }
 0x340   : > { %v1307_v29 = vsub.f32 %v10348_v13, %v1289_v24  ;;  %v1308_v13 = vsub.f32 %v10362_v39, %v1292_v2  ;;  %v1588_v24 = vsel %vm1442_vm3, %v10370_v50, 0 }
 0x342   : > { %v1337_v58 = vmul.f32 1.442695, %v1307_v29  ;;  %v1339_v43 = vmul.f32 1.442695, %v1308_v13  ;;  %v1636_v13 = vsel %vm1442_vm3, %v10376_v60, 0 }
 0x343   : > { %1372 = vadd.xlane.f32.xlu1 %v1371_v56 }
 0x344   : > { %9497 = vpow2.f32 %v1337_v58 }
 0x345   : > { %9499 = vpow2.f32 %v1339_v43 }
 0x347   : > { %1378 = vadd.xlane.f32.xlu1 %v1377_v35 }
 0x34c   : > { %2110 = vrot.lane.b32.xlu0 %v10164_v7, %s9906_s6 }
 0x351   : > { %v10465_v36 = vpop.eup %9497 }
 0x352   : > { %v1383_v38 = vsel %vm478_vm2, %v10465_v36, 0.0  ;;  %v10472_v12 = vpop.eup %9499 }
 0x353   : > { %1384 = vadd.xlane.f32.xlu1 %v1383_v38  ;;  %v1386_v17 = vsel %vm478_vm2, %v10472_v12, 0.0 }
 0x364   : > { %2158 = vrot.lane.b32.xlu1 %v10172_v11, %s9906_s6 }
 0x368   : > { %2258 = vrot.lane.b32.xlu1 %v10126_v40, %s9907_s7 }
 0x36b   : > { %1387 = vadd.xlane.f32.xlu0 %v1386_v17 }
 0x36c   : > { %2256 = vrot.lane.b32.xlu1 %v10126_v40, %s9908_s8 }
 0x370   : > { %2358 = vrot.lane.b32.xlu1 %v10122_v37, %s9907_s7 }
 0x374   : > { %2356 = vrot.lane.b32.xlu1 %v10122_v37, %s9908_s8 }
 0x378   : > { %2458 = vrot.lane.b32.xlu1 %v10138_v51, %s9907_s7 }
 0x37c   : > { %2456 = vrot.lane.b32.xlu1 %v10138_v51, %s9908_s8 }
 0x37f   : > { %v1343_v39 = vpop.xlane.xlu1 %1342 }
 0x380   : > { %9501 = vrcp.f32 %v1343_v39  ;;  %2558 = vrot.lane.b32.xlu1 %v10140_v53, %s9907_s7 }
 0x381   : > { %2208 = vrot.lane.b32.xlu0 %v10118_v34, %s9907_s7 }
 0x384   : > { %2556 = vrot.lane.b32.xlu1 %v10140_v53, %s9908_s8 }
 0x385   : > { %2206 = vrot.lane.b32.xlu0 %v10118_v34, %s9908_s8 }
 0x387   : > { %v1346_v23 = vpop.xlane.xlu0 %1345 }
 0x388   : > { %9503 = vrcp.f32 %v1346_v23  ;;  %2658 = vrot.lane.b32.xlu1 %v10154_v63, %s9907_s7 }
 0x389   : > { %2308 = vrot.lane.b32.xlu0 %v10116_v31, %s9907_s7 }
 0x38b   : > { %v1355_v49 = vpop.xlane.xlu1 %1354 }
 0x38c   : > { %2656 = vrot.lane.b32.xlu1 %v10154_v63, %s9908_s8 }
 0x38d   : > { %v9502_v6 = vpop.eup %9501  ;;  %2306 = vrot.lane.b32.xlu0 %v10116_v31, %s9908_s8 }
 0x38e   : > { %v1405_v8 = vmul.f32 %v9502_v6, %v10393_v30 }
 0x38f   : > { %v1349_v9 = vpop.xlane.xlu1 %1348 }
 0x390   : > { %2758 = vrot.lane.b32.xlu1 %v10156_v1, %s9907_s7  ;;  %v1421_v18 = vpack.c.bf16 %v1405_v8, %v1405_v8  ;;  %9505 = vrcp.f32 %v1349_v9 }
 0x391   : > { %2408 = vrot.lane.b32.xlu0 %v10132_v45, %s9907_s7  ;;  %9507 = vrcp.f32 %v1355_v49  ;;  %v1684_v49 = vsel %vm1442_vm3, %v10374_v54, 0 }
 0x392   : > { %8720 = vmatmul.mubr.msk.bf16.vlgmr.msra.gmra.mxu0 %vm478_vm2, %v1421_v18  ;;  %v1828_v18 = vsel %vm1442_vm3, %v10384_v4, 0 }
 0x393   : > { %8730 = vmatpush3.bf16.msra.mxu0 %v1540_v32  ;;  %8731 = vmatprep.mubr.msk.bf16.mxu0 %vm9904_vm1, %v12572_v26  ;;  %v1361_v29 = vpop.xlane.xlu1 %1360 }
 0x394   : > { %2756 = vrot.lane.b32.xlu1 %v10156_v1, %s9908_s8  ;;  %8741 = vmatprep.subr.bf16.mxu0 %v12572_v26 }
 0x395   : > { %v9504_v30 = vpop.eup %9503  ;;  %2406 = vrot.lane.b32.xlu0 %v10132_v45, %s9908_s8 }
 0x396   : > { %v1406_v19 = vmul.f32 %v9504_v30, %v10399_v44 }
 0x397   : > { %v1367_v2 = vpop.xlane.xlu1 %1366 }
 0x398   : > { %v1352_v22 = vpop.xlane.xlu0 %1351  ;;  %2858 = vrot.lane.b32.xlu1 %v10170_v10, %s9907_s7  ;;  %v1422_v52 = vpack.c.bf16 %v1406_v19, %v1406_v19 }
 0x399   : > { %2508 = vrot.lane.b32.xlu0 %v10134_v47, %s9907_s7  ;;  %9509 = vrcp.f32 %v1352_v22  ;;  %v1924_v22 = vsel %vm1442_vm3, %v10387_v14, 0 }
 0x39a   : > { %8726 = vmatmul.mubr.msk.bf16.vlgmr.msra.gmra.mxu1 %vm478_vm2, %v1422_v52  ;;  %9511 = vrcp.f32 %v1361_v29  ;;  %v1876_v52 = vsel %vm1442_vm3, %v10382_v0, 0  ;;  %v1972_v29 = vsel %vm1442_vm3, %v10452_v42, 0 }
 0x39b   : > { %8736 = vmatpush3.bf16.msra.mxu1 %v1588_v24  ;;  %8737 = vmatprep.mubr.msk.bf16.mxu1 %vm9904_vm1, %v12572_v26 }
 0x39c   : > { %2856 = vrot.lane.b32.xlu1 %v10170_v10, %s9908_s8  ;;  %8747 = vmatprep.subr.bf16.mxu1 %v12572_v26 }
 0x39d   : > { %2506 = vrot.lane.b32.xlu0 %v10134_v47, %s9908_s8  ;;  %v9506_v44 = vpop.eup %9505 }
 0x39e   : > { %v1407_v50 = vmul.f32 %v9506_v44, %v10408_v27  ;;  %v9508_v35 = vpop.eup %9507 }
 0x39f   : > { %v1358_v58 = vpop.xlane.xlu0 %1357  ;;  %v1409_v27 = vmul.f32 %v9508_v35, %v10403_v48  ;;  %v1732_v48 = vsel %vm1442_vm3, %v10380_v62, 0 }
 0x3a0   : > { %2958 = vrot.lane.b32.xlu1 %v10172_v11, %s9907_s7  ;;  %9513 = vrcp.f32 %v1358_v58  ;;  %v1423_v56 = vpack.c.bf16 %v1407_v50, %v1407_v50  ;;  %v2063_v58 = vpop.permute.xlu1 %2062 }
 0x3a1   : > { %2608 = vrot.lane.b32.xlu0 %v10146_v57, %s9907_s7  ;;  %9515 = vrcp.f32 %v1367_v2  ;;  %v1425_v17 = vpack.c.bf16 %v1409_v27, %v1409_v27  ;;  %v2068_v42 = vsel %vm1442_vm3, %v2063_v58, 0 }
 0x3a2   : > { %8732 = vmatmul.mubr.msk.bf16.vlgmr.msra.gmra.mxu0 %vm478_vm2, %v1423_v56 }
 0x3a3   : > { %8742 = vmatpush3.bf16.msra.mxu0 %v1636_v13  ;;  %8743 = vmatprep.mubr.msk.bf16.mxu0 %vm9904_vm1, %v12572_v26 }
 0x3a4   : > { %2956 = vrot.lane.b32.xlu1 %v10172_v11, %s9908_s8  ;;  %8753 = vmatprep.subr.bf16.mxu0 %v12572_v26 }
 0x3a5   : > { %2606 = vrot.lane.b32.xlu0 %v10146_v57, %s9908_s8 }
 0x3a6   : > { %v9510_v38 = vpop.eup %9509 }
 0x3a7   : > { %v1364_v43 = vpop.xlane.xlu0 %1363  ;;  %v1408_v60 = vmul.f32 %v9510_v38, %v10419_v41  ;;  %v9512_v39 = vpop.eup %9511 }
 0x3a8   : > { %3198 = vrot.lane.b32.xlu1 %v10118_v34, %s9909_s15  ;;  %9517 = vrcp.f32 %v1364_v43  ;;  %v1411_v41 = vmul.f32 %v9512_v39, %v10412_v15 }
 0x3a9   : > { %2708 = vrot.lane.b32.xlu0 %v10148_v59, %s9907_s7  ;;  %v1424_v23 = vpack.c.bf16 %v1408_v60, %v1408_v60 }
 0x3aa   : > { %8744 = vmatmul.mubr.msk.bf16.vlgmr.msra.gmra.mxu0 %vm478_vm2, %v1425_v17  ;;  %v1427_v8 = vpack.c.bf16 %v1411_v41, %v1411_v41  ;;  %v2020_v17 = vsel %vm1442_vm3, %v10492_v46, 0 }
 0x3ab   : > { %8738 = vmatmul.mubr.msk.bf16.vlgmr.msra.gmra.mxu1 %vm478_vm2, %v1424_v23  ;;  %8754 = vmatpush3.bf16.msra.mxu0 %v1732_v48 }
 0x3ac   : > { %8748 = vmatpush3.bf16.msra.mxu1 %v1684_v49  ;;  %3294 = vrot.lane.b32.xlu1 %v10116_v31, %s9909_s15 }
 0x3ad   : > { %v9514_v6 = vpop.eup %9513  ;;  %2706 = vrot.lane.b32.xlu0 %v10148_v59, %s9908_s8  ;;  %8755 = vmatprep.mubr.msk.bf16.mxu0 %vm9904_vm1, %v12572_v26 }
 0x3ae   : > { %8765 = vmatprep.subr.bf16.mxu0 %v12572_v26  ;;  %8749 = vmatprep.mubr.msk.bf16.mxu1 %vm9904_vm1, %v12572_v26  ;;  %v1410_v54 = vmul.f32 %v9514_v6, %v10426_v33  ;;  %v9516_v9 = vpop.eup %9515  ;;  %v1780_v33 = vsel %vm1442_vm3, %v10378_v61, 0 }
 0x3af   : > { %v1370_v62 = vpop.xlane.xlu0 %1369  ;;  %8759 = vmatprep.subr.bf16.mxu1 %v12572_v26  ;;  %v1413_v32 = vmul.f32 %v9516_v9, %v10417_v21 }
 0x3b0   : > { %9519 = vrcp.f32 %v1370_v62  ;;  %3390 = vrot.lane.b32.xlu1 %v10132_v45, %s9909_s15  ;;  %v1426_v15 = vpack.c.bf16 %v1410_v54, %v1410_v54 }
 0x3b1   : > { %2808 = vrot.lane.b32.xlu0 %v10162_v5, %s9907_s7  ;;  %v1429_v19 = vpack.c.bf16 %v1413_v32, %v1413_v32 }
 0x3b2   : > { %8756 = vmatmul.mubr.msk.bf16.vlgmr.msra.gmra.mxu0 %vm478_vm2, %v1427_v8 }
 0x3b3   : > { %8750 = vmatmul.mubr.msk.bf16.vlgmr.msra.gmra.mxu1 %vm478_vm2, %v1426_v15  ;;  %8766 = vmatpush3.bf16.msra.mxu0 %v1828_v18 }
 0x3b4   : > { %8760 = vmatpush3.bf16.msra.mxu1 %v1780_v33  ;;  %3486 = vrot.lane.b32.xlu1 %v10134_v47, %s9909_s15 }
 0x3b5   : > { %v9518_v30 = vpop.eup %9517  ;;  %2806 = vrot.lane.b32.xlu0 %v10162_v5, %s9908_s8  ;;  %8767 = vmatprep.mubr.msk.bf16.mxu0 %vm9904_vm1, %v12572_v26 }
 0x3b6   : > { %8777 = vmatprep.subr.bf16.mxu0 %v12572_v26  ;;  %8761 = vmatprep.mubr.msk.bf16.mxu1 %vm9904_vm1, %v12572_v26  ;;  %v1412_v61 = vmul.f32 %v9518_v30, %v10431_v3 }
 0x3b7   : > { %v1376_v4 = vpop.xlane.xlu0 %1375  ;;  %8771 = vmatprep.subr.bf16.mxu1 %v12572_v26 }
 0x3b8   : > { %9521 = vrcp.f32 %v1376_v4  ;;  %3582 = vrot.lane.b32.xlu1 %v10146_v57, %s9909_s15  ;;  %v1428_v21 = vpack.c.bf16 %v1412_v61, %v1412_v61 }
 0x3b9   : > { %2908 = vrot.lane.b32.xlu0 %v10164_v7, %s9907_s7 }
 0x3ba   : > { %8768 = vmatmul.mubr.msk.bf16.vlgmr.msra.gmra.mxu0 %vm478_vm2, %v1429_v19 }
 0x3bb   : > { %8762 = vmatmul.mubr.msk.bf16.vlgmr.msra.gmra.mxu1 %vm478_vm2, %v1428_v21  ;;  %8778 = vmatpush3.bf16.msra.mxu0 %v1924_v22 }
 0x3bc   : > { %8772 = vmatpush3.bf16.msra.mxu1 %v1876_v52  ;;  %3678 = vrot.lane.b32.xlu1 %v10148_v59, %s9909_s15 }
 0x3bd   : > { %v9520_v3 = vpop.eup %9519  ;;  %2906 = vrot.lane.b32.xlu0 %v10164_v7, %s9908_s8  ;;  %8773 = vmatprep.mubr.msk.bf16.mxu1 %vm9904_vm1, %v12572_v26 }
 0x3be   : > { %v1414_v14 = vmul.f32 %v9520_v3, %v10438_v16  ;;  %8783 = vmatprep.subr.bf16.mxu1 %v12572_v26  ;;  %8779 = vmatprep.mubr.msk.bf16.mxu0 %vm9904_vm1, %v12572_v26 }
 0x3bf   : > { %v1382_v24 = vpop.xlane.xlu0 %1381  ;;  %8789 = vmatprep.subr.bf16.mxu0 %v12572_v26 }
 0x3c0   : > { %9523 = vrcp.f32 %v1382_v24  ;;  %v1430_v0 = vpack.c.bf16 %v1414_v14, %v1414_v14  ;;  %3726 = vrot.lane.b32.xlu1 %v10156_v1, %s9909_s15 }
 0x3c1   : > { %3246 = vrot.lane.b32.xlu0 %v10126_v40, %s9909_s15 }
 0x3c3   : > { %8774 = vmatmul.mubr.msk.bf16.vlgmr.msra.gmra.mxu1 %vm478_vm2, %v1430_v0  ;;  %v2111_v49 = vpop.permute.xlu0 %2110 }
 0x3c4   : > { %8784 = vmatpush3.bf16.msra.mxu1 %v1972_v29  ;;  %8785 = vmatprep.mubr.msk.bf16.mxu1 %vm9904_vm1, %v12572_v26  ;;  %v2116_v46 = vsel %vm1442_vm3, %v2111_v49, 0 }
 0x3c5   : > { %v9522_v16 = vpop.eup %9521  ;;  %3342 = vrot.lane.b32.xlu0 %v10122_v37, %s9909_s15  ;;  %8795 = vmatprep.subr.bf16.mxu1 %v12572_v26 }
 0x3c6   : > { %v1416_v44 = vmul.f32 %v9522_v16, %v10443_v28 }
 0x3c8   : > { %v1432_v50 = vpack.c.bf16 %v1416_v44, %v1416_v44 }
 0x3c9   : > { %3438 = vrot.lane.b32.xlu0 %v10138_v51, %s9909_s15 }
 0x3cb   : > { %8786 = vmatmul.mubr.msk.bf16.vlgmr.msra.gmra.mxu1 %vm478_vm2, %v1432_v50 }
 0x3cc   : > { %8796 = vmatpush3.bf16.msra.mxu1 %v2068_v42  ;;  %v1373_v35 = vpop.xlane.xlu1 %1372  ;;  %8797 = vmatprep.mubr.msk.bf16.mxu1 %vm9904_vm1, %v12572_v26 }
 0x3cd   : > { %v9524_v56 = vpop.eup %9523  ;;  %9525 = vrcp.f32 %v1373_v35  ;;  %3534 = vrot.lane.b32.xlu0 %v10140_v53, %s9909_s15  ;;  %8807 = vmatprep.subr.bf16.mxu1 %v12572_v26 }
 0x3ce   : > { %v1418_v28 = vmul.f32 %v9524_v56, %v10448_v20 }
 0x3d0   : > { %v1434_v2 = vpack.c.bf16 %v1418_v28, %v1418_v28  ;;  %v1379_v13 = vpop.xlane.xlu1 %1378 }
 0x3d1   : > { %9527 = vrcp.f32 %v1379_v13  ;;  %3630 = vrot.lane.b32.xlu0 %v10154_v63, %s9909_s15 }
 0x3d3   : > { %8798 = vmatmul.mubr.msk.bf16.vlgmr.msra.gmra.mxu1 %vm478_vm2, %v1434_v2 }
 0x3d4   : > { %8809 = vmatprep.mubr.msk.bf16.mxu1 %vm9904_vm1, %v12572_v26 }
 0x3da   : > { %v9526_v27 = vpop.eup %9525 }
 0x3db   : > { %v1415_v43 = vmul.f32 %v9526_v27, %v10454_v25 }
 0x3dc   : > { %v1385_v38 = vpop.xlane.xlu1 %1384 }
 0x3dd   : > { %9529 = vrcp.f32 %v1385_v38  ;;  %v1431_v60 = vpack.c.bf16 %v1415_v43, %v1415_v43 }
 0x3de   : > { %v9528_v20 = vpop.eup %9527 }
 0x3df   : > { %8780 = vmatmul.mubr.msk.bf16.vlgmr.msra.gmra.mxu0 %vm478_vm2, %v1431_v60  ;;  %v1417_v25 = vmul.f32 %v9528_v20, %v10459_v55 }
 0x3e0   : > { %v2159_v39 = vpop.permute.xlu1 %2158  ;;  %8790 = vmatpush3.bf16.msra.mxu0 %v2020_v17  ;;  %8791 = vmatprep.mubr.msk.bf16.mxu0 %vm9904_vm1, %v12572_v26 }
 0x3e1   : > { %v2164_v23 = vsel %vm1442_vm3, %v2159_v39, 0  ;;  %8801 = vmatprep.subr.bf16.mxu0 %v12572_v26  ;;  %v1433_v41 = vpack.c.bf16 %v1417_v25, %v1417_v25 }
 0x3e2   : > { %8808 = vmatpush3.bf16.msra.mxu1 %v2164_v23 }
 0x3e3   : > { %8819 = vmatprep.subr.bf16.mxu1 %v12572_v26 }
 0x3e4   : > { %v2259_v48 = vpop.permute.xlu1 %2258 }
 0x3e5   : > { %v2264_v0 = vsel %vm478_vm2, %v2259_v48, 0 }
 0x3e7   : > { %8792 = vmatmul.mubr.msk.bf16.vlgmr.msra.gmra.mxu0 %vm478_vm2, %v1433_v41 }
 0x3e8   : > { %v2257_v6 = vpop.permute.xlu1 %2256  ;;  %8802 = vmatpush3.bf16.msra.mxu0 %v2116_v46  ;;  %8803 = vmatprep.mubr.msk.bf16.mxu0 %vm9904_vm1, %v12572_v26 }
 0x3e9   : > { %8813 = vmatprep.subr.bf16.mxu0 %v12572_v26 }
 0x3ea   : > { %v9530_v62 = vpop.eup %9529 }
 0x3eb   : > { %v1419_v54 = vmul.f32 %v9530_v62, %v10465_v36 }
 0x3ec   : > { %v2359_v55 = vpop.permute.xlu1 %2358 }
 0x3ed   : > { %v1435_v15 = vpack.c.bf16 %v1419_v54, %v1419_v54  ;;  %v2364_v50 = vsel %vm478_vm2, %v2359_v55, 0 }
 0x3ef   : > { %8804 = vmatmul.mubr.msk.bf16.vlgmr.msra.gmra.mxu0 %vm478_vm2, %v1435_v15 }
 0x3f0   : > { %v2357_v8 = vpop.permute.xlu1 %2356  ;;  %8815 = vmatprep.mubr.msk.bf16.mxu0 %vm9904_vm1, %v12572_v26 }
 0x3f4   : > { %v2459_v9 = vpop.permute.xlu1 %2458  ;;  %v1388_v18 = vpop.xlane.xlu0 %1387 }
 0x3f5   : > { %9531 = vrcp.f32 %v1388_v18  ;;  %v2464_v28 = vsel %vm478_vm2, %v2459_v9, 0 }
 0x3f8   : > { %v2457_v33 = vpop.permute.xlu1 %2456  ;;  %v2209_v32 = vpop.permute.xlu0 %2208 }
 0x3f9   : > { %v2214_v30 = vsel %vm478_vm2, %v2209_v32, 0 }
 0x3fa   : > { %8814 = vmatpush3.bf16.xpose.msra.mxu0 %v2214_v30 }
 0x3fb   : > { %8825 = vmatprep.subr.bf16.mxu0 %v12572_v26 }
 0x3fc   : > { %v2559_v4 = vpop.permute.xlu1 %2558  ;;  %v2207_v36 = vpop.permute.xlu0 %2206 }
 0x3fd   : > { %v2564_v60 = vsel %vm478_vm2, %v2559_v4, 0 }
 0x400   : > { %v10667_v61 = vpop.permute.xlu1 %2556  ;;  %v2309_v21 = vpop.permute.xlu0 %2308 }
 0x401   : > { %v2314_v19 = vsel %vm478_vm2, %v2309_v21, 0  ;;  %8816 = vmatmul.mubr.msk.bf16.vlgmr.msra.gmra.mxu0 %vm478_vm2, %v2207_v36 }
 0x402   : > { %v9532_v22 = vpop.eup %9531  ;;  %8826 = vmatpush3.bf16.xpose.msra.mxu0 %v2314_v19  ;;  %8827 = vmatprep.mubr.msk.bf16.mxu0 %vm9904_vm1, %v12572_v26 }
 0x403   : > { %v1420_v52 = vmul.f32 %v9532_v22, %v10472_v12  ;;  %8837 = vmatprep.subr.bf16.mxu0 %v12572_v26 }
 0x404   : > { %v2307_v3 = vpop.permute.xlu0 %2306  ;;  %v2659_v24 = vpop.permute.xlu1 %2658 }
 0x405   : > { %v1436_v14 = vpack.c.bf16 %v1420_v52, %v1420_v52  ;;  %v2664_v25 = vsel %vm478_vm2, %v2659_v24, 0 }
 0x407   : > { %8810 = vmatmul.mubr.msk.bf16.vlgmr.msra.gmra.mxu1 %vm478_vm2, %v1436_v14 }
 0x408   : > { %8820 = vmatpush3.bf16.xpose.msra.mxu1 %v2264_v0  ;;  %v2409_v29 = vpop.permute.xlu0 %2408  ;;  %8821 = vmatprep.mubr.msk.bf16.mxu1 %vm9904_vm1, %v12572_v26  ;;  %v2657_v12 = vpop.permute.xlu1 %2656 }
 0x409   : > { %v2414_v16 = vsel %vm478_vm2, %v2409_v29, 0  ;;  %8828 = vmatmul.mubr.msk.bf16.vlgmr.msra.gmra.mxu0 %vm478_vm2, %v2307_v3  ;;  %8831 = vmatprep.subr.bf16.mxu1 %v12572_v26 }
 0x40a   : > { %8838 = vmatpush3.bf16.xpose.msra.mxu0 %v2414_v16  ;;  %8839 = vmatprep.mubr.msk.bf16.mxu0 %vm9904_vm1, %v12572_v26 }
 0x40b   : > { %8849 = vmatprep.subr.bf16.mxu0 %v12572_v26 }
 0x40c   : > { %v2407_v44 = vpop.permute.xlu0 %2406  ;;  %v2759_v56 = vpop.permute.xlu1 %2758 }
 0x40f   : > { %8822 = vmatmul.mubr.msk.bf16.vlgmr.msra.gmra.mxu1 %vm478_vm2, %v2257_v6  ;;  %v2764_v6 = vsel %vm478_vm2, %v2759_v56, 0 }
 0x410   : > { %8832 = vmatpush3.bf16.xpose.msra.mxu1 %v2364_v50  ;;  %v2509_v58 = vpop.permute.xlu0 %2508  ;;  %8833 = vmatprep.mubr.msk.bf16.mxu1 %vm9904_vm1, %v12572_v26  ;;  %v2757_v2 = vpop.permute.xlu1 %2756 }
 0x411   : > { %v2514_v42 = vsel %vm478_vm2, %v2509_v58, 0  ;;  %8840 = vmatmul.mubr.msk.bf16.vlgmr.msra.gmra.mxu0 %vm478_vm2, %v2407_v44  ;;  %8843 = vmatprep.subr.bf16.mxu1 %v12572_v26 }
 0x412   : > { %8850 = vmatpush3.bf16.xpose.msra.mxu0 %v2514_v42  ;;  %8851 = vmatprep.mubr.msk.bf16.mxu0 %vm9904_vm1, %v12572_v26 }
 0x413   : > { %8861 = vmatprep.subr.bf16.mxu0 %v12572_v26 }
 0x414   : > { %v2507_v35 = vpop.permute.xlu0 %2506  ;;  %v2859_v43 = vpop.permute.xlu1 %2858 }
 0x417   : > { %8834 = vmatmul.mubr.msk.bf16.vlgmr.msra.gmra.mxu1 %vm478_vm2, %v2357_v8  ;;  %v2864_v8 = vsel %vm478_vm2, %v2859_v43, 0 }
 0x418   : > { %8844 = vmatpush3.bf16.xpose.msra.mxu1 %v2464_v28  ;;  %v2609_v13 = vpop.permute.xlu0 %2608  ;;  %8845 = vmatprep.mubr.msk.bf16.mxu1 %vm9904_vm1, %v12572_v26  ;;  %v2857_v39 = vpop.permute.xlu1 %2856 }
 0x419   : > { %v2614_v27 = vsel %vm478_vm2, %v2609_v13, 0  ;;  %8852 = vmatmul.mubr.msk.bf16.vlgmr.msra.gmra.mxu0 %vm478_vm2, %v2507_v35  ;;  %8855 = vmatprep.subr.bf16.mxu1 %v12572_v26 }
 0x41a   : > { %8862 = vmatpush3.bf16.xpose.msra.mxu0 %v2614_v27  ;;  %8863 = vmatprep.mubr.msk.bf16.mxu0 %vm9904_vm1, %v12572_v26 }
 0x41b   : > { %8873 = vmatprep.subr.bf16.mxu0 %v12572_v26 }
 0x41c   : > { %v2607_v38 = vpop.permute.xlu0 %2606  ;;  %v2959_v41 = vpop.permute.xlu1 %2958 }
 0x41f   : > { %8846 = vmatmul.mubr.msk.bf16.vlgmr.msra.gmra.mxu1 %vm478_vm2, %v2457_v33  ;;  %v2964_v33 = vsel %vm478_vm2, %v2959_v41, 0 }
 0x420   : > { %8856 = vmatpush3.bf16.xpose.msra.mxu1 %v2564_v60  ;;  %v2709_v20 = vpop.permute.xlu0 %2708  ;;  %8857 = vmatprep.mubr.msk.bf16.mxu1 %vm9904_vm1, %v12572_v26  ;;  %v2957_v62 = vpop.permute.xlu1 %2956 }
 0x421   : > { %v2714_v17 = vsel %vm478_vm2, %v2709_v20, 0  ;;  %8864 = vmatmul.mubr.msk.bf16.vlgmr.msra.gmra.mxu0 %vm478_vm2, %v2607_v38  ;;  %8867 = vmatprep.subr.bf16.mxu1 %v12572_v26 }
 0x422   : > { %8874 = vmatpush3.bf16.xpose.msra.mxu0 %v2714_v17  ;;  %8875 = vmatprep.mubr.msk.bf16.mxu0 %vm9904_vm1, %v12572_v26 }
 0x423   : > { %8885 = vmatprep.subr.bf16.mxu0 %v12572_v26 }
 0x424   : > { %v2707_v23 = vpop.permute.xlu0 %2706  ;;  %v3199_v15 = vpop.permute.xlu1 %3198 }
 0x425   : > { %v3204_v18 = vsel %vm1442_vm3, %v3199_v15, 0 }
 0x427   : > { %8858 = vmatmul.mubr.msk.bf16.vlgmr.msra.gmra.mxu1 %vm478_vm2, %v10667_v61 }
 0x428   : > { %8868 = vmatpush3.bf16.xpose.msra.mxu1 %v2664_v25  ;;  %v2809_v48 = vpop.permute.xlu0 %2808  ;;  %8869 = vmatprep.mubr.msk.bf16.mxu1 %vm9904_vm1, %v12572_v26 }
 0x429   : > { %v2814_v49 = vsel %vm478_vm2, %v2809_v48, 0  ;;  %8876 = vmatmul.mubr.msk.bf16.vlgmr.msra.gmra.mxu0 %vm478_vm2, %v2707_v23  ;;  %8879 = vmatprep.subr.bf16.mxu1 %v12572_v26 }
 0x42a   : > { %8886 = vmatpush3.bf16.xpose.msra.mxu0 %v2814_v49  ;;  %8887 = vmatprep.mubr.msk.bf16.mxu0 %vm9904_vm1, %v12572_v26 }
 0x42b   : > { %8897 = vmatprep.subr.bf16.mxu0 %v12572_v26 }
 0x42c   : > { %v2807_v46 = vpop.permute.xlu0 %2806 }
 0x42f   : > { %8870 = vmatmul.mubr.msk.bf16.vlgmr.msra.gmra.mxu1 %vm478_vm2, %v2657_v12 }
 0x430   : > { %8880 = vmatpush3.bf16.xpose.msra.mxu1 %v2764_v6  ;;  %v2909_v54 = vpop.permute.xlu0 %2908  ;;  %8881 = vmatprep.mubr.msk.bf16.mxu1 %vm9904_vm1, %v12572_v26 }
 0x431   : > { %v2914_v55 = vsel %vm478_vm2, %v2909_v54, 0  ;;  %8888 = vmatmul.mubr.msk.bf16.vlgmr.msra.gmra.mxu0 %vm478_vm2, %v2807_v46  ;;  %8891 = vmatprep.subr.bf16.mxu1 %v12572_v26 }
 0x432   : > { %8898 = vmatpush3.bf16.xpose.msra.mxu0 %v2914_v55  ;;  %8899 = vmatprep.mubr.msk.bf16.mxu0 %vm9904_vm1, %v12572_v26 }
 0x433   : > { %8909 = vmatprep.subr.bf16.mxu0 %v12572_v26 }
 0x434   : > { %v2907_v9 = vpop.permute.xlu0 %2906 }
 0x437   : > { %8882 = vmatmul.mubr.msk.bf16.vlgmr.msra.gmra.mxu1 %vm478_vm2, %v2757_v2 }
 0x438   : > { %8892 = vmatpush3.bf16.xpose.msra.mxu1 %v2864_v8  ;;  %8893 = vmatprep.mubr.msk.bf16.mxu1 %vm9904_vm1, %v12572_v26  ;;  %v3247_v32 = vpop.permute.xlu0 %3246 }
 0x439   : > { %8900 = vmatmul.mubr.msk.bf16.vlgmr.msra.gmra.mxu0 %vm478_vm2, %v2907_v9  ;;  %8903 = vmatprep.subr.bf16.mxu1 %v12572_v26  ;;  %v3252_v30 = vsel %vm1442_vm3, %v3247_v32, 0 }
 0x43a   : > { %8910 = vmatpush3.bf16.msra.mxu0 %v3204_v18  ;;  %8911 = vmatprep.mubr.msk.bf16.mxu0 %vm9904_vm1, %v12572_v26 }
 0x43b   : > { %8921 = vmatprep.subr.bf16.mxu0 %v12572_v26 }
 0x43f   : > { %8894 = vmatmul.mubr.msk.bf16.vlgmr.msra.gmra.mxu1 %vm478_vm2, %v2857_v39 }
 0x440   : > { %8904 = vmatpush3.bf16.xpose.msra.mxu1 %v2964_v33  ;;  %8905 = vmatprep.mubr.msk.bf16.mxu1 %vm9904_vm1, %v12572_v26 }
 0x441   : > { %8915 = vmatprep.subr.bf16.mxu1 %v12572_v26 }
 0x447   : > { %8906 = vmatmul.mubr.msk.bf16.vlgmr.msra.gmra.mxu1 %vm478_vm2, %v2957_v62 }
 0x448   : > { %8916 = vmatpush3.bf16.msra.mxu1 %v3252_v30  ;;  %8917 = vmatprep.mubr.msk.bf16.mxu1 %vm9904_vm1, %v12572_v26 }
 0x449   : > { %8927 = vmatprep.subr.bf16.mxu1 %v12572_v26 }
 0x452   : > { %v10756_v4 = vpop.f32.mrf.mxu0 }
 0x453   : > { %12585 = vst [vmem:[#allocation11_spill] sm:$0xff] %v10756_v4 }
 0x454   : > { %v8721_v36 = vpop.f32.mrf.mxu0 }
 0x456   : > { %v1483_v61 = vpop.f32.mrf.mxu0 }
 0x458   : > { %v8722_v21 = vpop.f32.mrf.mxu0 }
 0x45a   : > { %v10758_v19 = vpop.f32.mrf.mxu1 }
 0x45b   : > { %12586 = vst [vmem:[#allocation12_spill] sm:$0xff] %v10758_v19 }
 0x45c   : > { %v8727_v22 = vpop.f32.mrf.mxu1 }
 0x45e   : > { %v1531_v52 = vpop.f32.mrf.mxu1 }
 0x460   : > { %v8728_v3 = vpop.f32.mrf.mxu1 }
 0x462   : > { %v10760_v14 = vpop.f32.mrf.mxu0 }
 0x463   : > { %12587 = vst [vmem:[#allocation13_spill] sm:$0xff] %v10760_v14 }
 0x464   : > { %v8733_v24 = vpop.f32.mrf.mxu0 }
 0x466   : > { %v1579_v0 = vpop.f32.mrf.mxu0 }
 0x468   : > { %v8734_v29 = vpop.f32.mrf.mxu0 }
 0x46a   : > { %v10762_v16 = vpop.f32.mrf.mxu0 }
 0x46b   : > { %12588 = vst [vmem:[#allocation14_spill] sm:$0xff] %v10762_v16  ;;  %v10764_v12 = vpop.f32.mrf.mxu1 }
 0x46c   : > { %12589 = vst [vmem:[#allocation15_spill] sm:$0xff] %v10764_v12  ;;  %v8745_v44 = vpop.f32.mrf.mxu0 }
 0x46d   : > { %v8739_v50 = vpop.f32.mrf.mxu1 }
 0x46e   : > { %v1675_v58 = vpop.f32.mrf.mxu0 }
 0x46f   : > { %v1627_v42 = vpop.f32.mrf.mxu1 }
 0x470   : > { %v8746_v56 = vpop.f32.mrf.mxu0 }
 0x471   : > { %v8740_v35 = vpop.f32.mrf.mxu1 }
 0x472   : > { %v10766_v28 = vpop.f32.mrf.mxu0 }
 0x473   : > { %12590 = vst [vmem:[#allocation16_spill] sm:$0xff] %v10766_v28  ;;  %v10768_v2 = vpop.f32.mrf.mxu1 }
 0x474   : > { %12591 = vst [vmem:[#allocation17_spill] sm:$0xff] %v10768_v2  ;;  %v8757_v13 = vpop.f32.mrf.mxu0 }
 0x475   : > { %v8751_v27 = vpop.f32.mrf.mxu1 }
 0x476   : > { %v1771_v38 = vpop.f32.mrf.mxu0 }
 0x477   : > { %v1723_v43 = vpop.f32.mrf.mxu1 }
 0x478   : > { %v8758_v60 = vpop.f32.mrf.mxu0 }
 0x479   : > { %v8752_v20 = vpop.f32.mrf.mxu1 }
 0x47a   : > { %v10770_v17 = vpop.f32.mrf.mxu0 }
 0x47b   : > { %12592 = vst [vmem:[#allocation18_spill] sm:$0xff] %v10770_v17  ;;  %v10772_v39 = vpop.f32.mrf.mxu1 }
 0x47c   : > { %12593 = vst [vmem:[#allocation19_spill] sm:$0xff] %v10772_v39  ;;  %v8769_v23 = vpop.f32.mrf.mxu0 }
 0x47d   : > { %v8763_v25 = vpop.f32.mrf.mxu1 }
 0x47e   : > { %v1867_v48 = vpop.f32.mrf.mxu0 }
 0x47f   : > { %v1819_v49 = vpop.f32.mrf.mxu1 }
 0x480   : > { %v8770_v41 = vpop.f32.mrf.mxu0 }
 0x481   : > { %v8764_v46 = vpop.f32.mrf.mxu1 }
 0x483   : > { %v10774_v6 = vpop.f32.mrf.mxu1 }
 0x484   : > { %12594 = vst [vmem:[#allocation20_spill] sm:$0xff] %v10774_v6 }
 0x485   : > { %v8775_v62 = vpop.f32.mrf.mxu1 }
 0x487   : > { %v1915_v54 = vpop.f32.mrf.mxu1 }
 0x489   : > { %v8776_v55 = vpop.f32.mrf.mxu1 }
 0x48b   : > { %v10776_v15 = vpop.f32.mrf.mxu1 }
 0x48c   : > { %12595 = vst [vmem:[#allocation21_spill] sm:$0xff] %v10776_v15 }
 0x48d   : > { %v8787_v8 = vpop.f32.mrf.mxu1 }
 0x48f   : > { %v2011_v9 = vpop.f32.mrf.mxu1 }
 0x491   : > { %v8788_v18 = vpop.f32.mrf.mxu1 }
 0x493   : > { %v10778_v33 = vpop.f32.mrf.mxu1 }
 0x494   : > { %12596 = vst [vmem:[#allocation22_spill] sm:$0xff] %v10778_v33 }
 0x495   : > { %v8799_v32 = vpop.f32.mrf.mxu1 }
 0x497   : > { %v2107_v30 = vpop.f32.mrf.mxu1 }
 0x499   : > { %v8800_v36 = vpop.f32.mrf.mxu1 }
 0x49f   : > { %v10780_v61 = vpop.f32.mrf.mxu0 }
 0x4a0   : > { %12597 = vst [vmem:[#allocation23_spill] sm:$0xff] %v10780_v61 }
 0x4a1   : > { %v8781_v21 = vpop.f32.mrf.mxu0 }
 0x4a3   : > { %v1963_v22 = vpop.f32.mrf.mxu0 }
 0x4a5   : > { %v8782_v52 = vpop.f32.mrf.mxu0 }
 0x4a7   : > { %v10782_v3 = vpop.f32.mrf.mxu0 }
 0x4a8   : > { %12598 = vst [vmem:[#allocation24_spill] sm:$0xff] %v10782_v3 }
 0x4a9   : > { %v8793_v24 = vpop.f32.mrf.mxu0 }
 0x4ab   : > { %v2059_v0 = vpop.f32.mrf.mxu0 }
 0x4ad   : > { %v8794_v29 = vpop.f32.mrf.mxu0 }
 0x4af   : > { %v10784_v44 = vpop.f32.mrf.mxu0 }
 0x4b0   : > { %12599 = vst [vmem:[#allocation25_spill] sm:$0xff] %v10784_v44 }
 0x4b1   : > { %v8805_v50 = vpop.f32.mrf.mxu0 }
 0x4b3   : > { %v2155_v58 = vpop.f32.mrf.mxu0 }
 0x4b5   : > { %v8806_v42 = vpop.f32.mrf.mxu0 }
 0x4c1   : > { %v10786_v56 = vpop.f32.mrf.mxu0 }
 0x4c2   : > { %v3006_v35 = vsel %vm478_vm2, %v10786_v56, -inf }
 0x4c3   : > { %3007 = vmax.xlane.f32.xlu0 %v3006_v35  ;;  %v8817_v13 = vpop.f32.mrf.mxu0 }
 0x4c5   : > { %v2253_v27 = vpop.f32.mrf.mxu0 }
 0x4c7   : > { %v10790_v38 = vpop.f32.mrf.mxu1  ;;  %v8818_v43 = vpop.f32.mrf.mxu0 }
 0x4c8   : > { %12600 = vst [vmem:[#allocation26_spill] sm:$0xff] %v10790_v38 }
 0x4c9   : > { %v8811_v60 = vpop.f32.mrf.mxu1  ;;  %v10792_v20 = vpop.f32.mrf.mxu0 }
 0x4ca   : > { %v3012_v23 = vsel %vm478_vm2, %v10792_v20, -inf }
 0x4cb   : > { %v2203_v25 = vpop.f32.mrf.mxu1  ;;  %3013 = vmax.xlane.f32.xlu0 %v3012_v23  ;;  %v8829_v48 = vpop.f32.mrf.mxu0 }
 0x4cd   : > { %v8812_v49 = vpop.f32.mrf.mxu1  ;;  %v2353_v41 = vpop.f32.mrf.mxu0 }
 0x4cf   : > { %v10796_v46 = vpop.f32.mrf.mxu1  ;;  %v8830_v62 = vpop.f32.mrf.mxu0 }
 0x4d0   : > { %v3009_v54 = vsel %vm478_vm2, %v10796_v46, -inf }
 0x4d1   : > { %3010 = vmax.xlane.f32.xlu1 %v3009_v54  ;;  %v8823_v55 = vpop.f32.mrf.mxu1  ;;  %v10800_v8 = vpop.f32.mrf.mxu0 }
 0x4d2   : > { %v3018_v32 = vsel %vm478_vm2, %v10800_v8, -inf }
 0x4d3   : > { %v2303_v9 = vpop.f32.mrf.mxu1  ;;  %v8841_v18 = vpop.f32.mrf.mxu0 }
 0x4d5   : > { %v8824_v30 = vpop.f32.mrf.mxu1  ;;  %3019 = vmax.xlane.f32.xlu1 %v3018_v32  ;;  %v2453_v36 = vpop.f32.mrf.mxu0 }
 0x4d7   : > { %v10804_v21 = vpop.f32.mrf.mxu1  ;;  %v8842_v22 = vpop.f32.mrf.mxu0 }
 0x4d8   : > { %v3015_v52 = vsel %vm478_vm2, %v10804_v21, -inf }
 0x4d9   : > { %v8835_v24 = vpop.f32.mrf.mxu1  ;;  %3016 = vmax.xlane.f32.xlu0 %v3015_v52  ;;  %v10808_v0 = vpop.f32.mrf.mxu0 }
 0x4da   : > { %v3024_v29 = vsel %vm478_vm2, %v10808_v0, -inf }
 0x4db   : > { %v2403_v50 = vpop.f32.mrf.mxu1  ;;  %3025 = vmax.xlane.f32.xlu1 %v3024_v29  ;;  %v8853_v58 = vpop.f32.mrf.mxu0 }
 0x4dd   : > { %v8836_v42 = vpop.f32.mrf.mxu1  ;;  %v2553_v35 = vpop.f32.mrf.mxu0 }
 0x4df   : > { %v10812_v13 = vpop.f32.mrf.mxu1  ;;  %v8854_v27 = vpop.f32.mrf.mxu0 }
 0x4e0   : > { %v3021_v43 = vsel %vm478_vm2, %v10812_v13, -inf }
 0x4e1   : > { %v8847_v60 = vpop.f32.mrf.mxu1  ;;  %3022 = vmax.xlane.f32.xlu0 %v3021_v43  ;;  %v10816_v23 = vpop.f32.mrf.mxu0 }
 0x4e2   : > { %v3030_v25 = vsel %vm478_vm2, %v10816_v23, -inf }
 0x4e3   : > { %v2503_v48 = vpop.f32.mrf.mxu1  ;;  %3031 = vmax.xlane.f32.xlu1 %v3030_v25  ;;  %v8865_v49 = vpop.f32.mrf.mxu0 }
 0x4e5   : > { %v8848_v41 = vpop.f32.mrf.mxu1  ;;  %v2653_v62 = vpop.f32.mrf.mxu0 }
 0x4e7   : > { %v10820_v54 = vpop.f32.mrf.mxu1  ;;  %v8866_v55 = vpop.f32.mrf.mxu0 }
 0x4e8   : > { %v3027_v9 = vsel %vm478_vm2, %v10820_v54, -inf }
 0x4e9   : > { %v8859_v18 = vpop.f32.mrf.mxu1  ;;  %3028 = vmax.xlane.f32.xlu0 %v3027_v9  ;;  %v10824_v32 = vpop.f32.mrf.mxu0 }
 0x4ea   : > { %v3036_v30 = vsel %vm478_vm2, %v10824_v32, -inf }
 0x4eb   : > { %v2603_v36 = vpop.f32.mrf.mxu1  ;;  %3037 = vmax.xlane.f32.xlu1 %v3036_v30  ;;  %v8877_v22 = vpop.f32.mrf.mxu0 }
 0x4ed   : > { %v8860_v52 = vpop.f32.mrf.mxu1  ;;  %v2753_v24 = vpop.f32.mrf.mxu0 }
 0x4ef   : > { %v10828_v29 = vpop.f32.mrf.mxu1  ;;  %v8878_v50 = vpop.f32.mrf.mxu0 }
 0x4f0   : > { %v3033_v58 = vsel %vm478_vm2, %v10828_v29, -inf }
 0x4f1   : > { %v8871_v42 = vpop.f32.mrf.mxu1  ;;  %3034 = vmax.xlane.f32.xlu0 %v3033_v58  ;;  %v10832_v35 = vpop.f32.mrf.mxu0 }
 0x4f2   : > { %v3042_v27 = vsel %vm478_vm2, %v10832_v35, -inf }
 0x4f3   : > { %v2703_v43 = vpop.f32.mrf.mxu1  ;;  %3043 = vmax.xlane.f32.xlu1 %v3042_v27  ;;  %v8889_v60 = vpop.f32.mrf.mxu0 }
 0x4f5   : > { %v8872_v25 = vpop.f32.mrf.mxu1  ;;  %v2853_v48 = vpop.f32.mrf.mxu0 }
 0x4f7   : > { %v10836_v49 = vpop.f32.mrf.mxu1  ;;  %v8890_v41 = vpop.f32.mrf.mxu0 }
 0x4f8   : > { %v3039_v62 = vsel %vm478_vm2, %v10836_v49, -inf }
 0x4f9   : > { %v8883_v55 = vpop.f32.mrf.mxu1  ;;  %3040 = vmax.xlane.f32.xlu0 %v3039_v62  ;;  %v10840_v9 = vpop.f32.mrf.mxu0 }
 0x4fa   : > { %v3048_v18 = vsel %vm478_vm2, %v10840_v9, -inf  ;;  %v10856_v55 = vpop.permute.xlu0 %3342 }
 0x4fb   : > { %v2803_v30 = vpop.f32.mrf.mxu1  ;;  %3049 = vmax.xlane.f32.xlu1 %v3048_v18  ;;  %v8901_v36 = vpop.f32.mrf.mxu0 }
 0x4fc   : > { %v10858_v18 = vpop.permute.xlu1 %3294 }
 0x4fd   : > { %v8884_v22 = vpop.f32.mrf.mxu1  ;;  %v2953_v52 = vpop.f32.mrf.mxu0 }
 0x4fe   : > { %v10860_v30 = vpop.permute.xlu0 %3438 }
 0x4ff   : > { %v10844_v24 = vpop.f32.mrf.mxu1  ;;  %v8902_v50 = vpop.f32.mrf.mxu0 }
 0x500   : > { %v3045_v58 = vsel %vm478_vm2, %v10844_v24, -inf  ;;  %v10862_v36 = vpop.permute.xlu1 %3390 }
 0x501   : > { %v8895_v42 = vpop.f32.mrf.mxu1  ;;  %3046 = vmax.xlane.f32.xlu0 %v3045_v58 }
 0x502   : > { %v10864_v22 = vpop.permute.xlu0 %3534 }
 0x503   : > { %v2903_v27 = vpop.f32.mrf.mxu1 }
 0x504   : > { %v10866_v52 = vpop.permute.xlu1 %3486 }
 0x505   : > { %v8896_v43 = vpop.f32.mrf.mxu1 }
 0x506   : > { %v10868_v50 = vpop.permute.xlu0 %3630 }
 0x507   : > { %v10848_v60 = vpop.f32.mrf.mxu1 }
 0x508   : > { %v3051_v25 = vsel %vm478_vm2, %v10848_v60, -inf  ;;  %v10870_v58 = vpop.permute.xlu1 %3582 }
 0x509   : > { %v8907_v48 = vpop.f32.mrf.mxu1  ;;  %3052 = vmax.xlane.f32.xlu0 %v3051_v25 }
 0x50b   : > { %v3003_v41 = vpop.f32.mrf.mxu1 }
 0x50c   : > { %3822 = vrot.lane.b32.xlu1 %v10170_v10, %s9909_s15  ;;  %v10873_v25 = vpop.permute.xlu1 %3678 }
 0x50d   : > { %v8908_v62 = vpop.f32.mrf.mxu1 }
 0x510   : > { %v10876_v62 = vpop.permute.xlu1 %3726 }
 0x51f   : > { %3774 = vrot.lane.b32.xlu0 %v10162_v5, %s9909_s15 }
 0x54c   : > { %v3008_v42 = vpop.xlane.xlu0 %3007 }
 0x54d   : > { %v3054_v27 = vsub.f32 %v10786_v56, %v3008_v42 }
 0x54f   : > { %v3070_v43 = vmul.f32 1.442695, %v3054_v27 }
 0x551   : > { %9533 = vpow2.f32 %v3070_v43 }
 0x554   : > { %v3014_v48 = vpop.xlane.xlu0 %3013 }
 0x555   : > { %v3056_v41 = vsub.f32 %v10792_v20, %v3014_v48 }
 0x557   : > { %v3074_v26 = vmul.f32 1.442695, %v3056_v41 }
 0x559   : > { %9535 = vpow2.f32 %v3074_v26 }
 0x55a   : > { %v3011_v17 = vpop.xlane.xlu1 %3010 }
 0x55b   : > { %v3055_v15 = vsub.f32 %v10796_v46, %v3011_v17 }
 0x55d   : > { %v3072_v28 = vmul.f32 1.442695, %v3055_v15 }
 0x55e   : > { %v10879_v6 = vpop.eup %9533  ;;  %v3020_v16 = vpop.xlane.xlu1 %3019 }
 0x55f   : > { %9537 = vpow2.f32 %v3072_v28  ;;  %v3058_v56 = vsub.f32 %v10800_v8, %v3020_v16  ;;  %v3102_v42 = vsel %vm478_vm2, %v10879_v6, 0.0 }
 0x560   : > { %3103 = vadd.xlane.f32.xlu1 %v3102_v42 }
 0x561   : > { %v3078_v27 = vmul.f32 1.442695, %v3058_v56 }
 0x562   : > { %v3017_v20 = vpop.xlane.xlu0 %3016 }
 0x563   : > { %9539 = vpow2.f32 %v3078_v27  ;;  %v3057_v43 = vsub.f32 %v10804_v21, %v3017_v20 }
 0x564   : > { %v3026_v26 = vpop.xlane.xlu1 %3025 }
 0x565   : > { %v3076_v48 = vmul.f32 1.442695, %v3057_v43  ;;  %v3060_v17 = vsub.f32 %v10808_v0, %v3026_v26 }
 0x566   : > { %v10886_v15 = vpop.eup %9535 }
 0x567   : > { %9541 = vpow2.f32 %v3076_v48  ;;  %v3082_v46 = vmul.f32 1.442695, %v3060_v17  ;;  %v3108_v16 = vsel %vm478_vm2, %v10886_v15, 0.0 }
 0x568   : > { %3109 = vadd.xlane.f32.xlu1 %v3108_v16 }
 0x569   : > { %9543 = vpow2.f32 %v3082_v46 }
 0x56a   : > { %v3023_v28 = vpop.xlane.xlu0 %3022 }
 0x56b   : > { %v3059_v8 = vsub.f32 %v10812_v13, %v3023_v28 }
 0x56c   : > { %v10891_v41 = vpop.eup %9537  ;;  %v3032_v56 = vpop.xlane.xlu1 %3031 }
 0x56d   : > { %v3080_v21 = vmul.f32 1.442695, %v3059_v8  ;;  %v3062_v42 = vsub.f32 %v10816_v23, %v3032_v56  ;;  %v3105_v0 = vsel %vm478_vm2, %v10891_v41, 0.0 }
 0x56e   : > { %3106 = vadd.xlane.f32.xlu0 %v3105_v0 }
 0x56f   : > { %9545 = vpow2.f32 %v3080_v21  ;;  %v3086_v27 = vmul.f32 1.442695, %v3062_v42 }
 0x570   : > { %v10896_v20 = vpop.eup %9539 }
 0x571   : > { %9547 = vpow2.f32 %v3086_v27  ;;  %v3114_v43 = vsel %vm478_vm2, %v10896_v20, 0.0 }
 0x572   : > { %3115 = vadd.xlane.f32.xlu1 %v3114_v43  ;;  %v3029_v13 = vpop.xlane.xlu0 %3028 }
 0x573   : > { %v3061_v26 = vsub.f32 %v10820_v54, %v3029_v13 }
 0x574   : > { %v10901_v48 = vpop.eup %9541  ;;  %v3038_v17 = vpop.xlane.xlu1 %3037 }
 0x575   : > { %v3084_v23 = vmul.f32 1.442695, %v3061_v26  ;;  %v3064_v46 = vsub.f32 %v10824_v32, %v3038_v17  ;;  %v3111_v16 = vsel %vm478_vm2, %v10901_v48, 0.0 }
 0x576   : > { %v10906_v28 = vpop.eup %9543  ;;  %3112 = vadd.xlane.f32.xlu0 %v3111_v16 }
 0x577   : > { %9549 = vpow2.f32 %v3084_v23  ;;  %v3090_v8 = vmul.f32 1.442695, %v3064_v46  ;;  %v3120_v56 = vsel %vm478_vm2, %v10906_v28, 0.0 }
 0x578   : > { %3121 = vadd.xlane.f32.xlu1 %v3120_v56 }
 0x579   : > { %9551 = vpow2.f32 %v3090_v8 }
 0x57a   : > { %v3035_v54 = vpop.xlane.xlu0 %3034 }
 0x57b   : > { %v3063_v21 = vsub.f32 %v10828_v29, %v3035_v54 }
 0x57c   : > { %v10911_v42 = vpop.eup %9545  ;;  %v3044_v0 = vpop.xlane.xlu1 %3043 }
 0x57d   : > { %v3088_v32 = vmul.f32 1.442695, %v3063_v21  ;;  %v3066_v27 = vsub.f32 %v10832_v35, %v3044_v0  ;;  %v3117_v43 = vsel %vm478_vm2, %v10911_v42, 0.0 }
 0x57e   : > { %v10916_v13 = vpop.eup %9547  ;;  %3118 = vadd.xlane.f32.xlu0 %v3117_v43 }
 0x57f   : > { %9553 = vpow2.f32 %v3088_v32  ;;  %v3094_v26 = vmul.f32 1.442695, %v3066_v27  ;;  %v3126_v17 = vsel %vm478_vm2, %v10916_v13, 0.0 }
 0x580   : > { %3127 = vadd.xlane.f32.xlu1 %v3126_v17 }
 0x581   : > { %9555 = vpow2.f32 %v3094_v26 }
 0x582   : > { %v3041_v29 = vpop.xlane.xlu0 %3040 }
 0x583   : > { %v3065_v23 = vsub.f32 %v10836_v49, %v3041_v29 }
 0x584   : > { %v10921_v46 = vpop.eup %9549 }
 0x585   : > { %v3092_v16 = vmul.f32 1.442695, %v3065_v23  ;;  %v3123_v35 = vsel %vm478_vm2, %v10921_v46, 0.0  ;;  %v3050_v23 = vpop.xlane.xlu1 %3049 }
 0x586   : > { %v10925_v8 = vpop.eup %9551  ;;  %3124 = vadd.xlane.f32.xlu0 %v3123_v35 }
 0x587   : > { %9557 = vpow2.f32 %v3092_v16  ;;  %v3132_v56 = vsel %vm478_vm2, %v10925_v8, 0.0  ;;  %v3068_v16 = vsub.f32 %v10840_v9, %v3050_v23 }
 0x588   : > { %3133 = vadd.xlane.f32.xlu1 %v3132_v56 }
 0x589   : > { %v3098_v35 = vmul.f32 1.442695, %v3068_v16 }
 0x58a   : > { %v3047_v54 = vpop.xlane.xlu0 %3046 }
 0x58b   : > { %v3067_v21 = vsub.f32 %v10844_v24, %v3047_v54 }
 0x58c   : > { %v10930_v0 = vpop.eup %9553 }
 0x58d   : > { %v3096_v49 = vmul.f32 1.442695, %v3067_v21  ;;  %v3129_v32 = vsel %vm478_vm2, %v10930_v0, 0.0 }
 0x58e   : > { %v10934_v27 = vpop.eup %9555  ;;  %3130 = vadd.xlane.f32.xlu0 %v3129_v32 }
 0x58f   : > { %9559 = vpow2.f32 %v3096_v49  ;;  %v3138_v43 = vsel %vm478_vm2, %v10934_v27, 0.0 }
 0x590   : > { %3139 = vadd.xlane.f32.xlu1 %v3138_v43  ;;  %9561 = vpow2.f32 %v3098_v35 }
 0x592   : > { %v3053_v56 = vpop.xlane.xlu0 %3052 }
 0x593   : > { %v3069_v54 = vsub.f32 %v10848_v60, %v3053_v56  ;;  %v10968_v60 = vpop.permute.xlu1 %3822 }
 0x594   : > { %v10938_v26 = vpop.eup %9557 }
 0x595   : > { %v3135_v17 = vsel %vm478_vm2, %v10938_v26, 0.0  ;;  %v3100_v21 = vmul.f32 1.442695, %v3069_v54 }
 0x596   : > { %3136 = vadd.xlane.f32.xlu0 %v3135_v17  ;;  %v10984_v23 = vpop.permute.xlu0 %3774 }
 0x597   : > { %9563 = vpow2.f32 %v3100_v21 }
 0x59c   : > { %v10942_v24 = vpop.eup %9559 }
 0x59d   : > { %v3141_v29 = vsel %vm478_vm2, %v10942_v24, 0.0  ;;  %v10952_v49 = vpop.eup %9561 }
 0x59e   : > { %3142 = vadd.xlane.f32.xlu0 %v3141_v29  ;;  %v3144_v32 = vsel %vm478_vm2, %v10952_v49, 0.0 }
 0x5a1   : > { %3918 = vrot.lane.b32.xlu1 %v10172_v11, %s9909_s15 }
 0x5a4   : > { %v10956_v43 = vpop.eup %9563 }
 0x5a5   : > { %v3147_v9 = vsel %vm478_vm2, %v10956_v43, 0.0 }
 0x5b4   : > { %3870 = vrot.lane.b32.xlu0 %v10164_v7, %s9909_s15  ;;  %s12420_s15 = scalar_lea.vmem [#allocation7], %s8152_s12  ;;  %s8334_s12 = sshll.u32 %s9972_s22, 11 }
 0x5b5   : > { %s9919_s22 = smov [#allocation7]  }
 0x5c5   : > { %3145 = vadd.xlane.f32.xlu1 %v3144_v32  ;;  %v3300_v32 = vsel %vm1442_vm3, %v10858_v18, 0 }
 0x5d3   : > { %3148 = vadd.xlane.f32.xlu0 %v3147_v9 }
 0x5d6   : > { %4018 = vrot.lane.b32.xlu1 %v10126_v40, %s9910_s23 }
 0x5da   : > { %4016 = vrot.lane.b32.xlu1 %v10126_v40, %s9911_s27 }
 0x5de   : > { %4118 = vrot.lane.b32.xlu1 %v10122_v37, %s9910_s23 }
 0x5e2   : > { %4116 = vrot.lane.b32.xlu1 %v10122_v37, %s9911_s27 }
 0x5e6   : > { %4218 = vrot.lane.b32.xlu1 %v10138_v51, %s9910_s23 }
 0x5e9   : > { %v3104_v17 = vpop.xlane.xlu1 %3103  ;;  %3968 = vrot.lane.b32.xlu0 %v10118_v34, %s9910_s23 }
 0x5ea   : > { %9565 = vrcp.f32 %v3104_v17  ;;  %4216 = vrot.lane.b32.xlu1 %v10138_v51, %s9911_s27 }
 0x5ed   : > { %3966 = vrot.lane.b32.xlu0 %v10118_v34, %s9911_s27 }
 0x5ee   : > { %4318 = vrot.lane.b32.xlu1 %v10140_v53, %s9910_s23 }
 0x5f1   : > { %v3110_v29 = vpop.xlane.xlu1 %3109  ;;  %4068 = vrot.lane.b32.xlu0 %v10116_v31, %s9910_s23 }
 0x5f2   : > { %9567 = vrcp.f32 %v3110_v29  ;;  %4316 = vrot.lane.b32.xlu1 %v10140_v53, %s9911_s27 }
 0x5f5   : > { %4066 = vrot.lane.b32.xlu0 %v10116_v31, %s9911_s27 }
 0x5f6   : > { %4418 = vrot.lane.b32.xlu1 %v10154_v63, %s9910_s23 }
 0x5f7   : > { %v9566_v16 = vpop.eup %9565  ;;  %v3107_v35 = vpop.xlane.xlu0 %3106 }
 0x5f8   : > { %9569 = vrcp.f32 %v3107_v35  ;;  %v3166_v56 = vmul.f32 %v9566_v16, %v10879_v6  ;;  %v12601_v6 = vmov 0.0   ;;  %v3396_v35 = vsel %vm1442_vm3, %v10862_v36, 0 }
 0x5f9   : > { %4168 = vrot.lane.b32.xlu0 %v10132_v45, %s9910_s23 }
 0x5fa   : > { %4416 = vrot.lane.b32.xlu1 %v10154_v63, %s9911_s27  ;;  %v3182_v54 = vpack.c.bf16 %v3166_v56, %v3166_v56 }
 0x5fb   : > { %v3116_v21 = vpop.xlane.xlu1 %3115 }
 0x5fc   : > { %9571 = vrcp.f32 %v3116_v21  ;;  %8912 = vmatmul.mubr.msk.bf16.vlgmr.msra.gmra.mxu0 %vm478_vm2, %v3182_v54 }
 0x5fd   : > { %8922 = vmatpush3.bf16.msra.mxu0 %v3300_v32  ;;  %4166 = vrot.lane.b32.xlu0 %v10132_v45, %s9911_s27 }
 0x5fe   : > { %4518 = vrot.lane.b32.xlu1 %v10156_v1, %s9910_s23  ;;  %8923 = vmatprep.mubr.msk.bf16.mxu0 %vm9904_vm1, %v12601_v6 }
 0x5ff   : > { %v9568_v9 = vpop.eup %9567  ;;  %v3113_v17 = vpop.xlane.xlu0 %3112  ;;  %8933 = vmatprep.subr.bf16.mxu0 %v12601_v6 }
 0x600   : > { %9573 = vrcp.f32 %v3113_v17  ;;  %v3168_v18 = vmul.f32 %v9568_v9, %v10886_v15  ;;  %v3348_v9 = vsel %vm1442_vm3, %v10856_v55, 0  ;;  %v3492_v55 = vsel %vm1442_vm3, %v10866_v52, 0 }
 0x601   : > { %v3122_v29 = vpop.xlane.xlu1 %3121  ;;  %4268 = vrot.lane.b32.xlu0 %v10134_v47, %s9910_s23 }
 0x602   : > { %9575 = vrcp.f32 %v3122_v29  ;;  %4516 = vrot.lane.b32.xlu1 %v10156_v1, %s9911_s27  ;;  %v3184_v16 = vpack.c.bf16 %v3168_v18, %v3168_v18 }
 0x604   : > { %8924 = vmatmul.mubr.msk.bf16.vlgmr.msra.gmra.mxu0 %vm478_vm2, %v3184_v16 }
 0x605   : > { %v9570_v56 = vpop.eup %9569  ;;  %8934 = vmatpush3.bf16.msra.mxu0 %v3396_v35  ;;  %4266 = vrot.lane.b32.xlu0 %v10134_v47, %s9911_s27 }
 0x606   : > { %4618 = vrot.lane.b32.xlu1 %v10170_v10, %s9910_s23  ;;  %v3167_v15 = vmul.f32 %v9570_v56, %v10891_v41  ;;  %8935 = vmatprep.mubr.msk.bf16.mxu0 %vm9904_vm1, %v12601_v6 }
 0x607   : > { %v3119_v54 = vpop.xlane.xlu0 %3118  ;;  %8945 = vmatprep.subr.bf16.mxu0 %v12601_v6 }
 0x608   : > { %9577 = vrcp.f32 %v3119_v54  ;;  %v3183_v36 = vpack.c.bf16 %v3167_v15, %v3167_v15  ;;  %v3444_v15 = vsel %vm1442_vm3, %v10860_v30, 0  ;;  %v3588_v30 = vsel %vm1442_vm3, %v10870_v58, 0 }
 0x609   : > { %v9572_v21 = vpop.eup %9571  ;;  %v3128_v32 = vpop.xlane.xlu1 %3127  ;;  %4368 = vrot.lane.b32.xlu0 %v10146_v57, %s9910_s23 }
 0x60a   : > { %v3170_v17 = vmul.f32 %v9572_v21, %v10896_v20  ;;  %9579 = vrcp.f32 %v3128_v32  ;;  %4616 = vrot.lane.b32.xlu1 %v10170_v10, %s9911_s27  ;;  %8918 = vmatmul.mubr.msk.bf16.vlgmr.msra.gmra.mxu1 %vm478_vm2, %v3183_v36 }
 0x60b   : > { %8928 = vmatpush3.bf16.msra.mxu1 %v3348_v9  ;;  %8929 = vmatprep.mubr.msk.bf16.mxu1 %vm9904_vm1, %v12601_v6 }
 0x60c   : > { %v3186_v41 = vpack.c.bf16 %v3170_v17, %v3170_v17  ;;  %8939 = vmatprep.subr.bf16.mxu1 %v12601_v6 }
 0x60d   : > { %v9574_v18 = vpop.eup %9573  ;;  %4366 = vrot.lane.b32.xlu0 %v10146_v57, %s9911_s27 }
 0x60e   : > { %4718 = vrot.lane.b32.xlu1 %v10172_v11, %s9910_s23  ;;  %8936 = vmatmul.mubr.msk.bf16.vlgmr.msra.gmra.mxu0 %vm478_vm2, %v3186_v41  ;;  %v3169_v20 = vmul.f32 %v9574_v18, %v10901_v48 }
 0x60f   : > { %v9576_v29 = vpop.eup %9575  ;;  %8946 = vmatpush3.bf16.msra.mxu0 %v3492_v55  ;;  %v3125_v16 = vpop.xlane.xlu0 %3124  ;;  %8947 = vmatprep.mubr.msk.bf16.mxu0 %vm9904_vm1, %v12601_v6 }
 0x610   : > { %v3172_v35 = vmul.f32 %v9576_v29, %v10906_v28  ;;  %9581 = vrcp.f32 %v3125_v16  ;;  %v3185_v56 = vpack.c.bf16 %v3169_v20, %v3169_v20  ;;  %8957 = vmatprep.subr.bf16.mxu0 %v12601_v6  ;;  %v3780_v16 = vsel %vm1442_vm3, %v10984_v23, 0 }
 0x611   : > { %v3134_v52 = vpop.xlane.xlu1 %3133  ;;  %4468 = vrot.lane.b32.xlu0 %v10148_v59, %s9910_s23 }
 0x612   : > { %9583 = vrcp.f32 %v3134_v52  ;;  %4716 = vrot.lane.b32.xlu1 %v10172_v11, %s9911_s27  ;;  %8930 = vmatmul.mubr.msk.bf16.vlgmr.msra.gmra.mxu1 %vm478_vm2, %v3185_v56  ;;  %v3188_v48 = vpack.c.bf16 %v3172_v35, %v3172_v35 }
 0x613   : > { %8940 = vmatpush3.bf16.msra.mxu1 %v3444_v15  ;;  %8941 = vmatprep.mubr.msk.bf16.mxu1 %vm9904_vm1, %v12601_v6 }
 0x614   : > { %8951 = vmatprep.subr.bf16.mxu1 %v12601_v6 }
 0x615   : > { %v9578_v28 = vpop.eup %9577  ;;  %4466 = vrot.lane.b32.xlu0 %v10148_v59, %s9911_s27 }
 0x616   : > { %v3171_v54 = vmul.f32 %v9578_v28, %v10911_v42  ;;  %4958 = vrot.lane.b32.xlu1 %v10118_v34, %s9912_s28  ;;  %8948 = vmatmul.mubr.msk.bf16.vlgmr.msra.gmra.mxu0 %vm478_vm2, %v3188_v48  ;;  %v3540_v42 = vsel %vm1442_vm3, %v10864_v22, 0  ;;  %v3684_v22 = vsel %vm1442_vm3, %v10873_v25, 0  ;;  %v3636_v25 = vsel %vm1442_vm3, %v10868_v50, 0 }
 0x617   : > { %v9580_v36 = vpop.eup %9579  ;;  %8958 = vmatpush3.bf16.msra.mxu0 %v3588_v30  ;;  %v3131_v21 = vpop.xlane.xlu0 %3130  ;;  %8959 = vmatprep.mubr.msk.bf16.mxu0 %vm9904_vm1, %v12601_v6 }
 0x618   : > { %v3187_v32 = vpack.c.bf16 %v3171_v54, %v3171_v54  ;;  %v3174_v9 = vmul.f32 %v9580_v36, %v10916_v13  ;;  %9585 = vrcp.f32 %v3131_v21  ;;  %8969 = vmatprep.subr.bf16.mxu0 %v12601_v6  ;;  %v3828_v54 = vsel %vm1442_vm3, %v10968_v60, 0 }
 0x619   : > { %v3140_v58 = vpop.xlane.xlu1 %3139  ;;  %4568 = vrot.lane.b32.xlu0 %v10162_v5, %s9910_s23 }
 0x61a   : > { %9587 = vrcp.f32 %v3140_v58  ;;  %5054 = vrot.lane.b32.xlu1 %v10116_v31, %s9912_s28  ;;  %8942 = vmatmul.mubr.msk.bf16.vlgmr.msra.gmra.mxu1 %vm478_vm2, %v3187_v32  ;;  %v3190_v13 = vpack.c.bf16 %v3174_v9, %v3174_v9 }
 0x61b   : > { %8952 = vmatpush3.bf16.msra.mxu1 %v3540_v42  ;;  %8953 = vmatprep.mubr.msk.bf16.mxu1 %vm9904_vm1, %v12601_v6 }
 0x61c   : > { %8963 = vmatprep.subr.bf16.mxu1 %v12601_v6 }
 0x61d   : > { %v9582_v17 = vpop.eup %9581  ;;  %4566 = vrot.lane.b32.xlu0 %v10162_v5, %s9911_s27  ;;  %v3919_v21 = vpop.permute.xlu1 %3918 }
 0x61e   : > { %v3173_v41 = vmul.f32 %v9582_v17, %v10921_v46  ;;  %5150 = vrot.lane.b32.xlu1 %v10132_v45, %s9912_s28  ;;  %8960 = vmatmul.mubr.msk.bf16.vlgmr.msra.gmra.mxu0 %vm478_vm2, %v3190_v13  ;;  %v3924_v60 = vsel %vm1442_vm3, %v3919_v21, 0 }
 0x61f   : > { %v9584_v18 = vpop.eup %9583  ;;  %8970 = vmatpush3.bf16.msra.mxu0 %v3684_v22  ;;  %v3137_v55 = vpop.xlane.xlu0 %3136  ;;  %8971 = vmatprep.mubr.msk.bf16.mxu0 %vm9904_vm1, %v12601_v6 }
 0x620   : > { %v3189_v20 = vpack.c.bf16 %v3173_v41, %v3173_v41  ;;  %v3176_v29 = vmul.f32 %v9584_v18, %v10925_v8  ;;  %9589 = vrcp.f32 %v3137_v55  ;;  %8981 = vmatprep.subr.bf16.mxu0 %v12601_v6 }
 0x621   : > { %4668 = vrot.lane.b32.xlu0 %v10164_v7, %s9910_s23  ;;  %s8061_s23 = sshll.u32 %s12420_s15, 4  ;;  %s12516_s23 = int_to_ptr.vmem [resolvable:$true] %s8061_s23 }
 0x622   : > { %5246 = vrot.lane.b32.xlu1 %v10134_v47, %s9912_s28  ;;  %8954 = vmatmul.mubr.msk.bf16.vlgmr.msra.gmra.mxu1 %vm478_vm2, %v3189_v20  ;;  %v3192_v46 = vpack.c.bf16 %v3176_v29, %v3176_v29 }
 0x623   : > { %8964 = vmatpush3.bf16.msra.mxu1 %v3636_v25  ;;  %8965 = vmatprep.mubr.msk.bf16.mxu1 %vm9904_vm1, %v12601_v6 }
 0x624   : > { %8975 = vmatprep.subr.bf16.mxu1 %v12601_v6 }
 0x625   : > { %v9586_v8 = vpop.eup %9585  ;;  %4666 = vrot.lane.b32.xlu0 %v10164_v7, %s9911_s27 }
 0x626   : > { %v3175_v50 = vmul.f32 %v9586_v8, %v10930_v0  ;;  %5342 = vrot.lane.b32.xlu1 %v10146_v57, %s9912_s28  ;;  %8972 = vmatmul.mubr.msk.bf16.vlgmr.msra.gmra.mxu0 %vm478_vm2, %v3192_v46  ;;  %v3732_v0 = vsel %vm1442_vm3, %v10876_v62, 0 }
 0x627   : > { %v9588_v35 = vpop.eup %9587  ;;  %8982 = vmatpush3.bf16.msra.mxu0 %v3780_v16  ;;  %v3143_v56 = vpop.xlane.xlu0 %3142  ;;  %8983 = vmatprep.mubr.msk.bf16.mxu0 %vm9904_vm1, %v12601_v6 }
 0x628   : > { %v3191_v52 = vpack.c.bf16 %v3175_v50, %v3175_v50  ;;  %v3178_v15 = vmul.f32 %v9588_v35, %v10934_v27  ;;  %9591 = vrcp.f32 %v3143_v56  ;;  %8993 = vmatprep.subr.bf16.mxu0 %v12601_v6 }
 0x629   : > { %5006 = vrot.lane.b32.xlu0 %v10126_v40, %s9912_s28 }
 0x62a   : > { %5438 = vrot.lane.b32.xlu1 %v10148_v59, %s9912_s28  ;;  %8966 = vmatmul.mubr.msk.bf16.vlgmr.msra.gmra.mxu1 %vm478_vm2, %v3191_v52  ;;  %v3194_v27 = vpack.c.bf16 %v3178_v15, %v3178_v15 }
 0x62b   : > { %8976 = vmatpush3.bf16.msra.mxu1 %v3732_v0  ;;  %v3871_v23 = vpop.permute.xlu0 %3870  ;;  %8977 = vmatprep.mubr.msk.bf16.mxu1 %vm9904_vm1, %v12601_v6 }
 0x62c   : > { %v3876_v48 = vsel %vm1442_vm3, %v3871_v23, 0  ;;  %8987 = vmatprep.subr.bf16.mxu1 %v12601_v6 }
 0x62d   : > { %v9590_v28 = vpop.eup %9589  ;;  %5102 = vrot.lane.b32.xlu0 %v10122_v37, %s9912_s28 }
 0x62e   : > { %v3177_v62 = vmul.f32 %v9590_v28, %v10938_v26  ;;  %5486 = vrot.lane.b32.xlu1 %v10156_v1, %s9912_s28  ;;  %8984 = vmatmul.mubr.msk.bf16.vlgmr.msra.gmra.mxu0 %vm478_vm2, %v3194_v27 }
 0x62f   : > { %8994 = vmatpush3.bf16.msra.mxu0 %v3876_v48  ;;  %8995 = vmatprep.mubr.msk.bf16.mxu0 %vm9904_vm1, %v12601_v6 }
 0x630   : > { %v3193_v30 = vpack.c.bf16 %v3177_v62, %v3177_v62  ;;  %9005 = vmatprep.subr.bf16.mxu0 %v12601_v6 }
 0x631   : > { %5198 = vrot.lane.b32.xlu0 %v10138_v51, %s9912_s28 }
 0x632   : > { %8978 = vmatmul.mubr.msk.bf16.vlgmr.msra.gmra.mxu1 %vm478_vm2, %v3193_v30 }
 0x633   : > { %8988 = vmatpush3.bf16.msra.mxu1 %v3828_v54  ;;  %8989 = vmatprep.mubr.msk.bf16.mxu1 %vm9904_vm1, %v12601_v6 }
 0x634   : > { %8999 = vmatprep.subr.bf16.mxu1 %v12601_v6 }
 0x635   : > { %v9592_v26 = vpop.eup %9591  ;;  %5294 = vrot.lane.b32.xlu0 %v10140_v53, %s9912_s28 }
 0x636   : > { %v3179_v36 = vmul.f32 %v9592_v26, %v10942_v24 }
 0x638   : > { %v3195_v32 = vpack.c.bf16 %v3179_v36, %v3179_v36 }
 0x639   : > { %5390 = vrot.lane.b32.xlu0 %v10154_v63, %s9912_s28 }
 0x63a   : > { %8990 = vmatmul.mubr.msk.bf16.vlgmr.msra.gmra.mxu1 %vm478_vm2, %v3195_v32 }
 0x63b   : > { %9000 = vmatpush3.bf16.msra.mxu1 %v3924_v60  ;;  %9001 = vmatprep.mubr.msk.bf16.mxu1 %vm9904_vm1, %v12601_v6 }
 0x63c   : > { %9011 = vmatprep.subr.bf16.mxu1 %v12601_v6 }
 0x64e   : > { %v3146_v9 = vpop.xlane.xlu1 %3145 }
 0x64f   : > { %9593 = vrcp.f32 %v3146_v9 }
 0x652   : > { %v4019_v58 = vpop.permute.xlu1 %4018 }
 0x653   : > { %v4024_v0 = vsel %vm478_vm2, %v4019_v58, 0 }
 0x656   : > { %v4017_v42 = vpop.permute.xlu1 %4016 }
 0x65a   : > { %v4119_v24 = vpop.permute.xlu1 %4118 }
 0x65b   : > { %v4124_v62 = vsel %vm478_vm2, %v4119_v24, 0 }
 0x65c   : > { %v9594_v13 = vpop.eup %9593  ;;  %v3149_v17 = vpop.xlane.xlu0 %3148 }
 0x65d   : > { %v3180_v22 = vmul.f32 %v9594_v13, %v10952_v49  ;;  %9595 = vrcp.f32 %v3149_v17 }
 0x65e   : > { %v4117_v41 = vpop.permute.xlu1 %4116 }
 0x65f   : > { %v3196_v18 = vpack.c.bf16 %v3180_v22, %v3180_v22 }
 0x660   : > { %v3969_v55 = vpop.permute.xlu0 %3968 }
 0x661   : > { %v3974_v20 = vsel %vm478_vm2, %v3969_v55, 0  ;;  %8996 = vmatmul.mubr.msk.bf16.vlgmr.msra.gmra.mxu0 %vm478_vm2, %v3196_v18 }
 0x662   : > { %v4219_v29 = vpop.permute.xlu1 %4218  ;;  %9006 = vmatpush3.bf16.xpose.msra.mxu0 %v3974_v20  ;;  %9007 = vmatprep.mubr.msk.bf16.mxu0 %vm9904_vm1, %v12601_v6 }
 0x663   : > { %9017 = vmatprep.subr.bf16.mxu0 %v12601_v6  ;;  %v4224_v21 = vsel %vm478_vm2, %v4219_v29, 0 }
 0x664   : > { %v3967_v25 = vpop.permute.xlu0 %3966 }
 0x666   : > { %v4217_v46 = vpop.permute.xlu1 %4216 }
 0x668   : > { %v4069_v8 = vpop.permute.xlu0 %4068 }
 0x669   : > { %v4074_v49 = vsel %vm478_vm2, %v4069_v8, 0  ;;  %9008 = vmatmul.mubr.msk.bf16.vlgmr.msra.gmra.mxu0 %vm478_vm2, %v3967_v25 }
 0x66a   : > { %v9596_v16 = vpop.eup %9595  ;;  %v4319_v50 = vpop.permute.xlu1 %4318  ;;  %9018 = vmatpush3.bf16.xpose.msra.mxu0 %v4074_v49  ;;  %9019 = vmatprep.mubr.msk.bf16.mxu0 %vm9904_vm1, %v12601_v6 }
 0x66b   : > { %v3181_v35 = vmul.f32 %v9596_v16, %v10956_v43  ;;  %9029 = vmatprep.subr.bf16.mxu0 %v12601_v6  ;;  %v4324_v24 = vsel %vm478_vm2, %v4319_v50, 0 }
 0x66c   : > { %v4067_v56 = vpop.permute.xlu0 %4066 }
 0x66d   : > { %v3197_v52 = vpack.c.bf16 %v3181_v35, %v3181_v35 }
 0x66e   : > { %v4317_v15 = vpop.permute.xlu1 %4316 }
 0x66f   : > { %9002 = vmatmul.mubr.msk.bf16.vlgmr.msra.gmra.mxu1 %vm478_vm2, %v3197_v52 }
 0x670   : > { %9012 = vmatpush3.bf16.xpose.msra.mxu1 %v4024_v0  ;;  %v4169_v23 = vpop.permute.xlu0 %4168  ;;  %9013 = vmatprep.mubr.msk.bf16.mxu1 %vm9904_vm1, %v12601_v6 }
 0x671   : > { %v4174_v27 = vsel %vm478_vm2, %v4169_v23, 0  ;;  %9020 = vmatmul.mubr.msk.bf16.vlgmr.msra.gmra.mxu0 %vm478_vm2, %v4067_v56  ;;  %9023 = vmatprep.subr.bf16.mxu1 %v12601_v6 }
 0x672   : > { %v4419_v43 = vpop.permute.xlu1 %4418  ;;  %9030 = vmatpush3.bf16.xpose.msra.mxu0 %v4174_v27  ;;  %9031 = vmatprep.mubr.msk.bf16.mxu0 %vm9904_vm1, %v12601_v6 }
 0x673   : > { %9041 = vmatprep.subr.bf16.mxu0 %v12601_v6  ;;  %v4424_v18 = vsel %vm478_vm2, %v4419_v43, 0 }
 0x674   : > { %v4167_v48 = vpop.permute.xlu0 %4166 }
 0x676   : > { %v4417_v28 = vpop.permute.xlu1 %4416 }
 0x677   : > { %9014 = vmatmul.mubr.msk.bf16.vlgmr.msra.gmra.mxu1 %vm478_vm2, %v4017_v42 }
 0x678   : > { %9024 = vmatpush3.bf16.xpose.msra.mxu1 %v4124_v62  ;;  %v4269_v30 = vpop.permute.xlu0 %4268  ;;  %9025 = vmatprep.mubr.msk.bf16.mxu1 %vm9904_vm1, %v12601_v6 }
 0x679   : > { %v4274_v54 = vsel %vm478_vm2, %v4269_v30, 0  ;;  %9032 = vmatmul.mubr.msk.bf16.vlgmr.msra.gmra.mxu0 %vm478_vm2, %v4167_v48  ;;  %9035 = vmatprep.subr.bf16.mxu1 %v12601_v6 }
 0x67a   : > { %v4519_v26 = vpop.permute.xlu1 %4518  ;;  %9042 = vmatpush3.bf16.xpose.msra.mxu0 %v4274_v54  ;;  %9043 = vmatprep.mubr.msk.bf16.mxu0 %vm9904_vm1, %v12601_v6 }
 0x67b   : > { %9053 = vmatprep.subr.bf16.mxu0 %v12601_v6 }
 0x67c   : > { %v4267_v36 = vpop.permute.xlu0 %4266 }
 0x67e   : > { %v4517_v32 = vpop.permute.xlu1 %4516 }
 0x67f   : > { %9026 = vmatmul.mubr.msk.bf16.vlgmr.msra.gmra.mxu1 %vm478_vm2, %v4117_v41 }
 0x680   : > { %9036 = vmatpush3.bf16.xpose.msra.mxu1 %v4224_v21  ;;  %v4369_v60 = vpop.permute.xlu0 %4368  ;;  %9037 = vmatprep.mubr.msk.bf16.mxu1 %vm9904_vm1, %v12601_v6 }
 0x681   : > { %v4374_v9 = vsel %vm478_vm2, %v4369_v60, 0  ;;  %9044 = vmatmul.mubr.msk.bf16.vlgmr.msra.gmra.mxu0 %vm478_vm2, %v4267_v36  ;;  %9047 = vmatprep.subr.bf16.mxu1 %v12601_v6 }
 0x682   : > { %9054 = vmatpush3.bf16.xpose.msra.mxu0 %v4374_v9  ;;  %9055 = vmatprep.mubr.msk.bf16.mxu0 %vm9904_vm1, %v12601_v6  ;;  %v4619_v42 = vpop.permute.xlu1 %4618 }
 0x683   : > { %9065 = vmatprep.subr.bf16.mxu0 %v12601_v6  ;;  %v4624_v35 = vsel %vm478_vm2, %v4619_v42, 0 }
 0x684   : > { %v4367_v58 = vpop.permute.xlu0 %4366 }
 0x686   : > { %v4617_v22 = vpop.permute.xlu1 %4616 }
 0x687   : > { %9038 = vmatmul.mubr.msk.bf16.vlgmr.msra.gmra.mxu1 %vm478_vm2, %v4217_v46  ;;  %v4524_v46 = vsel %vm478_vm2, %v4519_v26, 0 }
 0x688   : > { %9048 = vmatpush3.bf16.xpose.msra.mxu1 %v4324_v24  ;;  %v4469_v13 = vpop.permute.xlu0 %4468  ;;  %9049 = vmatprep.mubr.msk.bf16.mxu1 %vm9904_vm1, %v12601_v6 }
 0x689   : > { %v4474_v17 = vsel %vm478_vm2, %v4469_v13, 0  ;;  %9056 = vmatmul.mubr.msk.bf16.vlgmr.msra.gmra.mxu0 %vm478_vm2, %v4367_v58  ;;  %9059 = vmatprep.subr.bf16.mxu1 %v12601_v6 }
 0x68a   : > { %9066 = vmatpush3.bf16.xpose.msra.mxu0 %v4474_v17  ;;  %9067 = vmatprep.mubr.msk.bf16.mxu0 %vm9904_vm1, %v12601_v6  ;;  %v4719_v29 = vpop.permute.xlu1 %4718 }
 0x68b   : > { %9077 = vmatprep.subr.bf16.mxu0 %v12601_v6 }
 0x68c   : > { %v4467_v41 = vpop.permute.xlu0 %4466 }
 0x68e   : > { %v4717_v8 = vpop.permute.xlu1 %4716 }
 0x68f   : > { %9050 = vmatmul.mubr.msk.bf16.vlgmr.msra.gmra.mxu1 %vm478_vm2, %v4317_v15  ;;  %v4724_v15 = vsel %vm478_vm2, %v4719_v29, 0 }
 0x690   : > { %9060 = vmatpush3.bf16.xpose.msra.mxu1 %v4424_v18  ;;  %v4569_v55 = vpop.permute.xlu0 %4568  ;;  %9061 = vmatprep.mubr.msk.bf16.mxu1 %vm9904_vm1, %v12601_v6 }
 0x691   : > { %v4574_v20 = vsel %vm478_vm2, %v4569_v55, 0  ;;  %9068 = vmatmul.mubr.msk.bf16.vlgmr.msra.gmra.mxu0 %vm478_vm2, %v4467_v41  ;;  %9071 = vmatprep.subr.bf16.mxu1 %v12601_v6 }
 0x692   : > { %9078 = vmatpush3.bf16.xpose.msra.mxu0 %v4574_v20  ;;  %9079 = vmatprep.mubr.msk.bf16.mxu0 %vm9904_vm1, %v12601_v6  ;;  %v4959_v50 = vpop.permute.xlu1 %4958 }
 0x693   : > { %9089 = vmatprep.subr.bf16.mxu0 %v12601_v6  ;;  %v4964_v52 = vsel %vm1442_vm3, %v4959_v50, 0 }
 0x694   : > { %v4567_v25 = vpop.permute.xlu0 %4566 }
 0x697   : > { %9062 = vmatmul.mubr.msk.bf16.vlgmr.msra.gmra.mxu1 %vm478_vm2, %v4417_v28 }
 0x698   : > { %9072 = vmatpush3.bf16.xpose.msra.mxu1 %v4524_v46  ;;  %v4669_v49 = vpop.permute.xlu0 %4668  ;;  %9073 = vmatprep.mubr.msk.bf16.mxu1 %vm9904_vm1, %v12601_v6 }
 0x699   : > { %v4674_v16 = vsel %vm478_vm2, %v4669_v49, 0  ;;  %9080 = vmatmul.mubr.msk.bf16.vlgmr.msra.gmra.mxu0 %vm478_vm2, %v4567_v25  ;;  %9083 = vmatprep.subr.bf16.mxu1 %v12601_v6 }
 0x69a   : > { %9090 = vmatpush3.bf16.xpose.msra.mxu0 %v4674_v16  ;;  %9091 = vmatprep.mubr.msk.bf16.mxu0 %vm9904_vm1, %v12601_v6 }
 0x69b   : > { %9101 = vmatprep.subr.bf16.mxu0 %v12601_v6 }
 0x69c   : > { %v4667_v56 = vpop.permute.xlu0 %4666 }
 0x69f   : > { %9074 = vmatmul.mubr.msk.bf16.vlgmr.msra.gmra.mxu1 %vm478_vm2, %v4517_v32 }
 0x6a0   : > { %9084 = vmatpush3.bf16.xpose.msra.mxu1 %v4624_v35  ;;  %9085 = vmatprep.mubr.msk.bf16.mxu1 %vm9904_vm1, %v12601_v6  ;;  %v5007_v0 = vpop.permute.xlu0 %5006 }
 0x6a1   : > { %9092 = vmatmul.mubr.msk.bf16.vlgmr.msra.gmra.mxu0 %vm478_vm2, %v4667_v56  ;;  %9095 = vmatprep.subr.bf16.mxu1 %v12601_v6  ;;  %v5012_v23 = vsel %vm1442_vm3, %v5007_v0, 0 }
 0x6a2   : > { %9102 = vmatpush3.bf16.msra.mxu0 %v4964_v52  ;;  %9103 = vmatprep.mubr.msk.bf16.mxu0 %vm9904_vm1, %v12601_v6 }
 0x6a3   : > { %9113 = vmatprep.subr.bf16.mxu0 %v12601_v6 }
 0x6a7   : > { %9086 = vmatmul.mubr.msk.bf16.vlgmr.msra.gmra.mxu1 %vm478_vm2, %v4617_v22 }
 0x6a8   : > { %9096 = vmatpush3.bf16.xpose.msra.mxu1 %v4724_v15  ;;  %9097 = vmatprep.mubr.msk.bf16.mxu1 %vm9904_vm1, %v12601_v6 }
 0x6a9   : > { %9107 = vmatprep.subr.bf16.mxu1 %v12601_v6 }
 0x6af   : > { %9098 = vmatmul.mubr.msk.bf16.vlgmr.msra.gmra.mxu1 %vm478_vm2, %v4717_v8 }
 0x6b0   : > { %9108 = vmatpush3.bf16.msra.mxu1 %v5012_v23  ;;  %9109 = vmatprep.mubr.msk.bf16.mxu1 %vm9904_vm1, %v12601_v6 }
 0x6b1   : > { %9119 = vmatprep.subr.bf16.mxu1 %v12601_v6 }
 0x6bc   : > { %v11240_v27 = vpop.f32.mrf.mxu0 }
 0x6be   : > { %v8913_v43 = vpop.f32.mrf.mxu0 }
 0x6c0   : > { %v3243_v48 = vpop.f32.mrf.mxu0 }
 0x6c2   : > { %v8914_v28 = vpop.f32.mrf.mxu0 }
 0x6c4   : > { %v11242_v62 = vpop.f32.mrf.mxu0 }
 0x6c6   : > { %v8925_v30 = vpop.f32.mrf.mxu0 }
 0x6c8   : > { %v3339_v54 = vpop.f32.mrf.mxu0 }
 0x6ca   : > { %v11244_v26 = vpop.f32.mrf.mxu1  ;;  %v8926_v36 = vpop.f32.mrf.mxu0 }
 0x6cc   : > { %v8919_v21 = vpop.f32.mrf.mxu1 }
 0x6ce   : > { %v3291_v32 = vpop.f32.mrf.mxu1  ;;  %v11246_v60 = vpop.f32.mrf.mxu0 }
 0x6d0   : > { %v8920_v9 = vpop.f32.mrf.mxu1  ;;  %v8937_v58 = vpop.f32.mrf.mxu0 }
 0x6d2   : > { %v11248_v42 = vpop.f32.mrf.mxu1  ;;  %v3435_v24 = vpop.f32.mrf.mxu0 }
 0x6d4   : > { %v8931_v13 = vpop.f32.mrf.mxu1  ;;  %v8938_v17 = vpop.f32.mrf.mxu0 }
 0x6d6   : > { %v3387_v22 = vpop.f32.mrf.mxu1  ;;  %v11250_v41 = vpop.f32.mrf.mxu0 }
 0x6d7   : > { %12602 = vst [vmem:[#allocation27_spill] sm:$0xff] %v11250_v41 }
 0x6d8   : > { %v8932_v18 = vpop.f32.mrf.mxu1  ;;  %v8949_v55 = vpop.f32.mrf.mxu0 }
 0x6da   : > { %v11252_v20 = vpop.f32.mrf.mxu1  ;;  %v3531_v29 = vpop.f32.mrf.mxu0 }
 0x6dc   : > { %v8943_v25 = vpop.f32.mrf.mxu1  ;;  %v8950_v46 = vpop.f32.mrf.mxu0 }
 0x6de   : > { %v3483_v8 = vpop.f32.mrf.mxu1  ;;  %v11254_v49 = vpop.f32.mrf.mxu0 }
 0x6df   : > { %12603 = vst [vmem:[#allocation28_spill] sm:$0xff] %v11254_v49 }
 0x6e0   : > { %v8944_v16 = vpop.f32.mrf.mxu1  ;;  %v8961_v50 = vpop.f32.mrf.mxu0 }
 0x6e2   : > { %v11256_v35 = vpop.f32.mrf.mxu1  ;;  %v3627_v56 = vpop.f32.mrf.mxu0 }
 0x6e4   : > { %v8955_v52 = vpop.f32.mrf.mxu1  ;;  %v8962_v15 = vpop.f32.mrf.mxu0 }
 0x6e6   : > { %v3579_v0 = vpop.f32.mrf.mxu1  ;;  %v11258_v23 = vpop.f32.mrf.mxu0 }
 0x6e7   : > { %12604 = vst [vmem:[#allocation29_spill] sm:$0xff] %v11258_v23 }
 0x6e8   : > { %v8956_v43 = vpop.f32.mrf.mxu1  ;;  %v8973_v48 = vpop.f32.mrf.mxu0 }
 0x6ea   : > { %v11260_v28 = vpop.f32.mrf.mxu1  ;;  %v3723_v30 = vpop.f32.mrf.mxu0 }
 0x6ec   : > { %v8967_v54 = vpop.f32.mrf.mxu1  ;;  %v8974_v36 = vpop.f32.mrf.mxu0 }
 0x6ee   : > { %v3675_v21 = vpop.f32.mrf.mxu1  ;;  %v11262_v32 = vpop.f32.mrf.mxu0 }
 0x6ef   : > { %12605 = vst [vmem:[#allocation30_spill] sm:$0xff] %v11262_v32 }
 0x6f0   : > { %v8968_v9 = vpop.f32.mrf.mxu1  ;;  %v8985_v58 = vpop.f32.mrf.mxu0 }
 0x6f2   : > { %v11264_v24 = vpop.f32.mrf.mxu1  ;;  %v3819_v13 = vpop.f32.mrf.mxu0 }
 0x6f4   : > { %v8979_v17 = vpop.f32.mrf.mxu1  ;;  %v8986_v22 = vpop.f32.mrf.mxu0 }
 0x6f6   : > { %v3771_v18 = vpop.f32.mrf.mxu1 }
 0x6f8   : > { %v8980_v55 = vpop.f32.mrf.mxu1 }
 0x6fa   : > { %v11266_v29 = vpop.f32.mrf.mxu1 }
 0x6fc   : > { %v8991_v25 = vpop.f32.mrf.mxu1 }
 0x6fe   : > { %v3867_v46 = vpop.f32.mrf.mxu1 }
 0x700   : > { %v8992_v8 = vpop.f32.mrf.mxu1 }
 0x721   : > { %v11268_v16 = vpop.f32.mrf.mxu0 }
 0x722   : > { %12606 = vst [vmem:[#allocation31_spill] sm:$0xff] %v11268_v16 }
 0x723   : > { %v8997_v50 = vpop.f32.mrf.mxu0 }
 0x725   : > { %v3915_v56 = vpop.f32.mrf.mxu0 }
 0x727   : > { %v8998_v52 = vpop.f32.mrf.mxu0 }
 0x729   : > { %v11270_v15 = vpop.f32.mrf.mxu0 }
 0x72a   : > { %v4766_v0 = vsel %vm478_vm2, %v11270_v15, -inf }
 0x72b   : > { %4767 = vmax.xlane.f32.xlu0 %v4766_v0  ;;  %v9009_v43 = vpop.f32.mrf.mxu0 }
 0x72d   : > { %v4013_v48 = vpop.f32.mrf.mxu0 }
 0x72f   : > { %v11274_v30 = vpop.f32.mrf.mxu1  ;;  %v9010_v54 = vpop.f32.mrf.mxu0 }
 0x730   : > { %12607 = vst [vmem:[#allocation32_spill] sm:$0xff] %v11274_v30 }
 0x731   : > { %v9003_v36 = vpop.f32.mrf.mxu1  ;;  %v11276_v21 = vpop.f32.mrf.mxu0 }
 0x732   : > { %v4772_v9 = vsel %vm478_vm2, %v11276_v21, -inf }
 0x733   : > { %v3963_v58 = vpop.f32.mrf.mxu1  ;;  %4773 = vmax.xlane.f32.xlu0 %v4772_v9  ;;  %v9021_v13 = vpop.f32.mrf.mxu0 }
 0x735   : > { %v9004_v17 = vpop.f32.mrf.mxu1  ;;  %v4113_v22 = vpop.f32.mrf.mxu0 }
 0x737   : > { %v11280_v18 = vpop.f32.mrf.mxu1  ;;  %v9022_v55 = vpop.f32.mrf.mxu0 }
 0x738   : > { %v4769_v25 = vsel %vm478_vm2, %v11280_v18, -inf }
 0x739   : > { %4770 = vmax.xlane.f32.xlu1 %v4769_v25  ;;  %v9015_v46 = vpop.f32.mrf.mxu1  ;;  %v11284_v8 = vpop.f32.mrf.mxu0 }
 0x73a   : > { %v4778_v52 = vsel %vm478_vm2, %v11284_v8, -inf }
 0x73b   : > { %v4063_v50 = vpop.f32.mrf.mxu1  ;;  %v9033_v56 = vpop.f32.mrf.mxu0 }
 0x73d   : > { %v9016_v0 = vpop.f32.mrf.mxu1  ;;  %4779 = vmax.xlane.f32.xlu1 %v4778_v52  ;;  %v4213_v43 = vpop.f32.mrf.mxu0 }
 0x73f   : > { %v11288_v48 = vpop.f32.mrf.mxu1  ;;  %v9034_v54 = vpop.f32.mrf.mxu0 }
 0x740   : > { %v4775_v36 = vsel %vm478_vm2, %v11288_v48, -inf }
 0x741   : > { %v9027_v9 = vpop.f32.mrf.mxu1  ;;  %4776 = vmax.xlane.f32.xlu0 %v4775_v36  ;;  %v11292_v58 = vpop.f32.mrf.mxu0 }
 0x742   : > { %v4784_v13 = vsel %vm478_vm2, %v11292_v58, -inf }
 0x743   : > { %v4163_v17 = vpop.f32.mrf.mxu1  ;;  %4785 = vmax.xlane.f32.xlu1 %v4784_v13  ;;  %v9045_v22 = vpop.f32.mrf.mxu0 }
 0x745   : > { %v9028_v55 = vpop.f32.mrf.mxu1  ;;  %v4313_v25 = vpop.f32.mrf.mxu0 }
 0x747   : > { %v11296_v46 = vpop.f32.mrf.mxu1  ;;  %v9046_v50 = vpop.f32.mrf.mxu0 }
 0x748   : > { %v4781_v56 = vsel %vm478_vm2, %v11296_v46, -inf }
 0x749   : > { %v9039_v52 = vpop.f32.mrf.mxu1  ;;  %4782 = vmax.xlane.f32.xlu0 %v4781_v56  ;;  %v11300_v0 = vpop.f32.mrf.mxu0 }
 0x74a   : > { %v4790_v43 = vsel %vm478_vm2, %v11300_v0, -inf }
 0x74b   : > { %v4263_v54 = vpop.f32.mrf.mxu1  ;;  %4791 = vmax.xlane.f32.xlu1 %v4790_v43  ;;  %v9057_v36 = vpop.f32.mrf.mxu0 }
 0x74d   : > { %v9040_v9 = vpop.f32.mrf.mxu1  ;;  %v4413_v13 = vpop.f32.mrf.mxu0 }
 0x74f   : > { %v11304_v17 = vpop.f32.mrf.mxu1  ;;  %v9058_v22 = vpop.f32.mrf.mxu0 }
 0x750   : > { %v4787_v55 = vsel %vm478_vm2, %v11304_v17, -inf }
 0x751   : > { %v9051_v25 = vpop.f32.mrf.mxu1  ;;  %4788 = vmax.xlane.f32.xlu0 %v4787_v55  ;;  %v11308_v50 = vpop.f32.mrf.mxu0 }
 0x752   : > { %v4796_v56 = vsel %vm478_vm2, %v11308_v50, -inf }
 0x753   : > { %v4363_v52 = vpop.f32.mrf.mxu1  ;;  %4797 = vmax.xlane.f32.xlu1 %v4796_v56  ;;  %v9069_v54 = vpop.f32.mrf.mxu0 }
 0x755   : > { %v9052_v43 = vpop.f32.mrf.mxu1  ;;  %v4513_v36 = vpop.f32.mrf.mxu0 }
 0x757   : > { %v11312_v9 = vpop.f32.mrf.mxu1  ;;  %v9070_v13 = vpop.f32.mrf.mxu0 }
 0x758   : > { %v4793_v22 = vsel %vm478_vm2, %v11312_v9, -inf }
 0x759   : > { %v9063_v39 = vpop.f32.mrf.mxu1  ;;  %4794 = vmax.xlane.f32.xlu0 %v4793_v22  ;;  %v11316_v25 = vpop.f32.mrf.mxu0 }
 0x75a   : > { %v4802_v55 = vsel %vm478_vm2, %v11316_v25, -inf }
 0x75b   : > { %v4463_v2 = vpop.f32.mrf.mxu1  ;;  %4803 = vmax.xlane.f32.xlu1 %v4802_v55  ;;  %v9081_v52 = vpop.f32.mrf.mxu0 }
 0x75d   : > { %v9064_v56 = vpop.f32.mrf.mxu1  ;;  %v4613_v54 = vpop.f32.mrf.mxu0 }
 0x75f   : > { %v11320_v43 = vpop.f32.mrf.mxu1  ;;  %v9082_v36 = vpop.f32.mrf.mxu0 }
 0x760   : > { %v4799_v13 = vsel %vm478_vm2, %v11320_v43, -inf }
 0x761   : > { %v9075_v12 = vpop.f32.mrf.mxu1  ;;  %4800 = vmax.xlane.f32.xlu0 %v4799_v13  ;;  %v11324_v39 = vpop.f32.mrf.mxu0 }
 0x762   : > { %v4808_v22 = vsel %vm478_vm2, %v11324_v39, -inf }
 0x763   : > { %v4563_v19 = vpop.f32.mrf.mxu1  ;;  %4809 = vmax.xlane.f32.xlu1 %v4808_v22  ;;  %v9093_v2 = vpop.f32.mrf.mxu0 }
 0x765   : > { %v9076_v55 = vpop.f32.mrf.mxu1  ;;  %v4713_v52 = vpop.f32.mrf.mxu0 }
 0x766   : > { %v11340_v55 = vpop.permute.xlu0 %5102 }
 0x767   : > { %v11328_v56 = vpop.f32.mrf.mxu1  ;;  %v9094_v54 = vpop.f32.mrf.mxu0 }
 0x768   : > { %v4805_v36 = vsel %vm478_vm2, %v11328_v56, -inf }
 0x769   : > { %v9087_v14 = vpop.f32.mrf.mxu1  ;;  %4806 = vmax.xlane.f32.xlu0 %v4805_v36 }
 0x76a   : > { %v11342_v14 = vpop.permute.xlu1 %5054  ;;  %v11344_v52 = vpop.permute.xlu0 %5198 }
 0x76b   : > { %v4663_v12 = vpop.f32.mrf.mxu1 }
 0x76d   : > { %v9088_v13 = vpop.f32.mrf.mxu1 }
 0x76e   : > { %v11346_v54 = vpop.permute.xlu1 %5150  ;;  %v11348_v36 = vpop.permute.xlu0 %5294 }
 0x76f   : > { %v11332_v4 = vpop.f32.mrf.mxu1 }
 0x770   : > { %v4811_v44 = vsel %vm478_vm2, %v11332_v4, -inf }
 0x771   : > { %v9099_v19 = vpop.f32.mrf.mxu1  ;;  %4812 = vmax.xlane.f32.xlu0 %v4811_v44 }
 0x772   : > { %v11350_v12 = vpop.permute.xlu1 %5246  ;;  %v11352_v44 = vpop.permute.xlu0 %5390 }
 0x773   : > { %v4763_v22 = vpop.f32.mrf.mxu1 }
 0x774   : > { %5582 = vrot.lane.b32.xlu1 %v10170_v10, %s9912_s28 }
 0x775   : > { %v9100_v2 = vpop.f32.mrf.mxu1 }
 0x776   : > { %v11354_v13 = vpop.permute.xlu1 %5342 }
 0x77a   : > { %v11357_v3 = vpop.permute.xlu1 %5438 }
 0x77e   : > { %v11360_v33 = vpop.permute.xlu1 %5486 }
 0x787   : > { %5534 = vrot.lane.b32.xlu0 %v10162_v5, %s9912_s28 }
 0x7b4   : > { %v4768_v19 = vpop.xlane.xlu0 %4767 }
 0x7b5   : > { %v4814_v22 = vsub.f32 %v11270_v15, %v4768_v19 }
 0x7b7   : > { %v4830_v2 = vmul.f32 1.442695, %v4814_v22 }
 0x7b9   : > { %9597 = vpow2.f32 %v4830_v2 }
 0x7bc   : > { %v4774_v61 = vpop.xlane.xlu0 %4773 }
 0x7bd   : > { %v4816_v38 = vsub.f32 %v11276_v21, %v4774_v61 }
 0x7bf   : > { %v4834_v16 = vmul.f32 1.442695, %v4816_v38 }
 0x7c1   : > { %9599 = vpow2.f32 %v4834_v16 }
 0x7c2   : > { %v4771_v32 = vpop.xlane.xlu1 %4770 }
 0x7c3   : > { %v4815_v23 = vsub.f32 %v11280_v18, %v4771_v32 }
 0x7c5   : > { %v4832_v49 = vmul.f32 1.442695, %v4815_v23 }
 0x7c6   : > { %v11363_v41 = vpop.eup %9597  ;;  %v4780_v30 = vpop.xlane.xlu1 %4779 }
 0x7c7   : > { %9601 = vpow2.f32 %v4832_v49  ;;  %v4818_v15 = vsub.f32 %v11284_v8, %v4780_v30  ;;  %v4862_v19 = vsel %vm478_vm2, %v11363_v41, 0.0 }
 0x7c8   : > { %4863 = vadd.xlane.f32.xlu1 %v4862_v19 }
 0x7c9   : > { %v4838_v22 = vmul.f32 1.442695, %v4818_v15 }
 0x7ca   : > { %v4777_v61 = vpop.xlane.xlu0 %4776 }
 0x7cb   : > { %9603 = vpow2.f32 %v4838_v22  ;;  %v4817_v38 = vsub.f32 %v11288_v48, %v4777_v61 }
 0x7cc   : > { %v4786_v16 = vpop.xlane.xlu1 %4785 }
 0x7cd   : > { %v4836_v21 = vmul.f32 1.442695, %v4817_v38  ;;  %v4820_v32 = vsub.f32 %v11292_v58, %v4786_v16 }
 0x7ce   : > { %v11370_v23 = vpop.eup %9599 }
 0x7cf   : > { %9605 = vpow2.f32 %v4836_v21  ;;  %v4842_v18 = vmul.f32 1.442695, %v4820_v32  ;;  %v4868_v49 = vsel %vm478_vm2, %v11370_v23, 0.0 }
 0x7d0   : > { %4869 = vadd.xlane.f32.xlu1 %v4868_v49 }
 0x7d1   : > { %9607 = vpow2.f32 %v4842_v18 }
 0x7d2   : > { %v4783_v30 = vpop.xlane.xlu0 %4782 }
 0x7d3   : > { %v4819_v8 = vsub.f32 %v11296_v46, %v4783_v30 }
 0x7d4   : > { %v11375_v2 = vpop.eup %9601  ;;  %v4792_v15 = vpop.xlane.xlu1 %4791 }
 0x7d5   : > { %v4840_v48 = vmul.f32 1.442695, %v4819_v8  ;;  %v4822_v19 = vsub.f32 %v11300_v0, %v4792_v15  ;;  %v4865_v58 = vsel %vm478_vm2, %v11375_v2, 0.0 }
 0x7d6   : > { %4866 = vadd.xlane.f32.xlu0 %v4865_v58 }
 0x7d7   : > { %9609 = vpow2.f32 %v4840_v48  ;;  %v4846_v22 = vmul.f32 1.442695, %v4822_v19 }
 0x7d8   : > { %v11380_v61 = vpop.eup %9603 }
 0x7d9   : > { %9611 = vpow2.f32 %v4846_v22  ;;  %v4874_v38 = vsel %vm478_vm2, %v11380_v61, 0.0 }
 0x7da   : > { %4875 = vadd.xlane.f32.xlu1 %v4874_v38  ;;  %v4789_v46 = vpop.xlane.xlu0 %4788 }
 0x7db   : > { %v4821_v16 = vsub.f32 %v11304_v17, %v4789_v46 }
 0x7dc   : > { %v11385_v21 = vpop.eup %9605  ;;  %v4798_v32 = vpop.xlane.xlu1 %4797 }
 0x7dd   : > { %v4844_v0 = vmul.f32 1.442695, %v4821_v16  ;;  %v4824_v18 = vsub.f32 %v11308_v50, %v4798_v32  ;;  %v4871_v49 = vsel %vm478_vm2, %v11385_v21, 0.0 }
 0x7de   : > { %v11390_v30 = vpop.eup %9607  ;;  %4872 = vadd.xlane.f32.xlu0 %v4871_v49 }
 0x7df   : > { %9613 = vpow2.f32 %v4844_v0  ;;  %v4850_v8 = vmul.f32 1.442695, %v4824_v18  ;;  %v4880_v15 = vsel %vm478_vm2, %v11390_v30, 0.0 }
 0x7e0   : > { %4881 = vadd.xlane.f32.xlu1 %v4880_v15 }
 0x7e1   : > { %9615 = vpow2.f32 %v4850_v8 }
 0x7e2   : > { %v4795_v17 = vpop.xlane.xlu0 %4794 }
 0x7e3   : > { %v4823_v48 = vsub.f32 %v11312_v9, %v4795_v17 }
 0x7e4   : > { %v11395_v19 = vpop.eup %9609  ;;  %v4804_v58 = vpop.xlane.xlu1 %4803 }
 0x7e5   : > { %v4848_v50 = vmul.f32 1.442695, %v4823_v48  ;;  %v4826_v22 = vsub.f32 %v11316_v25, %v4804_v58  ;;  %v4877_v38 = vsel %vm478_vm2, %v11395_v19, 0.0 }
 0x7e6   : > { %v11400_v46 = vpop.eup %9611  ;;  %4878 = vadd.xlane.f32.xlu0 %v4877_v38 }
 0x7e7   : > { %9617 = vpow2.f32 %v4848_v50  ;;  %v4854_v16 = vmul.f32 1.442695, %v4826_v22  ;;  %v4886_v32 = vsel %vm478_vm2, %v11400_v46, 0.0 }
 0x7e8   : > { %4887 = vadd.xlane.f32.xlu1 %v4886_v32 }
 0x7e9   : > { %9619 = vpow2.f32 %v4854_v16 }
 0x7ea   : > { %v4801_v9 = vpop.xlane.xlu0 %4800 }
 0x7eb   : > { %v4825_v0 = vsub.f32 %v11320_v43, %v4801_v9 }
 0x7ec   : > { %v11405_v18 = vpop.eup %9613 }
 0x7ed   : > { %v4852_v49 = vmul.f32 1.442695, %v4825_v0  ;;  %v4883_v25 = vsel %vm478_vm2, %v11405_v18, 0.0  ;;  %v4810_v0 = vpop.xlane.xlu1 %4809 }
 0x7ee   : > { %v11409_v8 = vpop.eup %9615  ;;  %4884 = vadd.xlane.f32.xlu0 %v4883_v25 }
 0x7ef   : > { %9621 = vpow2.f32 %v4852_v49  ;;  %v4892_v15 = vsel %vm478_vm2, %v11409_v8, 0.0  ;;  %v4828_v49 = vsub.f32 %v11324_v39, %v4810_v0 }
 0x7f0   : > { %4893 = vadd.xlane.f32.xlu1 %v4892_v15 }
 0x7f1   : > { %v4858_v25 = vmul.f32 1.442695, %v4828_v49 }
 0x7f2   : > { %v4807_v17 = vpop.xlane.xlu0 %4806 }
 0x7f3   : > { %v4827_v48 = vsub.f32 %v11328_v56, %v4807_v17 }
 0x7f4   : > { %v11414_v58 = vpop.eup %9617 }
 0x7f5   : > { %v4856_v43 = vmul.f32 1.442695, %v4827_v48  ;;  %v4889_v50 = vsel %vm478_vm2, %v11414_v58, 0.0 }
 0x7f6   : > { %v11418_v22 = vpop.eup %9619  ;;  %4890 = vadd.xlane.f32.xlu0 %v4889_v50 }
 0x7f7   : > { %9623 = vpow2.f32 %v4856_v43  ;;  %v4898_v38 = vsel %vm478_vm2, %v11418_v22, 0.0 }
 0x7f8   : > { %4899 = vadd.xlane.f32.xlu1 %v4898_v38  ;;  %9625 = vpow2.f32 %v4858_v25 }
 0x7fa   : > { %v4813_v15 = vpop.xlane.xlu0 %4812 }
 0x7fb   : > { %v4829_v17 = vsub.f32 %v11332_v4, %v4813_v15  ;;  %v11452_v4 = vpop.permute.xlu1 %5582 }
 0x7fc   : > { %v11422_v16 = vpop.eup %9621 }
 0x7fd   : > { %v4895_v32 = vsel %vm478_vm2, %v11422_v16, 0.0  ;;  %v4860_v48 = vmul.f32 1.442695, %v4829_v17 }
 0x7fe   : > { %4896 = vadd.xlane.f32.xlu0 %v4895_v32  ;;  %v11468_v0 = vpop.permute.xlu0 %5534 }
 0x7ff   : > { %9627 = vpow2.f32 %v4860_v48 }
 0x804   : > { %v11426_v56 = vpop.eup %9623 }
 0x805   : > { %v4901_v9 = vsel %vm478_vm2, %v11426_v56, 0.0  ;;  %v11436_v43 = vpop.eup %9625 }
 0x806   : > { %4902 = vadd.xlane.f32.xlu0 %v4901_v9  ;;  %v4904_v50 = vsel %vm478_vm2, %v11436_v43, 0.0 }
 0x809   : > { %5678 = vrot.lane.b32.xlu1 %v10172_v11, %s9912_s28 }
 0x80c   : > { %v11440_v38 = vpop.eup %9627 }
 0x80d   : > { %v4907_v39 = vsel %vm478_vm2, %v11440_v38, 0.0 }
 0x81c   : > { %5630 = vrot.lane.b32.xlu0 %v10164_v7, %s9912_s28 }
 0x82d   : > { %4905 = vadd.xlane.f32.xlu1 %v4904_v50  ;;  %v5060_v50 = vsel %vm1442_vm3, %v11342_v14, 0 }
 0x83b   : > { %4908 = vadd.xlane.f32.xlu0 %v4907_v39 }
 0x83e   : > { %5778 = vrot.lane.b32.xlu1 %v10126_v40, %s9913_s9 }
 0x842   : > { %5776 = vrot.lane.b32.xlu1 %v10126_v40, %s9914_s10 }
 0x846   : > { %5878 = vrot.lane.b32.xlu1 %v10122_v37, %s9913_s9 }
 0x84a   : > { %5876 = vrot.lane.b32.xlu1 %v10122_v37, %s9914_s10 }
 0x84e   : > { %5978 = vrot.lane.b32.xlu1 %v10138_v51, %s9913_s9 }
 0x851   : > { %v4864_v32 = vpop.xlane.xlu1 %4863  ;;  %5728 = vrot.lane.b32.xlu0 %v10118_v34, %s9913_s9 }
 0x852   : > { %9629 = vrcp.f32 %v4864_v32  ;;  %5976 = vrot.lane.b32.xlu1 %v10138_v51, %s9914_s10 }
 0x855   : > { %5726 = vrot.lane.b32.xlu0 %v10118_v34, %s9914_s10 }
 0x856   : > { %6078 = vrot.lane.b32.xlu1 %v10140_v53, %s9913_s9 }
 0x859   : > { %v4870_v9 = vpop.xlane.xlu1 %4869  ;;  %5828 = vrot.lane.b32.xlu0 %v10116_v31, %s9913_s9 }
 0x85a   : > { %9631 = vrcp.f32 %v4870_v9  ;;  %6076 = vrot.lane.b32.xlu1 %v10140_v53, %s9914_s10 }
 0x85d   : > { %5826 = vrot.lane.b32.xlu0 %v10116_v31, %s9914_s10 }
 0x85e   : > { %6178 = vrot.lane.b32.xlu1 %v10154_v63, %s9913_s9 }
 0x85f   : > { %v9630_v49 = vpop.eup %9629  ;;  %v4867_v25 = vpop.xlane.xlu0 %4866 }
 0x860   : > { %v4926_v15 = vmul.f32 %v9630_v49, %v11363_v41  ;;  %9633 = vrcp.f32 %v4867_v25  ;;  %v5156_v49 = vsel %vm1442_vm3, %v11346_v54, 0 }
 0x861   : > { %5928 = vrot.lane.b32.xlu0 %v10132_v45, %s9913_s9 }
 0x862   : > { %v4942_v17 = vpack.c.bf16 %v4926_v15, %v4926_v15  ;;  %6176 = vrot.lane.b32.xlu1 %v10154_v63, %s9914_s10 }
 0x863   : > { %v4876_v48 = vpop.xlane.xlu1 %4875 }
 0x864   : > { %9635 = vrcp.f32 %v4876_v48  ;;  %9104 = vmatmul.mubr.msk.bf16.vlgmr.msra.gmra.mxu0 %vm478_vm2, %v4942_v17 }
 0x865   : > { %9114 = vmatpush3.bf16.msra.mxu0 %v5060_v50  ;;  %5926 = vrot.lane.b32.xlu0 %v10132_v45, %s9914_s10  ;;  %v5108_v50 = vsel %vm1442_vm3, %v11340_v55, 0  ;;  %v5252_v55 = vsel %vm1442_vm3, %v11350_v12, 0 }
 0x866   : > { %6278 = vrot.lane.b32.xlu1 %v10156_v1, %s9913_s9  ;;  %9115 = vmatprep.mubr.msk.bf16.mxu0 %vm9904_vm1, %v12601_v6 }
 0x867   : > { %v9632_v41 = vpop.eup %9631  ;;  %v4873_v39 = vpop.xlane.xlu0 %4872  ;;  %9125 = vmatprep.subr.bf16.mxu0 %v12601_v6 }
 0x868   : > { %v4928_v32 = vmul.f32 %v9632_v41, %v11370_v23  ;;  %9637 = vrcp.f32 %v4873_v39 }
 0x869   : > { %v4882_v14 = vpop.xlane.xlu1 %4881  ;;  %6028 = vrot.lane.b32.xlu0 %v10134_v47, %s9913_s9 }
 0x86a   : > { %v4944_v9 = vpack.c.bf16 %v4928_v32, %v4928_v32  ;;  %9639 = vrcp.f32 %v4882_v14  ;;  %6276 = vrot.lane.b32.xlu1 %v10156_v1, %s9914_s10 }
 0x86c   : > { %9116 = vmatmul.mubr.msk.bf16.vlgmr.msra.gmra.mxu0 %vm478_vm2, %v4944_v9 }
 0x86d   : > { %v9634_v25 = vpop.eup %9633  ;;  %9126 = vmatpush3.bf16.msra.mxu0 %v5156_v49  ;;  %6026 = vrot.lane.b32.xlu0 %v10134_v47, %s9914_s10 }
 0x86e   : > { %v4927_v23 = vmul.f32 %v9634_v25, %v11375_v2  ;;  %6378 = vrot.lane.b32.xlu1 %v10170_v10, %s9913_s9  ;;  %9127 = vmatprep.mubr.msk.bf16.mxu0 %vm9904_vm1, %v12601_v6 }
 0x86f   : > { %v4879_v15 = vpop.xlane.xlu0 %4878  ;;  %9137 = vmatprep.subr.bf16.mxu0 %v12601_v6 }
 0x870   : > { %v4943_v17 = vpack.c.bf16 %v4927_v23, %v4927_v23  ;;  %9641 = vrcp.f32 %v4879_v15 }
 0x871   : > { %v9636_v54 = vpop.eup %9635  ;;  %v4888_v48 = vpop.xlane.xlu1 %4887  ;;  %6128 = vrot.lane.b32.xlu0 %v10146_v57, %s9913_s9 }
 0x872   : > { %v4930_v2 = vmul.f32 %v9636_v54, %v11380_v61  ;;  %9643 = vrcp.f32 %v4888_v48  ;;  %6376 = vrot.lane.b32.xlu1 %v10170_v10, %s9914_s10  ;;  %9110 = vmatmul.mubr.msk.bf16.vlgmr.msra.gmra.mxu1 %vm478_vm2, %v4943_v17 }
 0x873   : > { %9120 = vmatpush3.bf16.msra.mxu1 %v5108_v50  ;;  %9121 = vmatprep.mubr.msk.bf16.mxu1 %vm9904_vm1, %v12601_v6 }
 0x874   : > { %v4946_v41 = vpack.c.bf16 %v4930_v2, %v4930_v2  ;;  %9131 = vmatprep.subr.bf16.mxu1 %v12601_v6 }
 0x875   : > { %v9638_v39 = vpop.eup %9637  ;;  %6126 = vrot.lane.b32.xlu0 %v10146_v57, %s9914_s10 }
 0x876   : > { %v4929_v61 = vmul.f32 %v9638_v39, %v11385_v21  ;;  %6478 = vrot.lane.b32.xlu1 %v10172_v11, %s9913_s9  ;;  %9128 = vmatmul.mubr.msk.bf16.vlgmr.msra.gmra.mxu0 %vm478_vm2, %v4946_v41  ;;  %v5204_v21 = vsel %vm1442_vm3, %v11344_v52, 0  ;;  %v5348_v52 = vsel %vm1442_vm3, %v11354_v13, 0 }
 0x877   : > { %v9640_v32 = vpop.eup %9639  ;;  %9138 = vmatpush3.bf16.msra.mxu0 %v5252_v55  ;;  %v4885_v14 = vpop.xlane.xlu0 %4884  ;;  %9139 = vmatprep.mubr.msk.bf16.mxu0 %vm9904_vm1, %v12601_v6 }
 0x878   : > { %v4945_v9 = vpack.c.bf16 %v4929_v61, %v4929_v61  ;;  %v4932_v49 = vmul.f32 %v9640_v32, %v11390_v30  ;;  %9645 = vrcp.f32 %v4885_v14  ;;  %9149 = vmatprep.subr.bf16.mxu0 %v12601_v6 }
 0x879   : > { %v4894_v12 = vpop.xlane.xlu1 %4893  ;;  %6228 = vrot.lane.b32.xlu0 %v10148_v59, %s9913_s9 }
 0x87a   : > { %9647 = vrcp.f32 %v4894_v12  ;;  %6476 = vrot.lane.b32.xlu1 %v10172_v11, %s9914_s10  ;;  %9122 = vmatmul.mubr.msk.bf16.vlgmr.msra.gmra.mxu1 %vm478_vm2, %v4945_v9  ;;  %v4948_v30 = vpack.c.bf16 %v4932_v49, %v4932_v49  ;;  %v5588_v9 = vsel %vm1442_vm3, %v11452_v4, 0 }
 0x87b   : > { %9132 = vmatpush3.bf16.msra.mxu1 %v5204_v21  ;;  %9133 = vmatprep.mubr.msk.bf16.mxu1 %vm9904_vm1, %v12601_v6 }
 0x87c   : > { %9143 = vmatprep.subr.bf16.mxu1 %v12601_v6 }
 0x87d   : > { %v9642_v25 = vpop.eup %9641  ;;  %6226 = vrot.lane.b32.xlu0 %v10148_v59, %s9914_s10 }
 0x87e   : > { %v4931_v23 = vmul.f32 %v9642_v25, %v11395_v19  ;;  %6718 = vrot.lane.b32.xlu1 %v10118_v34, %s9915_s16  ;;  %9140 = vmatmul.mubr.msk.bf16.vlgmr.msra.gmra.mxu0 %vm478_vm2, %v4948_v30  ;;  %v5300_v34 = vsel %vm1442_vm3, %v11348_v36, 0  ;;  %v5444_v36 = vsel %vm1442_vm3, %v11357_v3, 0 }
 0x87f   : > { %v9644_v15 = vpop.eup %9643  ;;  %9150 = vmatpush3.bf16.msra.mxu0 %v5348_v52  ;;  %v4891_v17 = vpop.xlane.xlu0 %4890  ;;  %9151 = vmatprep.mubr.msk.bf16.mxu0 %vm9904_vm1, %v12601_v6 }
 0x880   : > { %v4947_v54 = vpack.c.bf16 %v4931_v23, %v4931_v23  ;;  %v4934_v48 = vmul.f32 %v9644_v15, %v11400_v46  ;;  %9649 = vrcp.f32 %v4891_v17  ;;  %9161 = vmatprep.subr.bf16.mxu0 %v12601_v6 }
 0x881   : > { %v4900_v13 = vpop.xlane.xlu1 %4899  ;;  %6328 = vrot.lane.b32.xlu0 %v10162_v5, %s9913_s9 }
 0x882   : > { %9651 = vrcp.f32 %v4900_v13  ;;  %6814 = vrot.lane.b32.xlu1 %v10116_v31, %s9915_s16  ;;  %9134 = vmatmul.mubr.msk.bf16.vlgmr.msra.gmra.mxu1 %vm478_vm2, %v4947_v54  ;;  %v4950_v19 = vpack.c.bf16 %v4934_v48, %v4934_v48 }
 0x883   : > { %9144 = vmatpush3.bf16.msra.mxu1 %v5300_v34  ;;  %9145 = vmatprep.mubr.msk.bf16.mxu1 %vm9904_vm1, %v12601_v6 }
 0x884   : > { %9155 = vmatprep.subr.bf16.mxu1 %v12601_v6 }
 0x885   : > { %v9646_v46 = vpop.eup %9645  ;;  %6326 = vrot.lane.b32.xlu0 %v10162_v5, %s9914_s10  ;;  %v5679_v49 = vpop.permute.xlu1 %5678 }
 0x886   : > { %v4933_v50 = vmul.f32 %v9646_v46, %v11405_v18  ;;  %6910 = vrot.lane.b32.xlu1 %v10132_v45, %s9915_s16  ;;  %9152 = vmatmul.mubr.msk.bf16.vlgmr.msra.gmra.mxu0 %vm478_vm2, %v4950_v19  ;;  %v5396_v45 = vsel %vm1442_vm3, %v11352_v44, 0 }
 0x887   : > { %v9648_v31 = vpop.eup %9647  ;;  %9162 = vmatpush3.bf16.msra.mxu0 %v5444_v36  ;;  %v4897_v2 = vpop.xlane.xlu0 %4896  ;;  %9163 = vmatprep.mubr.msk.bf16.mxu0 %vm9904_vm1, %v12601_v6 }
 0x888   : > { %v4949_v41 = vpack.c.bf16 %v4933_v50, %v4933_v50  ;;  %v4936_v39 = vmul.f32 %v9648_v31, %v11409_v8  ;;  %9653 = vrcp.f32 %v4897_v2  ;;  %9173 = vmatprep.subr.bf16.mxu0 %v12601_v6  ;;  %v5540_v8 = vsel %vm1442_vm3, %v11468_v0, 0 }
 0x889   : > { %6428 = vrot.lane.b32.xlu0 %v10164_v7, %s9913_s9  ;;  %s12513_s9 = scalar_lea.hbm %s12567_s5, %s8334_s12 }
 0x88a   : > { %7006 = vrot.lane.b32.xlu1 %v10134_v47, %s9915_s16  ;;  %9146 = vmatmul.mubr.msk.bf16.vlgmr.msra.gmra.mxu1 %vm478_vm2, %v4949_v41  ;;  %v4952_v3 = vpack.c.bf16 %v4936_v39, %v4936_v39 }
 0x88b   : > { %9156 = vmatpush3.bf16.msra.mxu1 %v5396_v45  ;;  %9157 = vmatprep.mubr.msk.bf16.mxu1 %vm9904_vm1, %v12601_v6 }
 0x88c   : > { %9167 = vmatprep.subr.bf16.mxu1 %v12601_v6 }
 0x88d   : > { %v9650_v18 = vpop.eup %9649  ;;  %6426 = vrot.lane.b32.xlu0 %v10164_v7, %s9914_s10  ;;  %s8048_s10 = scalar_lea.sflag [#allocation4], %s10067_s11 }
 0x88e   : > { %v4935_v44 = vmul.f32 %v9650_v18, %v11414_v58  ;;  %7102 = vrot.lane.b32.xlu1 %v10146_v57, %s9915_s16  ;;  %9164 = vmatmul.mubr.msk.bf16.vlgmr.msra.gmra.mxu0 %vm478_vm2, %v4952_v3  ;;  %v5492_v57 = vsel %vm1442_vm3, %v11360_v33, 0 }
 0x88f   : > { %v9652_v47 = vpop.eup %9651  ;;  %9174 = vmatpush3.bf16.msra.mxu0 %v5540_v8  ;;  %v4903_v55 = vpop.xlane.xlu0 %4902  ;;  %9175 = vmatprep.mubr.msk.bf16.mxu0 %vm9904_vm1, %v12601_v6 }
 0x890   : > { %v4951_v61 = vpack.c.bf16 %v4935_v44, %v4935_v44  ;;  %v4938_v32 = vmul.f32 %v9652_v47, %v11418_v22  ;;  %9655 = vrcp.f32 %v4903_v55  ;;  %9185 = vmatprep.subr.bf16.mxu0 %v12601_v6 }
 0x891   : > { %6766 = vrot.lane.b32.xlu0 %v10126_v40, %s9915_s16 }
 0x892   : > { %9158 = vmatmul.mubr.msk.bf16.vlgmr.msra.gmra.mxu1 %vm478_vm2, %v4951_v61  ;;  %v4954_v0 = vpack.c.bf16 %v4938_v32, %v4938_v32 }
 0x893   : > { %9168 = vmatpush3.bf16.msra.mxu1 %v5492_v57  ;;  %v5631_v58 = vpop.permute.xlu0 %5630  ;;  %9169 = vmatprep.mubr.msk.bf16.mxu1 %vm9904_vm1, %v12601_v6 }
 0x894   : > { %v5636_v14 = vsel %vm1442_vm3, %v5631_v58, 0  ;;  %9179 = vmatprep.subr.bf16.mxu1 %v12601_v6 }
 0x895   : > { %v9654_v22 = vpop.eup %9653  ;;  %6862 = vrot.lane.b32.xlu0 %v10122_v37, %s9915_s16 }
 0x896   : > { %v4937_v40 = vmul.f32 %v9654_v22, %v11422_v16  ;;  %9176 = vmatmul.mubr.msk.bf16.vlgmr.msra.gmra.mxu0 %vm478_vm2, %v4954_v0 }
 0x897   : > { %9186 = vmatpush3.bf16.msra.mxu0 %v5636_v14  ;;  %9187 = vmatprep.mubr.msk.bf16.mxu0 %vm9904_vm1, %v12601_v6 }
 0x898   : > { %v4953_v33 = vpack.c.bf16 %v4937_v40, %v4937_v40  ;;  %9197 = vmatprep.subr.bf16.mxu0 %v12601_v6 }
 0x899   : > { %6958 = vrot.lane.b32.xlu0 %v10138_v51, %s9915_s16  ;;  %v5684_v51 = vsel %vm1442_vm3, %v5679_v49, 0 }
 0x89a   : > { %9170 = vmatmul.mubr.msk.bf16.vlgmr.msra.gmra.mxu1 %vm478_vm2, %v4953_v33 }
 0x89b   : > { %9180 = vmatpush3.bf16.msra.mxu1 %v5588_v9  ;;  %9181 = vmatprep.mubr.msk.bf16.mxu1 %vm9904_vm1, %v12601_v6 }
 0x89c   : > { %9191 = vmatprep.subr.bf16.mxu1 %v12601_v6 }
 0x89d   : > { %v9656_v37 = vpop.eup %9655  ;;  %7054 = vrot.lane.b32.xlu0 %v10140_v53, %s9915_s16 }
 0x89e   : > { %v4939_v16 = vmul.f32 %v9656_v37, %v11426_v56 }
 0x8a0   : > { %v4955_v12 = vpack.c.bf16 %v4939_v16, %v4939_v16 }
 0x8a2   : > { %9182 = vmatmul.mubr.msk.bf16.vlgmr.msra.gmra.mxu1 %vm478_vm2, %v4955_v12 }
 0x8a3   : > { %9192 = vmatpush3.bf16.msra.mxu1 %v5684_v51  ;;  %9193 = vmatprep.mubr.msk.bf16.mxu1 %vm9904_vm1, %v12601_v6 }
 0x8a4   : > { %9203 = vmatprep.subr.bf16.mxu1 %v12601_v6 }
 0x8b6   : > { %v4906_v4 = vpop.xlane.xlu1 %4905 }
 0x8b7   : > { %9657 = vrcp.f32 %v4906_v4 }
 0x8ba   : > { %v5779_v21 = vpop.permute.xlu1 %5778 }
 0x8bb   : > { %v5784_v39 = vsel %vm478_vm2, %v5779_v21, 0 }
 0x8be   : > { %v5777_v30 = vpop.permute.xlu1 %5776 }
 0x8c2   : > { %v5879_v25 = vpop.permute.xlu1 %5878 }
 0x8c3   : > { %v5884_v44 = vsel %vm478_vm2, %v5879_v25, 0 }
 0x8c4   : > { %v9658_v53 = vpop.eup %9657  ;;  %v4909_v52 = vpop.xlane.xlu0 %4908 }
 0x8c5   : > { %v4940_v56 = vmul.f32 %v9658_v53, %v11436_v43  ;;  %9659 = vrcp.f32 %v4909_v52 }
 0x8c6   : > { %v5877_v23 = vpop.permute.xlu1 %5876 }
 0x8c7   : > { %v4956_v15 = vpack.c.bf16 %v4940_v56, %v4940_v56 }
 0x8c8   : > { %v5729_v17 = vpop.permute.xlu0 %5728 }
 0x8c9   : > { %v5734_v54 = vsel %vm478_vm2, %v5729_v17, 0  ;;  %9188 = vmatmul.mubr.msk.bf16.vlgmr.msra.gmra.mxu0 %vm478_vm2, %v4956_v15 }
 0x8ca   : > { %v5979_v48 = vpop.permute.xlu1 %5978  ;;  %9198 = vmatpush3.bf16.xpose.msra.mxu0 %v5734_v54  ;;  %9199 = vmatprep.mubr.msk.bf16.mxu0 %vm9904_vm1, %v12601_v6 }
 0x8cb   : > { %9209 = vmatprep.subr.bf16.mxu0 %v12601_v6  ;;  %v5984_v57 = vsel %vm478_vm2, %v5979_v48, 0 }
 0x8cc   : > { %v5727_v13 = vpop.permute.xlu0 %5726 }
 0x8ce   : > { %v5977_v34 = vpop.permute.xlu1 %5976 }
 0x8d0   : > { %v5829_v19 = vpop.permute.xlu0 %5828 }
 0x8d1   : > { %v5834_v43 = vsel %vm478_vm2, %v5829_v19, 0  ;;  %9200 = vmatmul.mubr.msk.bf16.vlgmr.msra.gmra.mxu0 %vm478_vm2, %v5727_v13 }
 0x8d2   : > { %v9660_v46 = vpop.eup %9659  ;;  %v6079_v36 = vpop.permute.xlu1 %6078  ;;  %9210 = vmatpush3.bf16.xpose.msra.mxu0 %v5834_v43  ;;  %9211 = vmatprep.mubr.msk.bf16.mxu0 %vm9904_vm1, %v12601_v6 }
 0x8d3   : > { %v4941_v50 = vmul.f32 %v9660_v46, %v11440_v38  ;;  %9221 = vmatprep.subr.bf16.mxu0 %v12601_v6  ;;  %v6084_v33 = vsel %vm478_vm2, %v6079_v36, 0 }
 0x8d4   : > { %v5827_v31 = vpop.permute.xlu0 %5826 }
 0x8d5   : > { %v4957_v2 = vpack.c.bf16 %v4941_v50, %v4941_v50 }
 0x8d6   : > { %v6077_v41 = vpop.permute.xlu1 %6076 }
 0x8d7   : > { %9194 = vmatmul.mubr.msk.bf16.vlgmr.msra.gmra.mxu1 %vm478_vm2, %v4957_v2 }
 0x8d8   : > { %9204 = vmatpush3.bf16.xpose.msra.mxu1 %v5784_v39  ;;  %v5929_v45 = vpop.permute.xlu0 %5928  ;;  %9205 = vmatprep.mubr.msk.bf16.mxu1 %vm9904_vm1, %v12601_v6 }
 0x8d9   : > { %v5934_v3 = vsel %vm478_vm2, %v5929_v45, 0  ;;  %9212 = vmatmul.mubr.msk.bf16.vlgmr.msra.gmra.mxu0 %vm478_vm2, %v5827_v31  ;;  %9215 = vmatprep.subr.bf16.mxu1 %v12601_v6 }
 0x8da   : > { %v6179_v38 = vpop.permute.xlu1 %6178  ;;  %9222 = vmatpush3.bf16.xpose.msra.mxu0 %v5934_v3  ;;  %9223 = vmatprep.mubr.msk.bf16.mxu0 %vm9904_vm1, %v12601_v6 }
 0x8db   : > { %9233 = vmatprep.subr.bf16.mxu0 %v12601_v6  ;;  %v6184_v12 = vsel %vm478_vm2, %v6179_v38, 0 }
 0x8dc   : > { %v5927_v18 = vpop.permute.xlu0 %5926 }
 0x8de   : > { %v6177_v8 = vpop.permute.xlu1 %6176 }
 0x8df   : > { %9206 = vmatmul.mubr.msk.bf16.vlgmr.msra.gmra.mxu1 %vm478_vm2, %v5777_v30 }
 0x8e0   : > { %9216 = vmatpush3.bf16.xpose.msra.mxu1 %v5884_v44  ;;  %v6029_v47 = vpop.permute.xlu0 %6028  ;;  %9217 = vmatprep.mubr.msk.bf16.mxu1 %vm9904_vm1, %v12601_v6 }
 0x8e1   : > { %v6034_v55 = vsel %vm478_vm2, %v6029_v47, 0  ;;  %9224 = vmatmul.mubr.msk.bf16.vlgmr.msra.gmra.mxu0 %vm478_vm2, %v5927_v18  ;;  %9227 = vmatprep.subr.bf16.mxu1 %v12601_v6 }
 0x8e2   : > { %v6279_v61 = vpop.permute.xlu1 %6278  ;;  %9234 = vmatpush3.bf16.xpose.msra.mxu0 %v6034_v55  ;;  %9235 = vmatprep.mubr.msk.bf16.mxu0 %vm9904_vm1, %v12601_v6 }
 0x8e3   : > { %9245 = vmatprep.subr.bf16.mxu0 %v12601_v6  ;;  %v6284_v25 = vsel %vm478_vm2, %v6279_v61, 0 }
 0x8e4   : > { %v6027_v32 = vpop.permute.xlu0 %6026 }
 0x8e6   : > { %v6277_v58 = vpop.permute.xlu1 %6276 }
 0x8e7   : > { %9218 = vmatmul.mubr.msk.bf16.vlgmr.msra.gmra.mxu1 %vm478_vm2, %v5877_v23 }
 0x8e8   : > { %9228 = vmatpush3.bf16.xpose.msra.mxu1 %v5984_v57  ;;  %v6129_v0 = vpop.permute.xlu0 %6128  ;;  %9229 = vmatprep.mubr.msk.bf16.mxu1 %vm9904_vm1, %v12601_v6 }
 0x8e9   : > { %v6134_v14 = vsel %vm478_vm2, %v6129_v0, 0  ;;  %9236 = vmatmul.mubr.msk.bf16.vlgmr.msra.gmra.mxu0 %vm478_vm2, %v6027_v32  ;;  %9239 = vmatprep.subr.bf16.mxu1 %v12601_v6 }
 0x8ea   : > { %9246 = vmatpush3.bf16.xpose.msra.mxu0 %v6134_v14  ;;  %9247 = vmatprep.mubr.msk.bf16.mxu0 %vm9904_vm1, %v12601_v6  ;;  %v6379_v40 = vpop.permute.xlu1 %6378 }
 0x8eb   : > { %9257 = vmatprep.subr.bf16.mxu0 %v12601_v6  ;;  %v6384_v15 = vsel %vm478_vm2, %v6379_v40, 0 }
 0x8ec   : > { %v6127_v22 = vpop.permute.xlu0 %6126 }
 0x8ee   : > { %v6377_v16 = vpop.permute.xlu1 %6376 }
 0x8ef   : > { %9230 = vmatmul.mubr.msk.bf16.vlgmr.msra.gmra.mxu1 %vm478_vm2, %v5977_v34 }
 0x8f0   : > { %9240 = vmatpush3.bf16.xpose.msra.mxu1 %v6084_v33  ;;  %v6229_v9 = vpop.permute.xlu0 %6228  ;;  %9241 = vmatprep.mubr.msk.bf16.mxu1 %vm9904_vm1, %v12601_v6 }
 0x8f1   : > { %v6234_v37 = vsel %vm478_vm2, %v6229_v9, 0  ;;  %9248 = vmatmul.mubr.msk.bf16.vlgmr.msra.gmra.mxu0 %vm478_vm2, %v6127_v22  ;;  %9251 = vmatprep.subr.bf16.mxu1 %v12601_v6 }
 0x8f2   : > { %9258 = vmatpush3.bf16.xpose.msra.mxu0 %v6234_v37  ;;  %9259 = vmatprep.mubr.msk.bf16.mxu0 %vm9904_vm1, %v12601_v6  ;;  %v6479_v21 = vpop.permute.xlu1 %6478 }
 0x8f3   : > { %9269 = vmatprep.subr.bf16.mxu0 %v12601_v6  ;;  %v6484_v48 = vsel %vm478_vm2, %v6479_v21, 0 }
 0x8f4   : > { %v6227_v49 = vpop.permute.xlu0 %6226 }
 0x8f6   : > { %v6477_v53 = vpop.permute.xlu1 %6476 }
 0x8f7   : > { %9242 = vmatmul.mubr.msk.bf16.vlgmr.msra.gmra.mxu1 %vm478_vm2, %v6077_v41 }
 0x8f8   : > { %9252 = vmatpush3.bf16.xpose.msra.mxu1 %v6184_v12  ;;  %v6329_v51 = vpop.permute.xlu0 %6328  ;;  %9253 = vmatprep.mubr.msk.bf16.mxu1 %vm9904_vm1, %v12601_v6 }
 0x8f9   : > { %v6334_v4 = vsel %vm478_vm2, %v6329_v51, 0  ;;  %9260 = vmatmul.mubr.msk.bf16.vlgmr.msra.gmra.mxu0 %vm478_vm2, %v6227_v49  ;;  %9263 = vmatprep.subr.bf16.mxu1 %v12601_v6 }
 0x8fa   : > { %9270 = vmatpush3.bf16.xpose.msra.mxu0 %v6334_v4  ;;  %9271 = vmatprep.mubr.msk.bf16.mxu0 %vm9904_vm1, %v12601_v6  ;;  %v6719_v23 = vpop.permute.xlu1 %6718 }
 0x8fb   : > { %9281 = vmatprep.subr.bf16.mxu0 %v12601_v6  ;;  %v6724_v54 = vsel %vm1442_vm3, %v6719_v23, 0 }
 0x8fc   : > { %v6327_v30 = vpop.permute.xlu0 %6326 }
 0x8ff   : > { %9254 = vmatmul.mubr.msk.bf16.vlgmr.msra.gmra.mxu1 %vm478_vm2, %v6177_v8 }
 0x900   : > { %9264 = vmatpush3.bf16.xpose.msra.mxu1 %v6284_v25  ;;  %v6429_v52 = vpop.permute.xlu0 %6428  ;;  %9265 = vmatprep.mubr.msk.bf16.mxu1 %vm9904_vm1, %v12601_v6 }
 0x901   : > { %v6434_v56 = vsel %vm478_vm2, %v6429_v52, 0  ;;  %9272 = vmatmul.mubr.msk.bf16.vlgmr.msra.gmra.mxu0 %vm478_vm2, %v6327_v30  ;;  %9275 = vmatprep.subr.bf16.mxu1 %v12601_v6 }
 0x902   : > { %9282 = vmatpush3.bf16.xpose.msra.mxu0 %v6434_v56  ;;  %9283 = vmatprep.mubr.msk.bf16.mxu0 %vm9904_vm1, %v12601_v6 }
 0x903   : > { %9293 = vmatprep.subr.bf16.mxu0 %v12601_v6 }
 0x904   : > { %v6427_v17 = vpop.permute.xlu0 %6426 }
 0x907   : > { %9266 = vmatmul.mubr.msk.bf16.vlgmr.msra.gmra.mxu1 %vm478_vm2, %v6277_v58 }
 0x908   : > { %9276 = vmatpush3.bf16.xpose.msra.mxu1 %v6384_v15  ;;  %9277 = vmatprep.mubr.msk.bf16.mxu1 %vm9904_vm1, %v12601_v6  ;;  %v6767_v13 = vpop.permute.xlu0 %6766 }
 0x909   : > { %9284 = vmatmul.mubr.msk.bf16.vlgmr.msra.gmra.mxu0 %vm478_vm2, %v6427_v17  ;;  %9287 = vmatprep.subr.bf16.mxu1 %v12601_v6  ;;  %v6772_v34 = vsel %vm1442_vm3, %v6767_v13, 0 }
 0x90a   : > { %9294 = vmatpush3.bf16.msra.mxu0 %v6724_v54  ;;  %9295 = vmatprep.mubr.msk.bf16.mxu0 %vm9904_vm1, %v12601_v6 }
 0x90b   : > { %9305 = vmatprep.subr.bf16.mxu0 %v12601_v6 }
 0x90f   : > { %9278 = vmatmul.mubr.msk.bf16.vlgmr.msra.gmra.mxu1 %vm478_vm2, %v6377_v16 }
 0x910   : > { %9288 = vmatpush3.bf16.xpose.msra.mxu1 %v6484_v48  ;;  %9289 = vmatprep.mubr.msk.bf16.mxu1 %vm9904_vm1, %v12601_v6 }
 0x911   : > { %9299 = vmatprep.subr.bf16.mxu1 %v12601_v6 }
 0x917   : > { %9290 = vmatmul.mubr.msk.bf16.vlgmr.msra.gmra.mxu1 %vm478_vm2, %v6477_v53 }
 0x918   : > { %9300 = vmatpush3.bf16.msra.mxu1 %v6772_v34  ;;  %9301 = vmatprep.mubr.msk.bf16.mxu1 %vm9904_vm1, %v12601_v6 }
 0x919   : > { %9311 = vmatprep.subr.bf16.mxu1 %v12601_v6 }
 0x924   : > { %v11718_v19 = vpop.f32.mrf.mxu0 }
 0x926   : > { %v9105_v43 = vpop.f32.mrf.mxu0 }
 0x928   : > { %v5003_v46 = vpop.f32.mrf.mxu0 }
 0x92a   : > { %v9106_v36 = vpop.f32.mrf.mxu0 }
 0x92c   : > { %v11720_v50 = vpop.f32.mrf.mxu0 }
 0x92e   : > { %v9117_v31 = vpop.f32.mrf.mxu0 }
 0x930   : > { %v5099_v2 = vpop.f32.mrf.mxu0 }
 0x932   : > { %v11722_v41 = vpop.f32.mrf.mxu1  ;;  %v9118_v39 = vpop.f32.mrf.mxu0 }
 0x934   : > { %v9111_v45 = vpop.f32.mrf.mxu1 }
 0x936   : > { %v5051_v3 = vpop.f32.mrf.mxu1  ;;  %v11724_v38 = vpop.f32.mrf.mxu0 }
 0x938   : > { %v9112_v18 = vpop.f32.mrf.mxu1  ;;  %v9129_v8 = vpop.f32.mrf.mxu0 }
 0x93a   : > { %v11726_v44 = vpop.f32.mrf.mxu1  ;;  %v5195_v47 = vpop.f32.mrf.mxu0 }
 0x93c   : > { %v9123_v55 = vpop.f32.mrf.mxu1  ;;  %v9130_v61 = vpop.f32.mrf.mxu0 }
 0x93e   : > { %v5147_v32 = vpop.f32.mrf.mxu1  ;;  %v11728_v57 = vpop.f32.mrf.mxu0 }
 0x940   : > { %v9124_v58 = vpop.f32.mrf.mxu1  ;;  %v9141_v0 = vpop.f32.mrf.mxu0 }
 0x942   : > { %v11730_v14 = vpop.f32.mrf.mxu1  ;;  %v5291_v22 = vpop.f32.mrf.mxu0 }
 0x944   : > { %v9135_v40 = vpop.f32.mrf.mxu1  ;;  %v9142_v33 = vpop.f32.mrf.mxu0 }
 0x946   : > { %v5243_v9 = vpop.f32.mrf.mxu1  ;;  %v11732_v37 = vpop.f32.mrf.mxu0 }
 0x948   : > { %v9136_v16 = vpop.f32.mrf.mxu1  ;;  %v9153_v49 = vpop.f32.mrf.mxu0 }
 0x94a   : > { %v11734_v12 = vpop.f32.mrf.mxu1  ;;  %v5387_v51 = vpop.f32.mrf.mxu0 }
 0x94c   : > { %v9147_v4 = vpop.f32.mrf.mxu1  ;;  %v9154_v21 = vpop.f32.mrf.mxu0 }
 0x94e   : > { %v5339_v30 = vpop.f32.mrf.mxu1  ;;  %v11736_v25 = vpop.f32.mrf.mxu0 }
 0x950   : > { %v9148_v53 = vpop.f32.mrf.mxu1  ;;  %v9165_v52 = vpop.f32.mrf.mxu0 }
 0x952   : > { %v11738_v56 = vpop.f32.mrf.mxu1  ;;  %v5483_v23 = vpop.f32.mrf.mxu0 }
 0x954   : > { %v9159_v15 = vpop.f32.mrf.mxu1  ;;  %v9166_v17 = vpop.f32.mrf.mxu0 }
 0x956   : > { %v5435_v54 = vpop.f32.mrf.mxu1  ;;  %v11740_v48 = vpop.f32.mrf.mxu0 }
 0x958   : > { %v9160_v13 = vpop.f32.mrf.mxu1  ;;  %v9177_v34 = vpop.f32.mrf.mxu0 }
 0x95a   : > { %v11742_v43 = vpop.f32.mrf.mxu1  ;;  %v5579_v46 = vpop.f32.mrf.mxu0 }
 0x95c   : > { %v9171_v36 = vpop.f32.mrf.mxu1  ;;  %v9178_v31 = vpop.f32.mrf.mxu0 }
 0x95e   : > { %v5531_v2 = vpop.f32.mrf.mxu1 }
 0x960   : > { %v9172_v39 = vpop.f32.mrf.mxu1 }
 0x962   : > { %v11744_v45 = vpop.f32.mrf.mxu1 }
 0x964   : > { %v9183_v3 = vpop.f32.mrf.mxu1 }
 0x966   : > { %v5627_v18 = vpop.f32.mrf.mxu1 }
 0x968   : > { %v9184_v8 = vpop.f32.mrf.mxu1 }
 0x989   : > { %v11746_v47 = vpop.f32.mrf.mxu0 }
 0x98a   : > { %12608 = vst [vmem:[#allocation33_spill] sm:$0xff] %v11746_v47 }
 0x98b   : > { %v9189_v55 = vpop.f32.mrf.mxu0 }
 0x98d   : > { %v5675_v61 = vpop.f32.mrf.mxu0 }
 0x98f   : > { %v9190_v32 = vpop.f32.mrf.mxu0 }
 0x991   : > { %v11748_v58 = vpop.f32.mrf.mxu0 }
 0x992   : > { %v6526_v0 = vsel %vm478_vm2, %v11748_v58, -inf }
 0x993   : > { %6527 = vmax.xlane.f32.xlu0 %v6526_v0  ;;  %v9201_v22 = vpop.f32.mrf.mxu0 }
 0x995   : > { %v5773_v40 = vpop.f32.mrf.mxu0 }
 0x997   : > { %v11752_v33 = vpop.f32.mrf.mxu1  ;;  %v9202_v9 = vpop.f32.mrf.mxu0 }
 0x999   : > { %v9195_v16 = vpop.f32.mrf.mxu1  ;;  %v11754_v49 = vpop.f32.mrf.mxu0 }
 0x99a   : > { %v6532_v51 = vsel %vm478_vm2, %v11754_v49, -inf }
 0x99b   : > { %v5723_v4 = vpop.f32.mrf.mxu1  ;;  %6533 = vmax.xlane.f32.xlu0 %v6532_v51  ;;  %v9213_v21 = vpop.f32.mrf.mxu0 }
 0x99d   : > { %v9196_v30 = vpop.f32.mrf.mxu1  ;;  %v5873_v53 = vpop.f32.mrf.mxu0 }
 0x99f   : > { %v11758_v52 = vpop.f32.mrf.mxu1  ;;  %v9214_v23 = vpop.f32.mrf.mxu0 }
 0x9a0   : > { %v6529_v15 = vsel %vm478_vm2, %v11758_v52, -inf }
 0x9a1   : > { %6530 = vmax.xlane.f32.xlu1 %v6529_v15  ;;  %v9207_v17 = vpop.f32.mrf.mxu1  ;;  %v11762_v54 = vpop.f32.mrf.mxu0 }
 0x9a2   : > { %v6538_v46 = vsel %vm478_vm2, %v11762_v54, -inf }
 0x9a3   : > { %v5823_v13 = vpop.f32.mrf.mxu1  ;;  %v9225_v34 = vpop.f32.mrf.mxu0 }
 0x9a5   : > { %v9208_v36 = vpop.f32.mrf.mxu1  ;;  %6539 = vmax.xlane.f32.xlu1 %v6538_v46  ;;  %v5973_v31 = vpop.f32.mrf.mxu0 }
 0x9a7   : > { %v11766_v2 = vpop.f32.mrf.mxu1  ;;  %v9226_v39 = vpop.f32.mrf.mxu0 }
 0x9a8   : > { %v6535_v3 = vsel %vm478_vm2, %v11766_v2, -inf }
 0x9a9   : > { %v9219_v18 = vpop.f32.mrf.mxu1  ;;  %6536 = vmax.xlane.f32.xlu0 %v6535_v3  ;;  %v11770_v8 = vpop.f32.mrf.mxu0 }
 0x9aa   : > { %v6544_v55 = vsel %vm478_vm2, %v11770_v8, -inf }
 0x9ab   : > { %v5923_v61 = vpop.f32.mrf.mxu1  ;;  %6545 = vmax.xlane.f32.xlu1 %v6544_v55  ;;  %v9237_v32 = vpop.f32.mrf.mxu0 }
 0x9ad   : > { %v9220_v0 = vpop.f32.mrf.mxu1  ;;  %v6073_v22 = vpop.f32.mrf.mxu0 }
 0x9af   : > { %v11774_v40 = vpop.f32.mrf.mxu1  ;;  %v9238_v9 = vpop.f32.mrf.mxu0 }
 0x9b0   : > { %v6541_v16 = vsel %vm478_vm2, %v11774_v40, -inf }
 0x9b1   : > { %v9231_v51 = vpop.f32.mrf.mxu1  ;;  %6542 = vmax.xlane.f32.xlu0 %v6541_v16  ;;  %v11778_v4 = vpop.f32.mrf.mxu0 }
 0x9b2   : > { %v6550_v21 = vsel %vm478_vm2, %v11778_v4, -inf }
 0x9b3   : > { %v6023_v30 = vpop.f32.mrf.mxu1  ;;  %6551 = vmax.xlane.f32.xlu1 %v6550_v21  ;;  %v9249_v53 = vpop.f32.mrf.mxu0 }
 0x9b5   : > { %v9232_v23 = vpop.f32.mrf.mxu1  ;;  %v6173_v15 = vpop.f32.mrf.mxu0 }
 0x9b7   : > { %v11782_v17 = vpop.f32.mrf.mxu1  ;;  %v9250_v13 = vpop.f32.mrf.mxu0 }
 0x9b8   : > { %v6547_v34 = vsel %vm478_vm2, %v11782_v17, -inf }
 0x9b9   : > { %v9243_v46 = vpop.f32.mrf.mxu1  ;;  %6548 = vmax.xlane.f32.xlu0 %v6547_v34  ;;  %v11786_v36 = vpop.f32.mrf.mxu0 }
 0x9ba   : > { %v6556_v31 = vsel %vm478_vm2, %v11786_v36, -inf }
 0x9bb   : > { %v6123_v39 = vpop.f32.mrf.mxu1  ;;  %6557 = vmax.xlane.f32.xlu1 %v6556_v31  ;;  %v9261_v3 = vpop.f32.mrf.mxu0 }
 0x9bd   : > { %v9244_v18 = vpop.f32.mrf.mxu1  ;;  %v6273_v55 = vpop.f32.mrf.mxu0 }
 0x9bf   : > { %v11790_v61 = vpop.f32.mrf.mxu1  ;;  %v9262_v32 = vpop.f32.mrf.mxu0 }
 0x9c0   : > { %v6553_v0 = vsel %vm478_vm2, %v11790_v61, -inf }
 0x9c1   : > { %v9255_v22 = vpop.f32.mrf.mxu1  ;;  %6554 = vmax.xlane.f32.xlu0 %v6553_v0  ;;  %v11794_v9 = vpop.f32.mrf.mxu0 }
 0x9c2   : > { %v6562_v16 = vsel %vm478_vm2, %v11794_v9, -inf }
 0x9c3   : > { %v6223_v51 = vpop.f32.mrf.mxu1  ;;  %6563 = vmax.xlane.f32.xlu1 %v6562_v16  ;;  %v9273_v21 = vpop.f32.mrf.mxu0 }
 0x9c5   : > { %v9256_v30 = vpop.f32.mrf.mxu1  ;;  %v6373_v53 = vpop.f32.mrf.mxu0 }
 0x9c7   : > { %v11798_v23 = vpop.f32.mrf.mxu1  ;;  %v9274_v15 = vpop.f32.mrf.mxu0 }
 0x9c8   : > { %v6559_v13 = vsel %vm478_vm2, %v11798_v23, -inf }
 0x9c9   : > { %v9267_v34 = vpop.f32.mrf.mxu1  ;;  %6560 = vmax.xlane.f32.xlu0 %v6559_v13  ;;  %v11802_v46 = vpop.f32.mrf.mxu0 }
 0x9ca   : > { %v6568_v31 = vsel %vm478_vm2, %v11802_v46, -inf }
 0x9cb   : > { %v6323_v39 = vpop.f32.mrf.mxu1  ;;  %6569 = vmax.xlane.f32.xlu1 %v6568_v31  ;;  %v9285_v3 = vpop.f32.mrf.mxu0 }
 0x9cc   : > { %v11820_v31 = vpop.permute.xlu0 %6862  ;;  %v11824_v3 = vpop.permute.xlu1 %6814 }
 0x9cd   : > { %v9268_v18 = vpop.f32.mrf.mxu1  ;;  %v6473_v55 = vpop.f32.mrf.mxu0 }
 0x9cf   : > { %v11806_v32 = vpop.f32.mrf.mxu1  ;;  %v9286_v0 = vpop.f32.mrf.mxu0 }
 0x9d0   : > { %v6565_v22 = vsel %vm478_vm2, %v11806_v32, -inf  ;;  %v11822_v39 = vpop.permute.xlu0 %6958  ;;  %v11828_v55 = vpop.permute.xlu1 %6910 }
 0x9d1   : > { %v9279_v16 = vpop.f32.mrf.mxu1  ;;  %6566 = vmax.xlane.f32.xlu0 %v6565_v22 }
 0x9d3   : > { %v6423_v51 = vpop.f32.mrf.mxu1 }
 0x9d4   : > { %v11826_v18 = vpop.permute.xlu0 %7054  ;;  %v11831_v16 = vpop.permute.xlu1 %7006 }
 0x9d5   : > { %v9280_v21 = vpop.f32.mrf.mxu1 }
 0x9d7   : > { %v11810_v30 = vpop.f32.mrf.mxu1 }
 0x9d8   : > { %v6571_v53 = vsel %vm478_vm2, %v11810_v30, -inf  ;;  %v11834_v51 = vpop.permute.xlu1 %7102 }
 0x9d9   : > { %v9291_v15 = vpop.f32.mrf.mxu1  ;;  %6572 = vmax.xlane.f32.xlu0 %v6571_v53 }
 0x9db   : > { %v6523_v13 = vpop.f32.mrf.mxu1 }
 0x9dc   : > { %7198 = vrot.lane.b32.xlu1 %v10148_v59, %s9915_s16 }
 0x9dd   : > { %v9292_v34 = vpop.f32.mrf.mxu1 }
 0x9e0   : > { %7246 = vrot.lane.b32.xlu1 %v10156_v1, %s9915_s16 }
 0x9ef   : > { %7150 = vrot.lane.b32.xlu0 %v10154_v63, %s9915_s16 }
 0xa1c   : > { %v6528_v0 = vpop.xlane.xlu0 %6527 }
 0xa1d   : > { %v6574_v59 = vsub.f32 %v11748_v58, %v6528_v0 }
 0xa1f   : > { %v6590_v22 = vmul.f32 1.442695, %v6574_v59 }
 0xa21   : > { %9661 = vpow2.f32 %v6590_v22 }
 0xa24   : > { %v6534_v1 = vpop.xlane.xlu0 %6533 }
 0xa25   : > { %v6576_v63 = vsub.f32 %v11754_v49, %v6534_v1 }
 0xa27   : > { %v6594_v21 = vmul.f32 1.442695, %v6576_v63 }
 0xa29   : > { %9663 = vpow2.f32 %v6594_v21 }
 0xa2a   : > { %v6531_v53 = vpop.xlane.xlu1 %6530 }
 0xa2b   : > { %v6575_v15 = vsub.f32 %v11758_v52, %v6531_v53 }
 0xa2d   : > { %v6592_v13 = vmul.f32 1.442695, %v6575_v15 }
 0xa2e   : > { %v11837_v34 = vpop.eup %9661  ;;  %v6540_v47 = vpop.xlane.xlu1 %6539 }
 0xa2f   : > { %9665 = vpow2.f32 %v6592_v13  ;;  %v6578_v58 = vsub.f32 %v11762_v54, %v6540_v47  ;;  %v6622_v0 = vsel %vm478_vm2, %v11837_v34, 0.0 }
 0xa30   : > { %6623 = vadd.xlane.f32.xlu1 %v6622_v0 }
 0xa31   : > { %v6598_v59 = vmul.f32 1.442695, %v6578_v58 }
 0xa32   : > { %v6537_v49 = vpop.xlane.xlu0 %6536 }
 0xa33   : > { %9667 = vpow2.f32 %v6598_v59  ;;  %v6577_v22 = vsub.f32 %v11766_v2, %v6537_v49 }
 0xa34   : > { %v6546_v1 = vpop.xlane.xlu1 %6545 }
 0xa35   : > { %v6596_v63 = vmul.f32 1.442695, %v6577_v22  ;;  %v6580_v52 = vsub.f32 %v11770_v8, %v6546_v1 }
 0xa36   : > { %v11844_v21 = vpop.eup %9663 }
 0xa37   : > { %9669 = vpow2.f32 %v6596_v63  ;;  %v6602_v53 = vmul.f32 1.442695, %v6580_v52  ;;  %v6628_v47 = vsel %vm478_vm2, %v11844_v21, 0.0 }
 0xa38   : > { %6629 = vadd.xlane.f32.xlu1 %v6628_v47 }
 0xa39   : > { %9671 = vpow2.f32 %v6602_v53 }
 0xa3a   : > { %v6543_v54 = vpop.xlane.xlu0 %6542 }
 0xa3b   : > { %v6579_v15 = vsub.f32 %v11774_v40, %v6543_v54 }
 0xa3c   : > { %v11849_v13 = vpop.eup %9665  ;;  %v6552_v58 = vpop.xlane.xlu1 %6551 }
 0xa3d   : > { %v6600_v2 = vmul.f32 1.442695, %v6579_v15  ;;  %v6582_v0 = vsub.f32 %v11778_v4, %v6552_v58  ;;  %v6625_v8 = vsel %vm478_vm2, %v11849_v13, 0.0 }
 0xa3e   : > { %6626 = vadd.xlane.f32.xlu0 %v6625_v8 }
 0xa3f   : > { %9673 = vpow2.f32 %v6600_v2  ;;  %v6606_v59 = vmul.f32 1.442695, %v6582_v0 }
 0xa40   : > { %v11854_v49 = vpop.eup %9667 }
 0xa41   : > { %9675 = vpow2.f32 %v6606_v59  ;;  %v6634_v22 = vsel %vm478_vm2, %v11854_v49, 0.0 }
 0xa42   : > { %6635 = vadd.xlane.f32.xlu1 %v6634_v22  ;;  %v6549_v40 = vpop.xlane.xlu0 %6548 }
 0xa43   : > { %v6581_v1 = vsub.f32 %v11782_v17, %v6549_v40 }
 0xa44   : > { %v11859_v63 = vpop.eup %9669  ;;  %v6558_v52 = vpop.xlane.xlu1 %6557 }
 0xa45   : > { %v6604_v4 = vmul.f32 1.442695, %v6581_v1  ;;  %v6584_v53 = vsub.f32 %v11786_v36, %v6558_v52  ;;  %v6631_v47 = vsel %vm478_vm2, %v11859_v63, 0.0 }
 0xa46   : > { %v11864_v54 = vpop.eup %9671  ;;  %6632 = vadd.xlane.f32.xlu0 %v6631_v47 }
 0xa47   : > { %9677 = vpow2.f32 %v6604_v4  ;;  %v6610_v15 = vmul.f32 1.442695, %v6584_v53  ;;  %v6640_v58 = vsel %vm478_vm2, %v11864_v54, 0.0 }
 0xa48   : > { %6641 = vadd.xlane.f32.xlu1 %v6640_v58 }
 0xa49   : > { %9679 = vpow2.f32 %v6610_v15 }
 0xa4a   : > { %v6555_v17 = vpop.xlane.xlu0 %6554 }
 0xa4b   : > { %v6583_v2 = vsub.f32 %v11790_v61, %v6555_v17 }
 0xa4c   : > { %v11869_v0 = vpop.eup %9673 }
 0xa4d   : > { %v6608_v8 = vmul.f32 1.442695, %v6583_v2  ;;  %v6637_v36 = vsel %vm478_vm2, %v11869_v0, 0.0  ;;  %v6564_v2 = vpop.xlane.xlu1 %6563 }
 0xa4e   : > { %v11873_v59 = vpop.eup %9675  ;;  %6638 = vadd.xlane.f32.xlu0 %v6637_v36 }
 0xa4f   : > { %9681 = vpow2.f32 %v6608_v8  ;;  %v6646_v22 = vsel %vm478_vm2, %v11873_v59, 0.0  ;;  %v6586_v8 = vsub.f32 %v11794_v9, %v6564_v2 }
 0xa50   : > { %6647 = vadd.xlane.f32.xlu1 %v6646_v22 }
 0xa51   : > { %v6614_v22 = vmul.f32 1.442695, %v6586_v8 }
 0xa52   : > { %v6561_v40 = vpop.xlane.xlu0 %6560 }
 0xa53   : > { %v6585_v1 = vsub.f32 %v11798_v23, %v6561_v40 }
 0xa54   : > { %v11878_v52 = vpop.eup %9677  ;;  %v6570_v36 = vpop.xlane.xlu1 %6569 }
 0xa55   : > { %v6612_v61 = vmul.f32 1.442695, %v6585_v1  ;;  %v6643_v4 = vsel %vm478_vm2, %v11878_v52, 0.0  ;;  %v6588_v40 = vsub.f32 %v11802_v46, %v6570_v36 }
 0xa56   : > { %v11882_v53 = vpop.eup %9679  ;;  %6644 = vadd.xlane.f32.xlu0 %v6643_v4 }
 0xa57   : > { %9683 = vpow2.f32 %v6612_v61  ;;  %v6652_v47 = vsel %vm478_vm2, %v11882_v53, 0.0  ;;  %v6618_v1 = vmul.f32 1.442695, %v6588_v40 }
 0xa58   : > { %6653 = vadd.xlane.f32.xlu1 %v6652_v47  ;;  %9685 = vpow2.f32 %v6614_v22  ;;  %v11926_v22 = vpop.permute.xlu1 %7198 }
 0xa59   : > { %9687 = vpow2.f32 %v6618_v1 }
 0xa5a   : > { %v6567_v61 = vpop.xlane.xlu0 %6566 }
 0xa5b   : > { %v6587_v4 = vsub.f32 %v11806_v32, %v6567_v61  ;;  %v12613_v61 = vld [vmem:[#allocation30_spill] sm:$0xff] }
 0xa5c   : > { %v11886_v15 = vpop.eup %9681  ;;  %v11930_v40 = vpop.permute.xlu1 %7246 }
 0xa5d   : > { %v6649_v58 = vsel %vm478_vm2, %v11886_v15, 0.0 }
 0xa5e   : > { %6650 = vadd.xlane.f32.xlu0 %v6649_v58  ;;  %v6616_v58 = vmul.f32 1.442695, %v6587_v4 }
 0xa60   : > { %9689 = vpow2.f32 %v6616_v58  ;;  %v12614_v58 = vld [vmem:[#allocation31_spill] sm:$0xff] }
 0xa62   : > { %v6573_v47 = vpop.xlane.xlu0 %6572 }
 0xa64   : > { %v11890_v23 = vpop.eup %9683 }
 0xa65   : > { %v6655_v17 = vsel %vm478_vm2, %v11890_v23, 0.0 }
 0xa66   : > { %6656 = vadd.xlane.f32.xlu0 %v6655_v17  ;;  %v11902_v17 = vpop.eup %9685 }
 0xa67   : > { %v6658_v46 = vsel %vm478_vm2, %v11902_v17, 0.0  ;;  %v11906_v2 = vpop.eup %9687 }
 0xa69   : > { %7342 = vrot.lane.b32.xlu1 %v10170_v10, %s9915_s16  ;;  %v6589_v10 = vsub.f32 %v11810_v30, %v6573_v47 }
 0xa6b   : > { %v6620_v9 = vmul.f32 1.442695, %v6589_v10 }
 0xa6d   : > { %9691 = vpow2.f32 %v6620_v9  ;;  %v11910_v32 = vpop.eup %9689 }
 0xa6e   : > { %v6661_v30 = vsel %vm478_vm2, %v11910_v32, 0.0 }
 0xa7a   : > { %v11914_v8 = vpop.eup %9691 }
 0xa7b   : > { %v6667_v36 = vsel %vm478_vm2, %v11914_v8, 0.0 }
 0xa7c   : > { %7294 = vrot.lane.b32.xlu0 %v10162_v5, %s9915_s16  ;;  %v6664_v5 = vsel %vm478_vm2, %v11906_v2, 0.0 }
 0xa8d   : > { %6659 = vadd.xlane.f32.xlu1 %v6658_v46  ;;  %v6868_v46 = vsel %vm1442_vm3, %v11820_v31, 0 }
 0xa91   : > { %6665 = vadd.xlane.f32.xlu1 %v6664_v5 }
 0xa9b   : > { %6662 = vadd.xlane.f32.xlu0 %v6661_v30 }
 0xa9f   : > { %6668 = vadd.xlane.f32.xlu0 %v6667_v36 }
 0xaa2   : > { %7438 = vrot.lane.b32.xlu1 %v10172_v11, %s9915_s16 }
 0xaa6   : > { %7504 = vrot.lane.b32.xlu1 %v11244_v26, %s9916_s24 }
 0xaaa   : > { %7508 = vrot.lane.b32.xlu1 %v11248_v42, %s9916_s24  ;;  %v11948_v42 = vpop.permute.xlu0 %7150 }
 0xaae   : > { %7512 = vrot.lane.b32.xlu1 %v11252_v20, %s9916_s24 }
 0xab2   : > { %7516 = vrot.lane.b32.xlu1 %v11256_v35, %s9916_s24 }
 0xab5   : > { %7390 = vrot.lane.b32.xlu0 %v10164_v7, %s9915_s16  ;;  %v12609_v7 = vld [vmem:[#allocation32_spill] sm:$0xff]  ;;  %s9827_s16 = scalar_lea.vmem %s12516_s23, 2048 }
 0xab6   : > { %7520 = vrot.lane.b32.xlu1 %v11260_v28, %s9916_s24  ;;  %p9828_p3 = scmp.ne.s32.totalorder %s12516_s23, %s9827_s16 }
 0xab8   : > { %p9829_p7 = pnand %p9828_p3, %p12632_p11 }
 0xab9   : > { %v6624_v11 = vpop.xlane.xlu1 %6623  ;;  %7502 = vrot.lane.b32.xlu0 %v11240_v27, %s9916_s24  ;;  %v12610_v27 = vld [vmem:[#allocation27_spill] sm:$0xff] }
 0xaba   : > { %9693 = vrcp.f32 %v6624_v11  ;;  %7524 = vrot.lane.b32.xlu1 %v11264_v24, %s9916_s24  ;;  %p9830_p12 = pneg %p9829_p7 }
 0xabd   : > { %7506 = vrot.lane.b32.xlu0 %v11242_v62, %s9916_s24 }
 0xabe   : > { %7528 = vrot.lane.b32.xlu1 %v11266_v29, %s9916_s24  ;;  %v6820_v29 = vsel %vm1442_vm3, %v11824_v3, 0 }
 0xac1   : > { %v6630_v26 = vpop.xlane.xlu1 %6629  ;;  %7510 = vrot.lane.b32.xlu0 %v11246_v60, %s9916_s24  ;;  %v12611_v60 = vld [vmem:[#allocation28_spill] sm:$0xff] }
 0xac2   : > { %9695 = vrcp.f32 %v6630_v26  ;;  %7532 = vrot.lane.b32.xlu1 %v12609_v7, %s9916_s24 }
 0xac5   : > { %7514 = vrot.lane.b32.xlu0 %v12610_v27, %s9916_s24 }
 0xac6   : > { %7568 = vrot.lane.b32.xlu1 %v11722_v41, %s9917_s26  ;;  %v12612_v41 = vld [vmem:[#allocation29_spill] sm:$0xff] }
 0xac7   : > { %v9694_v62 = vpop.eup %9693  ;;  %v6627_v20 = vpop.xlane.xlu0 %6626 }
 0xac8   : > { %v6686_v35 = vmul.f32 %v9694_v62, %v11837_v34  ;;  %9697 = vrcp.f32 %v6627_v20 }
 0xac9   : > { %7518 = vrot.lane.b32.xlu0 %v12611_v60, %s9916_s24  ;;  %v7252_v60 = vsel %vm1442_vm3, %v11930_v40, 0 }
 0xaca   : > { %v6702_v28 = vpack.c.bf16 %v6686_v35, %v6686_v35  ;;  %7572 = vrot.lane.b32.xlu1 %v11726_v44, %s9917_s26  ;;  %v12615_v35 = vld [vmem:[#allocation33_spill] sm:$0xff] }
 0xacb   : > { %v6636_v24 = vpop.xlane.xlu1 %6635 }
 0xacc   : > { %9699 = vrcp.f32 %v6636_v24  ;;  %9296 = vmatmul.mubr.msk.bf16.vlgmr.msra.gmra.mxu0 %vm478_vm2, %v6702_v28 }
 0xacd   : > { %9306 = vmatpush3.bf16.msra.mxu0 %v6820_v29  ;;  %7522 = vrot.lane.b32.xlu0 %v12612_v41, %s9916_s24 }
 0xace   : > { %7576 = vrot.lane.b32.xlu1 %v11730_v14, %s9917_s26  ;;  %9307 = vmatprep.mubr.msk.bf16.mxu0 %vm9904_vm1, %v12601_v6  ;;  %v6916_v14 = vsel %vm1442_vm3, %v11828_v55, 0 }
 0xacf   : > { %v9696_v34 = vpop.eup %9695  ;;  %v6633_v1 = vpop.xlane.xlu0 %6632  ;;  %9317 = vmatprep.subr.bf16.mxu0 %v12601_v6 }
 0xad0   : > { %v6688_v44 = vmul.f32 %v9696_v34, %v11844_v21  ;;  %9701 = vrcp.f32 %v6633_v1 }
 0xad1   : > { %v6642_v3 = vpop.xlane.xlu1 %6641  ;;  %7526 = vrot.lane.b32.xlu0 %v12613_v61, %s9916_s24 }
 0xad2   : > { %v6704_v4 = vpack.c.bf16 %v6688_v44, %v6688_v44  ;;  %9703 = vrcp.f32 %v6642_v3  ;;  %7580 = vrot.lane.b32.xlu1 %v11734_v12, %s9917_s26 }
 0xad4   : > { %9308 = vmatmul.mubr.msk.bf16.vlgmr.msra.gmra.mxu0 %vm478_vm2, %v6704_v4 }
 0xad5   : > { %v9698_v47 = vpop.eup %9697  ;;  %9318 = vmatpush3.bf16.msra.mxu0 %v6916_v14  ;;  %7530 = vrot.lane.b32.xlu0 %v12614_v58, %s9916_s24 }
 0xad6   : > { %v6687_v21 = vmul.f32 %v9698_v47, %v11849_v13  ;;  %7584 = vrot.lane.b32.xlu1 %v11738_v56, %s9917_s26  ;;  %9319 = vmatprep.mubr.msk.bf16.mxu0 %vm9904_vm1, %v12601_v6 }
 0xad7   : > { %v6639_v10 = vpop.xlane.xlu0 %6638  ;;  %9329 = vmatprep.subr.bf16.mxu0 %v12601_v6 }
 0xad8   : > { %v6703_v12 = vpack.c.bf16 %v6687_v21, %v6687_v21  ;;  %9705 = vrcp.f32 %v6639_v10 }
 0xad9   : > { %v9700_v55 = vpop.eup %9699  ;;  %v6648_v9 = vpop.xlane.xlu1 %6647  ;;  %7566 = vrot.lane.b32.xlu0 %v11718_v19, %s9917_s26  ;;  %v7012_v19 = vsel %vm1442_vm3, %v11831_v16, 0 }
 0xada   : > { %v6690_v13 = vmul.f32 %v9700_v55, %v11854_v49  ;;  %9707 = vrcp.f32 %v6648_v9  ;;  %7588 = vrot.lane.b32.xlu1 %v11742_v43, %s9917_s26  ;;  %9302 = vmatmul.mubr.msk.bf16.vlgmr.msra.gmra.mxu1 %vm478_vm2, %v6703_v12 }
 0xadb   : > { %9312 = vmatpush3.bf16.msra.mxu1 %v6868_v46  ;;  %9313 = vmatprep.mubr.msk.bf16.mxu1 %vm9904_vm1, %v12601_v6 }
 0xadc   : > { %v6706_v56 = vpack.c.bf16 %v6690_v13, %v6690_v13  ;;  %9323 = vmatprep.subr.bf16.mxu1 %v12601_v6 }
 0xadd   : > { %v9702_v5 = vpop.eup %9701  ;;  %7570 = vrot.lane.b32.xlu0 %v11720_v50, %s9917_s26 }
 0xade   : > { %v6689_v31 = vmul.f32 %v9702_v5, %v11859_v63  ;;  %7592 = vrot.lane.b32.xlu1 %v11744_v45, %s9917_s26  ;;  %9320 = vmatmul.mubr.msk.bf16.vlgmr.msra.gmra.mxu0 %vm478_vm2, %v6706_v56  ;;  %v6964_v45 = vsel %vm1442_vm3, %v11822_v39, 0 }
 0xadf   : > { %v9704_v43 = vpop.eup %9703  ;;  %9330 = vmatpush3.bf16.msra.mxu0 %v7012_v19  ;;  %v6645_v49 = vpop.xlane.xlu0 %6644  ;;  %9331 = vmatprep.mubr.msk.bf16.mxu0 %vm9904_vm1, %v12601_v6 }
 0xae0   : > { %v6705_v30 = vpack.c.bf16 %v6689_v31, %v6689_v31  ;;  %v6692_v36 = vmul.f32 %v9704_v43, %v11864_v54  ;;  %9709 = vrcp.f32 %v6645_v49  ;;  %9341 = vmatprep.subr.bf16.mxu0 %v12601_v6 }
 0xae1   : > { %v6654_v50 = vpop.xlane.xlu1 %6653  ;;  %7574 = vrot.lane.b32.xlu0 %v11724_v38, %s9917_s26  ;;  %v7108_v38 = vsel %vm1442_vm3, %v11834_v51, 0 }
 0xae2   : > { %9711 = vrcp.f32 %v6654_v50  ;;  %7596 = vrot.lane.b32.xlu1 %v11752_v33, %s9917_s26  ;;  %9314 = vmatmul.mubr.msk.bf16.vlgmr.msra.gmra.mxu1 %vm478_vm2, %v6705_v30  ;;  %v6708_v16 = vpack.c.bf16 %v6692_v36, %v6692_v36 }
 0xae3   : > { %9324 = vmatpush3.bf16.msra.mxu1 %v6964_v45  ;;  %9325 = vmatprep.mubr.msk.bf16.mxu1 %vm9904_vm1, %v12601_v6 }
 0xae4   : > { %9335 = vmatprep.subr.bf16.mxu1 %v12601_v6 }
 0xae5   : > { %v9706_v63 = vpop.eup %9705  ;;  %7578 = vrot.lane.b32.xlu0 %v11728_v57, %s9917_s26  ;;  %v7060_v57 = vsel %vm1442_vm3, %v11826_v18, 0  ;;  %v7343_v24 = vpop.permute.xlu1 %7342 }
 0xae6   : > { %v6691_v39 = vmul.f32 %v9706_v63, %v11869_v0  ;;  %9332 = vmatmul.mubr.msk.bf16.vlgmr.msra.gmra.mxu0 %vm478_vm2, %v6708_v16  ;;  %v7348_v41 = vsel %vm1442_vm3, %v7343_v24, 0 }
 0xae7   : > { %v9708_v33 = vpop.eup %9707  ;;  %9342 = vmatpush3.bf16.msra.mxu0 %v7108_v38  ;;  %v6651_v54 = vpop.xlane.xlu0 %6650  ;;  %9343 = vmatprep.mubr.msk.bf16.mxu0 %vm9904_vm1, %v12601_v6 }
 0xae8   : > { %v6707_v11 = vpack.c.bf16 %v6691_v39, %v6691_v39  ;;  %v6694_v26 = vmul.f32 %v9708_v33, %v11873_v59  ;;  %9713 = vrcp.f32 %v6651_v54  ;;  %9353 = vmatprep.subr.bf16.mxu0 %v12601_v6  ;;  %v7204_v59 = vsel %vm1442_vm3, %v11926_v22, 0 }
 0xae9   : > { %7582 = vrot.lane.b32.xlu0 %v11732_v37, %s9917_s26 }
 0xaea   : > { %9326 = vmatmul.mubr.msk.bf16.vlgmr.msra.gmra.mxu1 %vm478_vm2, %v6707_v11  ;;  %v6710_v51 = vpack.c.bf16 %v6694_v26, %v6694_v26 }
 0xaeb   : > { %9336 = vmatpush3.bf16.msra.mxu1 %v7060_v57  ;;  %9337 = vmatprep.mubr.msk.bf16.mxu1 %vm9904_vm1, %v12601_v6 }
 0xaec   : > { %9347 = vmatprep.subr.bf16.mxu1 %v12601_v6 }
 0xaed   : > { %v9710_v0 = vpop.eup %9709  ;;  %7586 = vrot.lane.b32.xlu0 %v11736_v25, %s9917_s26  ;;  %v7156_v25 = vsel %vm1442_vm3, %v11948_v42, 0 }
 0xaee   : > { %v6693_v37 = vmul.f32 %v9710_v0, %v11878_v52  ;;  %9344 = vmatmul.mubr.msk.bf16.vlgmr.msra.gmra.mxu0 %vm478_vm2, %v6710_v51 }
 0xaef   : > { %v9712_v18 = vpop.eup %9711  ;;  %9354 = vmatpush3.bf16.msra.mxu0 %v7204_v59  ;;  %v6657_v7 = vpop.xlane.xlu0 %6656  ;;  %9355 = vmatprep.mubr.msk.bf16.mxu0 %vm9904_vm1, %v12601_v6 }
 0xaf0   : > { %v6709_v27 = vpack.c.bf16 %v6693_v37, %v6693_v37  ;;  %v6696_v62 = vmul.f32 %v9712_v18, %v11882_v53  ;;  %9715 = vrcp.f32 %v6657_v7  ;;  %9365 = vmatprep.subr.bf16.mxu0 %v12601_v6  ;;  %v12616_v37 = vld [vmem:[#allocation22_spill] sm:$0xff] }
 0xaf1   : > { %7590 = vrot.lane.b32.xlu0 %v11740_v48, %s9917_s26 }
 0xaf2   : > { %9338 = vmatmul.mubr.msk.bf16.vlgmr.msra.gmra.mxu1 %vm478_vm2, %v6709_v27  ;;  %v6712_v22 = vpack.c.bf16 %v6696_v62, %v6696_v62 }
 0xaf3   : > { %9348 = vmatpush3.bf16.msra.mxu1 %v7156_v25  ;;  %v7295_v52 = vpop.permute.xlu0 %7294  ;;  %9349 = vmatprep.mubr.msk.bf16.mxu1 %vm9904_vm1, %v12601_v6  ;;  %v12617_v25 = vld [vmem:[#allocation26_spill] sm:$0xff] }
 0xaf4   : > { %v7300_v20 = vsel %vm1442_vm3, %v7295_v52, 0  ;;  %9359 = vmatprep.subr.bf16.mxu1 %v12601_v6 }
 0xaf5   : > { %v9714_v53 = vpop.eup %9713  ;;  %7594 = vrot.lane.b32.xlu0 %v12615_v35, %s9917_s26  ;;  %v12618_v35 = vld [vmem:[#allocation23_spill] sm:$0xff]  ;;  %s9831_s26 = sshll.u32 %s9919_s22, 4  ;;  %s9832_s26 = int_to_ptr.vmem [resolvable:$false] %s9831_s26 }
 0xaf6   : > { %v6695_v48 = vmul.f32 %v9714_v53, %v11886_v15  ;;  %9356 = vmatmul.mubr.msk.bf16.vlgmr.msra.gmra.mxu0 %vm478_vm2, %v6712_v22  ;;  %p9834_p10 = scmp.lt.s32.totalorder %s12516_s23, %s9832_s26 }
 0xaf7   : > { %9366 = vmatpush3.bf16.msra.mxu0 %v7300_v20  ;;  %9367 = vmatprep.mubr.msk.bf16.mxu0 %vm9904_vm1, %v12601_v6 }
 0xaf8   : > { %v6711_v42 = vpack.c.bf16 %v6695_v48, %v6695_v48  ;;  %9377 = vmatprep.subr.bf16.mxu0 %v12601_v6 }
 0xafa   : > { %9350 = vmatmul.mubr.msk.bf16.vlgmr.msra.gmra.mxu1 %vm478_vm2, %v6711_v42 }
 0xafb   : > { %9360 = vmatpush3.bf16.msra.mxu1 %v7252_v60  ;;  %9361 = vmatprep.mubr.msk.bf16.mxu1 %vm9904_vm1, %v12601_v6 }
 0xafc   : > { %9371 = vmatprep.subr.bf16.mxu1 %v12601_v6 }
 0xafd   : > { %v9716_v15 = vpop.eup %9715 }
 0xafe   : > { %v6697_v28 = vmul.f32 %v9716_v15, %v11890_v23  ;;  %v12619_v15 = vld [vmem:[#allocation24_spill] sm:$0xff] }
 0xb00   : > { %v6713_v29 = vpack.c.bf16 %v6697_v28, %v6697_v28 }
 0xb02   : > { %9362 = vmatmul.mubr.msk.bf16.vlgmr.msra.gmra.mxu1 %vm478_vm2, %v6713_v29 }
 0xb03   : > { %9372 = vmatpush3.bf16.msra.mxu1 %v7348_v41  ;;  %9373 = vmatprep.mubr.msk.bf16.mxu1 %vm9904_vm1, %v12601_v6  ;;  %v12620_v41 = vld [vmem:[#allocation25_spill] sm:$0xff] }
 0xb04   : > { %9383 = vmatprep.subr.bf16.mxu1 %v12601_v6 }
 0xb16   : > { %v6660_v40 = vpop.xlane.xlu1 %6659 }
 0xb17   : > { %9717 = vrcp.f32 %v6660_v40 }
 0xb1a   : > { %v6666_v34 = vpop.xlane.xlu1 %6665 }
 0xb1b   : > { %9719 = vrcp.f32 %v6666_v34 }
 0xb1e   : > { %v7439_v1 = vpop.permute.xlu1 %7438 }
 0xb1f   : > { %v7444_v49 = vsel %vm1442_vm3, %v7439_v1, 0 }
 0xb22   : > { %v12074_v44 = vpop.permute.xlu1 %7504 }
 0xb24   : > { %v9718_v23 = vpop.eup %9717  ;;  %v6663_v3 = vpop.xlane.xlu0 %6662 }
 0xb25   : > { %v6698_v61 = vmul.f32 %v9718_v23, %v11902_v17  ;;  %9721 = vrcp.f32 %v6663_v3 }
 0xb26   : > { %v12077_v4 = vpop.permute.xlu1 %7508 }
 0xb27   : > { %v6714_v14 = vpack.c.bf16 %v6698_v61, %v6698_v61 }
 0xb28   : > { %v9720_v47 = vpop.eup %9719  ;;  %v6669_v58 = vpop.xlane.xlu0 %6668 }
 0xb29   : > { %9723 = vrcp.f32 %v6669_v58  ;;  %9368 = vmatmul.mubr.msk.bf16.vlgmr.msra.gmra.mxu0 %vm478_vm2, %v6714_v14  ;;  %v6700_v10 = vmul.f32 %v9720_v47, %v11906_v2 }
 0xb2a   : > { %v12080_v21 = vpop.permute.xlu1 %7512  ;;  %9379 = vmatprep.mubr.msk.bf16.mxu0 %vm9904_vm1, %v12601_v6 }
 0xb2b   : > { %v6716_v9 = vpack.c.bf16 %v6700_v10, %v6700_v10 }
 0xb2c   : > { %v7391_v12 = vpop.permute.xlu0 %7390 }
 0xb2d   : > { %v7396_v55 = vsel %vm1442_vm3, %v7391_v12, 0 }
 0xb2e   : > { %v12086_v17 = vpop.permute.xlu1 %7516  ;;  %9378 = vmatpush3.bf16.msra.mxu0 %v7396_v55 }
 0xb30   : > { %v12088_v46 = vpop.permute.xlu0 %7502 }
 0xb31   : > { %9380 = vmatmul.mubr.msk.bf16.vlgmr.msra.gmra.mxu0 %vm478_vm2, %v6716_v9 }
 0xb32   : > { %v9722_v13 = vpop.eup %9721  ;;  %v12091_v56 = vpop.permute.xlu1 %7520 }
 0xb33   : > { %v6699_v5 = vmul.f32 %v9722_v13, %v11910_v32 }
 0xb34   : > { %v12094_v19 = vpop.permute.xlu0 %7506 }
 0xb35   : > { %v6715_v31 = vpack.c.bf16 %v6699_v5, %v6699_v5 }
 0xb36   : > { %v9724_v2 = vpop.eup %9723  ;;  %v12096_v43 = vpop.permute.xlu1 %7524 }
 0xb37   : > { %9374 = vmatmul.mubr.msk.bf16.vlgmr.msra.gmra.mxu1 %vm478_vm2, %v6715_v31  ;;  %v6701_v36 = vmul.f32 %v9724_v2, %v11914_v8 }
 0xb38   : > { %9384 = vmatpush3.bf16.msra.mxu1 %v7444_v49  ;;  %v12100_v30 = vpop.permute.xlu0 %7510  ;;  %9385 = vmatprep.mubr.msk.bf16.mxu1 %vm9904_vm1, %v12601_v6 }
 0xb39   : > { %v6717_v45 = vpack.c.bf16 %v6701_v36, %v6701_v36 }
 0xb3a   : > { %v7529_v50 = vpop.permute.xlu1 %7528 }
 0xb3b   : > { %v7691_v18 = vsel %vm478_vm2, %v12616_v37, %v7529_v50 }
 0xb3c   : > { %v12105_v32 = vpop.permute.xlu0 %7514 }
 0xb3e   : > { %v7533_v16 = vpop.permute.xlu1 %7532 }
 0xb3f   : > { %9386 = vmatmul.mubr.msk.bf16.vlgmr.msra.gmra.mxu1 %vm478_vm2, %v6717_v45  ;;  %v7693_v52 = vsel %vm478_vm2, %v12617_v25, %v7533_v16 }
 0xb40   : > { %v12108_v63 = vpop.permute.xlu0 %7518 }
 0xb42   : > { %v12110_v38 = vpop.permute.xlu1 %7568 }
 0xb44   : > { %v7523_v39 = vpop.permute.xlu0 %7522 }
 0xb45   : > { %v7688_v48 = vsel %vm478_vm2, %v12618_v35, %v7523_v39 }
 0xb46   : > { %v12112_v33 = vpop.permute.xlu1 %7572 }
 0xb48   : > { %v7527_v54 = vpop.permute.xlu0 %7526 }
 0xb49   : > { %v7690_v28 = vsel %vm478_vm2, %v12619_v15, %v7527_v54 }
 0xb4a   : > { %v12114_v11 = vpop.permute.xlu1 %7576 }
 0xb4c   : > { %v7531_v6 = vpop.permute.xlu0 %7530 }
 0xb4d   : > { %v7692_v40 = vsel %vm478_vm2, %v12620_v41, %v7531_v6 }
 0xb4e   : > { %v12116_v26 = vpop.permute.xlu1 %7580 }
 0xb50   : > { %v12118_v8 = vpop.permute.xlu0 %7566 }
 0xb52   : > { %v12120_v57 = vpop.permute.xlu1 %7584 }
 0xb54   : > { %v12122_v51 = vpop.permute.xlu0 %7570 }
 0xb56   : > { %v12124_v0 = vpop.permute.xlu1 %7588 }
 0xb58   : > { %v12126_v59 = vpop.permute.xlu0 %7574 }
 0xb5a   : > { %v7593_v7 = vpop.permute.xlu1 %7592 }
 0xb5b   : > { %v12131_v27 = vsel %vm7694_vm4, %v7691_v18, %v7593_v7 }
 0xb5c   : > { %v12133_v62 = vpop.permute.xlu0 %7578 }
 0xb5e   : > { %v7597_v22 = vpop.permute.xlu1 %7596 }
 0xb5f   : > { %v12138_v20 = vsel %vm7694_vm4, %v7693_v52, %v7597_v22 }
 0xb60   : > { %v12140_v53 = vpop.permute.xlu0 %7582 }
 0xb64   : > { %v7587_v42 = vpop.permute.xlu0 %7586 }
 0xb65   : > { %v12145_v60 = vsel %vm7694_vm4, %v7688_v48, %v7587_v42 }
 0xb68   : > { %v7591_v24 = vpop.permute.xlu0 %7590 }
 0xb69   : > { %v12150_v29 = vsel %vm7694_vm4, %v7690_v28, %v7591_v24 }
 0xb6c   : > { %v7595_v34 = vpop.permute.xlu0 %7594 }
 0xb6d   : > { %v12155_v1 = vsel %vm7694_vm4, %v7692_v40, %v7595_v34 }
 0xb8c   : > { %v6760_v23 = vpop.f32.mrf.mxu0 }
 0xb8d   : > { %7630 = vrot.lane.b32.xlu0 %v6760_v23, %s9918_s29 }
 0xb8e   : > { %v9297_v3 = vpop.f32.mrf.mxu0 }
 0xb90   : > { %v6763_v61 = vpop.f32.mrf.mxu0 }
 0xb92   : > { %v9298_v14 = vpop.f32.mrf.mxu0 }
 0xb94   : > { %v6856_v47 = vpop.f32.mrf.mxu0 }
 0xb95   : > { %7634 = vrot.lane.b32.xlu0 %v6856_v47, %s9918_s29 }
 0xb96   : > { %v9309_v58 = vpop.f32.mrf.mxu0 }
 0xb98   : > { %v6859_v10 = vpop.f32.mrf.mxu0 }
 0xb9a   : > { %v6808_v12 = vpop.f32.mrf.mxu1  ;;  %v9310_v55 = vpop.f32.mrf.mxu0 }
 0xb9b   : > { %7632 = vrot.lane.b32.xlu1 %v6808_v12, %s9918_s29 }
 0xb9c   : > { %v9303_v9 = vpop.f32.mrf.mxu1 }
 0xb9e   : > { %v6811_v13 = vpop.f32.mrf.mxu1  ;;  %v6952_v5 = vpop.f32.mrf.mxu0 }
 0xb9f   : > { %7638 = vrot.lane.b32.xlu0 %v6952_v5, %s9918_s29 }
 0xba0   : > { %v9304_v31 = vpop.f32.mrf.mxu1  ;;  %v9321_v2 = vpop.f32.mrf.mxu0 }
 0xba2   : > { %v6904_v49 = vpop.f32.mrf.mxu1  ;;  %v6955_v36 = vpop.f32.mrf.mxu0 }
 0xba3   : > { %7636 = vrot.lane.b32.xlu1 %v6904_v49, %s9918_s29 }
 0xba4   : > { %v9315_v50 = vpop.f32.mrf.mxu1  ;;  %v9322_v45 = vpop.f32.mrf.mxu0 }
 0xba6   : > { %v6907_v16 = vpop.f32.mrf.mxu1  ;;  %v7048_v39 = vpop.f32.mrf.mxu0 }
 0xba7   : > { %7642 = vrot.lane.b32.xlu0 %v7048_v39, %s9918_s29 }
 0xba8   : > { %v9316_v54 = vpop.f32.mrf.mxu1  ;;  %v9333_v6 = vpop.f32.mrf.mxu0 }
 0xbaa   : > { %v7000_v37 = vpop.f32.mrf.mxu1  ;;  %v7051_v18 = vpop.f32.mrf.mxu0 }
 0xbab   : > { %7640 = vrot.lane.b32.xlu1 %v7000_v37, %s9918_s29 }
 0xbac   : > { %v9327_v7 = vpop.f32.mrf.mxu1  ;;  %v9334_v25 = vpop.f32.mrf.mxu0 }
 0xbae   : > { %v7003_v52 = vpop.f32.mrf.mxu1  ;;  %v7144_v22 = vpop.f32.mrf.mxu0 }
 0xbaf   : > { %7646 = vrot.lane.b32.xlu0 %v7144_v22, %s9918_s29 }
 0xbb0   : > { %v9328_v35 = vpop.f32.mrf.mxu1  ;;  %v9345_v48 = vpop.f32.mrf.mxu0 }
 0xbb1   : > { %v12621_v35 = vld [vmem:[#allocation11_spill] sm:$0xff] }
 0xbb2   : > { %v7096_v42 = vpop.f32.mrf.mxu1  ;;  %v7147_v15 = vpop.f32.mrf.mxu0  ;;  %v7678_v48 = vsel %vm478_vm2, %v12621_v35, %v12088_v46 }
 0xbb3   : > { %7644 = vrot.lane.b32.xlu1 %v7096_v42, %s9918_s29  ;;  %v7695_v42 = vsel %vm7694_vm4, %v7678_v48, %v12118_v8 }
 0xbb4   : > { %v9339_v28 = vpop.f32.mrf.mxu1  ;;  %v9346_v24 = vpop.f32.mrf.mxu0 }
 0xbb5   : > { %v12622_v24 = vld [vmem:[#allocation13_spill] sm:$0xff] }
 0xbb6   : > { %v7099_v41 = vpop.f32.mrf.mxu1  ;;  %v7240_v40 = vpop.f32.mrf.mxu0 }
 0xbb7   : > { %7650 = vrot.lane.b32.xlu0 %v7240_v40, %s9918_s29  ;;  %v7680_v41 = vsel %vm478_vm2, %v12622_v24, %v12094_v19  ;;  %v12623_v40 = vld [vmem:[#allocation12_spill] sm:$0xff]  ;;  %v9758_v19 = vld [vmem:[%s10073_s17 + $0x10] sm:$0xff] }
 0xbb8   : > { %v9340_v34 = vpop.f32.mrf.mxu1  ;;  %v9357_v23 = vpop.f32.mrf.mxu0 }
 0xbb9   : > { %v7679_v34 = vsel %vm478_vm2, %v12623_v40, %v12074_v44  ;;  %v7697_v23 = vsel %vm7694_vm4, %v7680_v41, %v12122_v51 }
 0xbba   : > { %v7192_v3 = vpop.f32.mrf.mxu1  ;;  %v7243_v61 = vpop.f32.mrf.mxu0  ;;  %v7696_v46 = vsel %vm7694_vm4, %v7679_v34, %v12110_v38  ;;  %v9762_v34 = vld [vmem:[%s10073_s17 + $0x38] sm:$0xff] }
 0xbbb   : > { %7648 = vrot.lane.b32.xlu1 %v7192_v3, %s9918_s29  ;;  %v9757_v3 = vld [vmem:[%s10073_s17] sm:$0xff] }
 0xbbc   : > { %v9351_v14 = vpop.f32.mrf.mxu1  ;;  %v9358_v47 = vpop.f32.mrf.mxu0 }
 0xbbe   : > { %v7195_v58 = vpop.f32.mrf.mxu1 }
 0xbc0   : > { %v9352_v10 = vpop.f32.mrf.mxu1 }
 0xbc1   : > { %v9759_v10 = vld [vmem:[%s10073_s17 + $0x8] sm:$0xff] }
 0xbc2   : > { %v7288_v12 = vpop.f32.mrf.mxu1 }
 0xbc3   : > { %7652 = vrot.lane.b32.xlu1 %v7288_v12, %s9918_s29  ;;  %v12624_v12 = vld [vmem:[#allocation15_spill] sm:$0xff] }
 0xbc4   : > { %v9363_v55 = vpop.f32.mrf.mxu1  ;;  %v7681_v38 = vsel %vm478_vm2, %v12624_v12, %v12077_v4  ;;  %v12625_v4 = vld [vmem:[#allocation17_spill] sm:$0xff] }
 0xbc6   : > { %v7291_v9 = vpop.f32.mrf.mxu1 }
 0xbc8   : > { %v9364_v13 = vpop.f32.mrf.mxu1 }
 0xbc9   : > { %v7698_v13 = vsel %vm7694_vm4, %v7681_v38, %v12112_v33  ;;  %v12629_v38 = vld [vmem:[#allocation16_spill] sm:$0xff] }
 0xbe9   : > { %v7336_v5 = vpop.f32.mrf.mxu0 }
 0xbea   : > { %7654 = vrot.lane.b32.xlu0 %v7336_v5, %s9918_s29 }
 0xbeb   : > { %v9369_v31 = vpop.f32.mrf.mxu0 }
 0xbed   : > { %v7339_v2 = vpop.f32.mrf.mxu0 }
 0xbee   : > { %v9760_v2 = vld [vmem:[%s10073_s17 + $0x18] sm:$0xff] }
 0xbef   : > { %v9370_v49 = vpop.f32.mrf.mxu0 }
 0xbf1   : > { %v7432_v36 = vpop.f32.mrf.mxu0 }
 0xbf2   : > { %7658 = vrot.lane.b32.xlu0 %v7432_v36, %s9918_s29 }
 0xbf3   : > { %v9381_v50 = vpop.f32.mrf.mxu0 }
 0xbf4   : > { %v7683_v50 = vsel %vm478_vm2, %v12625_v4, %v12080_v21 }
 0xbf5   : > { %v7435_v45 = vpop.f32.mrf.mxu0 }
 0xbf7   : > { %v7384_v16 = vpop.f32.mrf.mxu1  ;;  %v9382_v39 = vpop.f32.mrf.mxu0 }
 0xbf8   : > { %7656 = vrot.lane.b32.xlu1 %v7384_v16, %s9918_s29  ;;  %v7700_v16 = vsel %vm7694_vm4, %v7683_v50, %v12114_v11  ;;  %v12630_v50 = vld [vmem:[#allocation21_spill] sm:$0xff] }
 0xbf9   : > { %v9375_v54 = vpop.f32.mrf.mxu1 }
 0xbfb   : > { %v7387_v6 = vpop.f32.mrf.mxu1 }
 0xbfd   : > { %v9376_v37 = vpop.f32.mrf.mxu1 }
 0xbfe   : > { %v9761_v37 = vld [vmem:[%s10073_s17 + $0x28] sm:$0xff] }
 0xbff   : > { %v7480_v18 = vpop.f32.mrf.mxu1  ;;  %v7631_v22 = vpop.permute.xlu0 %7630 }
 0xc00   : > { %7660 = vrot.lane.b32.xlu1 %v7480_v18, %s9918_s29  ;;  %v7712_v15 = vsel %vm7711_vm5, %v7695_v42, %v7631_v22  ;;  %s9833_s29 = scalar_lea.vmem %s9832_s26, 4096 }
 0xc01   : > { %v9387_v7 = vpop.f32.mrf.mxu1  ;;  %v12188_v61 = vadd.f32 %v9757_v3, %v7712_v15  ;;  %v12627_v15 = vld [vmem:[#allocation14_spill] sm:$0xff]  ;;  %p9835_p2 = scmp.lt.s32.totalorder %s9833_s29, %s9827_s16 }
 0xc03   : > { %v7483_v25 = vpop.f32.mrf.mxu1  ;;  %v7744_v51 = vsel %vm306_vm0, %v12188_v61, 0.0  ;;  %v7809_v6 = vmul.f32 %v12188_v61, %v12188_v61  ;;  %p9836_p13 = por %p9835_p2, %p9834_p10 }
 0xc04   : > { %v12626_v25 = vld [vmem:[#allocation19_spill] sm:$0xff] }
 0xc05   : > { %v9388_v52 = vpop.f32.mrf.mxu1  ;;  %v7825_v7 = vsel %vm306_vm0, %v7809_v6, 0.0  ;;  %v7685_v11 = vsel %vm478_vm2, %v12626_v25, %v12086_v17  ;;  %p9837_p0 = pnand %p9836_p13, %p9830_p12 }
 0xc06   : > { %v7702_v35 = vsel %vm7694_vm4, %v7685_v11, %v12116_v26 }
 0xc07   : > { %v7635_v28 = vpop.permute.xlu0 %7634 }
 0xc08   : > { %v7714_v8 = vsel %vm7711_vm5, %v7697_v23, %v7635_v28  ;;  %v7682_v28 = vsel %vm478_vm2, %v12627_v15, %v12100_v30  ;;  %v9763_v30 = vld [vmem:[%s10073_s17 + $0x20] sm:$0xff] }
 0xc09   : > { %v12195_v58 = vadd.f32 %v9758_v19, %v7714_v8  ;;  %v7699_v24 = vsel %vm7694_vm4, %v7682_v28, %v12126_v59  ;;  %v12628_v8 = vld [vmem:[#allocation20_spill] sm:$0xff] }
 0xc0b   : > { %v7750_v55 = vsel %vm306_vm0, %v12195_v58, 0.0  ;;  %v7811_v40 = vmul.f32 %v12195_v58, %v12195_v58 }
 0xc0d   : > { %v7633_v14 = vpop.permute.xlu1 %7632  ;;  %v7831_v59 = vsel %vm306_vm0, %v7811_v40, 0.0 }
 0xc0e   : > { %v7713_v47 = vsel %vm7711_vm5, %v7696_v46, %v7633_v14  ;;  %v7687_v14 = vsel %vm478_vm2, %v12628_v8, %v12091_v56 }
 0xc0f   : > { %v12198_v44 = vadd.f32 %v9759_v10, %v7713_v47  ;;  %v7704_v10 = vsel %vm7694_vm4, %v7687_v14, %v12120_v57 }
 0xc11   : > { %7745 = vadd.xlane.f32.xlu0 %v7744_v51  ;;  %v7810_v9 = vmul.f32 %v12198_v44, %v12198_v44  ;;  %v7639_v48 = vpop.permute.xlu0 %7638  ;;  %v7747_v41 = vsel %vm306_vm0, %v12198_v44, 0.0 }
 0xc12   : > { %v7716_v26 = vsel %vm7711_vm5, %v7699_v24, %v7639_v48 }
 0xc13   : > { %v7828_v36 = vsel %vm306_vm0, %v7810_v9, 0.0  ;;  %v12258_v46 = vadd.f32 %v9763_v30, %v7716_v26  ;;  %v9768_v26 = vld [vmem:[%s10073_s17 + $0x50] sm:$0xff] }
 0xc15   : > { %v7637_v5 = vpop.permute.xlu1 %7636  ;;  %7751 = vadd.xlane.f32.xlu0 %v7750_v55  ;;  %v7684_v55 = vsel %vm478_vm2, %v12629_v38, %v12105_v32  ;;  %v9765_v32 = vld [vmem:[%s10073_s17 + $0x30] sm:$0xff] }
 0xc16   : > { %v7715_v31 = vsel %vm7711_vm5, %v7698_v13, %v7637_v5  ;;  %v7701_v9 = vsel %vm7694_vm4, %v7684_v55, %v12133_v62  ;;  %v7756_v13 = vsel %vm306_vm0, %v12258_v46, 0.0  ;;  %v7813_v5 = vmul.f32 %v12258_v46, %v12258_v46 }
 0xc17   : > { %v12213_v49 = vadd.f32 %v9760_v2, %v7715_v31  ;;  %v9764_v31 = vld [vmem:[%s10073_s17 + $0x48] sm:$0xff] }
 0xc18   : > { %v7837_v62 = vsel %vm306_vm0, %v7813_v5, 0.0 }
 0xc19   : > { %7829 = vadd.xlane.f32.xlu0 %v7828_v36  ;;  %v7753_v45 = vsel %vm306_vm0, %v12213_v49, 0.0  ;;  %v7812_v33 = vmul.f32 %v12213_v49, %v12213_v49  ;;  %v7643_v51 = vpop.permute.xlu0 %7642 }
 0xc1a   : > { %v7718_v57 = vsel %vm7711_vm5, %v7701_v9, %v7643_v51 }
 0xc1b   : > { %v7834_v21 = vsel %vm306_vm0, %v7812_v33, 0.0  ;;  %v12286_v4 = vadd.f32 %v9765_v32, %v7718_v57 }
 0xc1d   : > { %v7641_v39 = vpop.permute.xlu1 %7640  ;;  %7754 = vadd.xlane.f32.xlu0 %v7753_v45  ;;  %v7689_v45 = vsel %vm478_vm2, %v12630_v50, %v12096_v43  ;;  %v7762_v25 = vsel %vm306_vm0, %v12286_v4, 0.0  ;;  %v7815_v11 = vmul.f32 %v12286_v4, %v12286_v4 }
 0xc1e   : > { %v7717_v54 = vsel %vm7711_vm5, %v7700_v16, %v7641_v39  ;;  %v7706_v39 = vsel %vm7694_vm4, %v7689_v45, %v12124_v0 }
 0xc1f   : > { %v12229_v18 = vadd.f32 %v9761_v37, %v7717_v54  ;;  %v12631_v37 = vld [vmem:[#allocation18_spill] sm:$0xff] }
 0xc21   : > { %7835 = vadd.xlane.f32.xlu0 %v7834_v21  ;;  %v7759_v52 = vsel %vm306_vm0, %v12229_v18, 0.0  ;;  %v7814_v22 = vmul.f32 %v12229_v18, %v12229_v18  ;;  %v7647_v54 = vpop.permute.xlu0 %7646  ;;  %v7686_v21 = vsel %vm478_vm2, %v12631_v37, %v12108_v63  ;;  %v9767_v63 = vld [vmem:[%s10073_s17 + $0x40] sm:$0xff] }
 0xc23   : > { %v7840_v3 = vsel %vm306_vm0, %v7814_v22, 0.0 }
 0xc24   : > { %7826 = vadd.xlane.f32.xlu1 %v7825_v7  ;;  %v7703_v7 = vsel %vm7694_vm4, %v7686_v21, %v12140_v53  ;;  %v7843_v53 = vsel %vm306_vm0, %v7815_v11, 0.0 }
 0xc25   : > { %v7645_v42 = vpop.permute.xlu1 %7644  ;;  %7760 = vadd.xlane.f32.xlu0 %v7759_v52  ;;  %v7720_v0 = vsel %vm7711_vm5, %v7703_v7, %v7647_v54  ;;  %v9766_v52 = vld [vmem:[%s10073_s17 + $0x58] sm:$0xff] }
 0xc26   : > { %v7719_v17 = vsel %vm7711_vm5, %v7702_v35, %v7645_v42  ;;  %v12314_v48 = vadd.f32 %v9767_v63, %v7720_v0 }
 0xc27   : > { %v12254_v23 = vadd.f32 %v9762_v34, %v7719_v17 }
 0xc28   : > { %7748 = vadd.xlane.f32.xlu1 %v7747_v41  ;;  %v7768_v17 = vsel %vm306_vm0, %v12314_v48, 0.0  ;;  %v7817_v24 = vmul.f32 %v12314_v48, %v12314_v48 }
 0xc29   : > { %7841 = vadd.xlane.f32.xlu0 %v7840_v3  ;;  %v7765_v47 = vsel %vm306_vm0, %v12254_v23, 0.0  ;;  %v7816_v19 = vmul.f32 %v12254_v23, %v12254_v23  ;;  %v7651_v28 = vpop.permute.xlu0 %7650 }
 0xc2a   : > { %v7722_v41 = vsel %vm7711_vm5, %v12145_v60, %v7651_v28  ;;  %v7849_v3 = vsel %vm306_vm0, %v7817_v24, 0.0 }
 0xc2b   : > { %v7846_v36 = vsel %vm306_vm0, %v7816_v19, 0.0  ;;  %v12329_v34 = vadd.f32 %v9768_v26, %v7722_v41 }
 0xc2c   : > { %7832 = vadd.xlane.f32.xlu1 %v7831_v59 }
 0xc2d   : > { %v7649_v12 = vpop.permute.xlu1 %7648  ;;  %7766 = vadd.xlane.f32.xlu0 %v7765_v47  ;;  %v7774_v30 = vsel %vm306_vm0, %v12329_v34, 0.0  ;;  %v7819_v59 = vmul.f32 %v12329_v34, %v12329_v34  ;;  %v9769_v47 = vld [vmem:[%s10073_s17 + $0x60] sm:$0xff] }
 0xc2e   : > { %v7721_v56 = vsel %vm7711_vm5, %v7704_v10, %v7649_v12 }
 0xc2f   : > { %v12282_v2 = vadd.f32 %v9764_v31, %v7721_v56  ;;  %v7855_v60 = vsel %vm306_vm0, %v7819_v59, 0.0  ;;  %v9770_v56 = vld [vmem:[%s10073_s17 + $0x70] sm:$0xff]  ;;  %v9771_v31 = vld [vmem:[%s10073_s17 + $0x68] sm:$0xff] }
 0xc30   : > { %7757 = vadd.xlane.f32.xlu1 %v7756_v13 }
 0xc31   : > { %7847 = vadd.xlane.f32.xlu0 %v7846_v36  ;;  %v7771_v33 = vsel %vm306_vm0, %v12282_v2, 0.0  ;;  %v7818_v16 = vmul.f32 %v12282_v2, %v12282_v2 }
 0xc33   : > { %v7852_v35 = vsel %vm306_vm0, %v7818_v16, 0.0 }
 0xc34   : > { %7838 = vadd.xlane.f32.xlu1 %v7837_v62 }
 0xc35   : > { %v7653_v6 = vpop.permute.xlu1 %7652  ;;  %7772 = vadd.xlane.f32.xlu0 %v7771_v33 }
 0xc36   : > { %v7723_v43 = vsel %vm7711_vm5, %v7706_v39, %v7653_v6 }
 0xc37   : > { %v12310_v22 = vadd.f32 %v9766_v52, %v7723_v43 }
 0xc38   : > { %7763 = vadd.xlane.f32.xlu1 %v7762_v25 }
 0xc39   : > { %7853 = vadd.xlane.f32.xlu0 %v7852_v35  ;;  %v7777_v42 = vsel %vm306_vm0, %v12310_v22, 0.0  ;;  %v7820_v15 = vmul.f32 %v12310_v22, %v12310_v22 }
 0xc3b   : > { %v7858_v40 = vsel %vm306_vm0, %v7820_v15, 0.0 }
 0xc3c   : > { %7844 = vadd.xlane.f32.xlu1 %v7843_v53 }
 0xc3d   : > { %7778 = vadd.xlane.f32.xlu0 %v7777_v42 }
 0xc40   : > { %7769 = vadd.xlane.f32.xlu1 %v7768_v17 }
 0xc41   : > { %7859 = vadd.xlane.f32.xlu0 %v7858_v40 }
 0xc44   : > { %7850 = vadd.xlane.f32.xlu1 %v7849_v3 }
 0xc48   : > { %7775 = vadd.xlane.f32.xlu1 %v7774_v30 }
 0xc4c   : > { %7856 = vadd.xlane.f32.xlu1 %v7855_v60 }
 0xc5c   : > { %v7655_v8 = vpop.permute.xlu0 %7654 }
 0xc5d   : > { %v7724_v14 = vsel %vm7711_vm5, %v12150_v29, %v7655_v8 }
 0xc5e   : > { %v12340_v19 = vadd.f32 %v9769_v47, %v7724_v14 }
 0xc60   : > { %v7780_v10 = vsel %vm306_vm0, %v12340_v19, 0.0  ;;  %v7821_v51 = vmul.f32 %v12340_v19, %v12340_v19 }
 0xc61   : > { %7781 = vadd.xlane.f32.xlu1 %v7780_v10 }
 0xc62   : > { %v7861_v38 = vsel %vm306_vm0, %v7821_v51, 0.0 }
 0xc64   : > { %v7659_v12 = vpop.permute.xlu0 %7658 }
 0xc65   : > { %v7726_v55 = vsel %vm7711_vm5, %v12155_v1, %v7659_v12  ;;  %7862 = vadd.xlane.f32.xlu1 %v7861_v38 }
 0xc66   : > { %v12350_v29 = vadd.f32 %v9770_v56, %v7726_v55 }
 0xc68   : > { %v7786_v9 = vsel %vm306_vm0, %v12350_v29, 0.0  ;;  %v7823_v13 = vmul.f32 %v12350_v29, %v12350_v29 }
 0xc69   : > { %7787 = vadd.xlane.f32.xlu1 %v7786_v9 }
 0xc6a   : > { %v7657_v5 = vpop.permute.xlu1 %7656  ;;  %v7867_v1 = vsel %vm306_vm0, %v7823_v13, 0.0 }
 0xc6b   : > { %v7725_v57 = vsel %vm7711_vm5, %v12131_v27, %v7657_v5  ;;  %v9772_v27 = vld [vmem:[%s10073_s17 + $0x78] sm:$0xff] }
 0xc6c   : > { %v12359_v36 = vadd.f32 %v9771_v31, %v7725_v57 }
 0xc6d   : > { %7868 = vadd.xlane.f32.xlu1 %v7867_v1 }
 0xc6e   : > { %v7783_v32 = vsel %vm306_vm0, %v12359_v36, 0.0  ;;  %v7822_v62 = vmul.f32 %v12359_v36, %v12359_v36 }
 0xc6f   : > { %7784 = vadd.xlane.f32.xlu0 %v7783_v32 }
 0xc70   : > { %v7864_v45 = vsel %vm306_vm0, %v7822_v62, 0.0 }
 0xc72   : > { %v7661_v50 = vpop.permute.xlu1 %7660 }
 0xc73   : > { %v7727_v33 = vsel %vm7711_vm5, %v12138_v20, %v7661_v50  ;;  %7865 = vadd.xlane.f32.xlu0 %v7864_v45 }
 0xc74   : > { %v12370_v16 = vadd.f32 %v9772_v27, %v7727_v33 }
 0xc76   : > { %v7789_v39 = vsel %vm306_vm0, %v12370_v16, 0.0  ;;  %v7824_v54 = vmul.f32 %v12370_v16, %v12370_v16 }
 0xc77   : > { %7790 = vadd.xlane.f32.xlu0 %v7789_v39 }
 0xc78   : > { %v7870_v6 = vsel %vm306_vm0, %v7824_v54, 0.0  ;;  %v12399_v54 = vld [vmem:[%s12565_s3] ss:$0 sm:$0xff] }
 0xc7b   : > { %7871 = vadd.xlane.f32.xlu0 %v7870_v6 }
 0xc9a   : > { %v7746_v37 = vpop.xlane.xlu0 %7745 }
 0xc9b   : > { %v7793_v20 = vmul.f32 0.03125, %v7746_v37 }
 0xc9d   : > { %v7889_v53 = vmul.f32 %v7793_v20, %v7793_v20 }
 0xc9e   : > { %v7752_v21 = vpop.xlane.xlu0 %7751 }
 0xc9f   : > { %v12379_v40 = vmul.f32 0.03125, %v7752_v21 }
 0xca1   : > { %v7891_v51 = vmul.f32 %v12379_v40, %v12379_v40 }
 0xca2   : > { %v7830_v43 = vpop.xlane.xlu0 %7829 }
 0xca3   : > { %v7874_v8 = vmul.f32 0.03125, %v7830_v43 }
 0xca6   : > { %v7755_v7 = vpop.xlane.xlu0 %7754 }
 0xca7   : > { %v7796_v25 = vmul.f32 0.03125, %v7755_v7 }
 0xca9   : > { %v7892_v0 = vmul.f32 %v7796_v25, %v7796_v25  ;;  %v7924_v45 = vsub.f32 %v12213_v49, %v7796_v25  ;;  %v12409_v49 = vld [vmem:[%s12566_s4] ss:$0 sm:$0xff] }
 0xcaa   : > { %v7836_v11 = vpop.xlane.xlu0 %7835 }
 0xcab   : > { %v7876_v52 = vmul.f32 0.03125, %v7836_v11 }
 0xcad   : > { %v7908_v35 = vsub.f32 %v7876_v52, %v7892_v0  ;;  %v7827_v63 = vpop.xlane.xlu1 %7826  ;;  %v7921_v0 = vsub.f32 %v12188_v61, %v7793_v20 }
 0xcae   : > { %v7873_v42 = vmul.f32 0.03125, %v7827_v63  ;;  %v7761_v15 = vpop.xlane.xlu0 %7760 }
 0xcaf   : > { %v7940_v28 = vadd.f32 1e-05, %v7908_v35  ;;  %v12377_v17 = vmul.f32 0.03125, %v7761_v15 }
 0xcb0   : > { %v7905_v24 = vsub.f32 %v7873_v42, %v7889_v53 }
 0xcb1   : > { %9725 = vrsqrt.f32 %v7940_v28  ;;  %v7749_v41 = vpop.xlane.xlu1 %7748  ;;  %v7894_v59 = vmul.f32 %v12377_v17, %v12377_v17 }
 0xcb2   : > { %v7937_v26 = vadd.f32 1e-05, %v7905_v24  ;;  %v12381_v3 = vmul.f32 0.03125, %v7749_v41  ;;  %v7842_v30 = vpop.xlane.xlu0 %7841 }
 0xcb3   : > { %v7878_v60 = vmul.f32 0.03125, %v7842_v30 }
 0xcb4   : > { %9727 = vrsqrt.f32 %v7937_v26  ;;  %v7890_v14 = vmul.f32 %v12381_v3, %v12381_v3  ;;  %v7926_v26 = vsub.f32 %v12229_v18, %v12377_v17  ;;  %v7923_v18 = vsub.f32 %v12195_v58, %v12379_v40 }
 0xcb5   : > { %v7910_v47 = vsub.f32 %v7878_v60, %v7894_v59  ;;  %v7833_v10 = vpop.xlane.xlu1 %7832 }
 0xcb6   : > { %v7906_v12 = vsub.f32 %v7874_v8, %v7890_v14  ;;  %v7875_v38 = vmul.f32 0.03125, %v7833_v10  ;;  %v7767_v55 = vpop.xlane.xlu0 %7766  ;;  %v7922_v14 = vsub.f32 %v12198_v44, %v12381_v3 }
 0xcb7   : > { %v7942_v56 = vadd.f32 1e-05, %v7910_v47  ;;  %v12389_v9 = vmul.f32 0.03125, %v7767_v55 }
 0xcb8   : > { %v7938_v13 = vadd.f32 1e-05, %v7906_v12  ;;  %v7907_v5 = vsub.f32 %v7875_v38, %v7891_v51 }
 0xcb9   : > { %9729 = vrsqrt.f32 %v7942_v56  ;;  %v7758_v57 = vpop.xlane.xlu1 %7757  ;;  %v7896_v62 = vmul.f32 %v12389_v9, %v12389_v9 }
 0xcba   : > { %9731 = vrsqrt.f32 %v7938_v13  ;;  %v7939_v31 = vadd.f32 1e-05, %v7907_v5  ;;  %v12391_v1 = vmul.f32 0.03125, %v7758_v57  ;;  %v7848_v32 = vpop.xlane.xlu0 %7847 }
 0xcbb   : > { %v7880_v50 = vmul.f32 0.03125, %v7848_v32 }
 0xcbc   : > { %9733 = vrsqrt.f32 %v7939_v31  ;;  %v7893_v6 = vmul.f32 %v12391_v1, %v12391_v1 }
 0xcbd   : > { %v7912_v33 = vsub.f32 %v7880_v50, %v7896_v62  ;;  %v7839_v27 = vpop.xlane.xlu1 %7838 }
 0xcbe   : > { %v9726_v39 = vpop.eup %9725  ;;  %v7877_v37 = vmul.f32 0.03125, %v7839_v27  ;;  %v7773_v21 = vpop.xlane.xlu0 %7772 }
 0xcbf   : > { %v7972_v43 = vmul.f32 %v9726_v39, %v7924_v45  ;;  %v7944_v7 = vadd.f32 1e-05, %v7912_v33  ;;  %v12403_v11 = vmul.f32 0.03125, %v7773_v21  ;;  %v7928_v39 = vsub.f32 %v12254_v23, %v12389_v9 }
 0xcc0   : > { %v7909_v25 = vsub.f32 %v7877_v37, %v7893_v6 }
 0xcc1   : > { %v9728_v52 = vpop.eup %9727  ;;  %v7995_v35 = vmul.f32 %v12399_v54, %v7972_v43  ;;  %9735 = vrsqrt.f32 %v7944_v7  ;;  %v7764_v63 = vpop.xlane.xlu1 %7763  ;;  %v7898_v61 = vmul.f32 %v12403_v11, %v12403_v11 }
 0xcc2   : > { %v7969_v53 = vmul.f32 %v9728_v52, %v7921_v0  ;;  %v7941_v42 = vadd.f32 1e-05, %v7909_v25  ;;  %v12412_v15 = vmul.f32 0.03125, %v7764_v63  ;;  %v7854_v28 = vpop.xlane.xlu0 %7853 }
 0xcc3   : > { %v8018_v24 = vadd.f32 %v12409_v49, %v7995_v35  ;;  %v7882_v20 = vmul.f32 0.03125, %v7854_v28  ;;  %v7925_v35 = vsub.f32 %v12258_v46, %v12391_v1  ;;  %v7930_v46 = vsub.f32 %v12282_v2, %v12403_v11 }
 0xcc4   : > { %v7992_v41 = vmul.f32 %v12399_v54, %v7969_v53  ;;  %9737 = vrsqrt.f32 %v7941_v42  ;;  %v7895_v47 = vmul.f32 %v12412_v15, %v12412_v15 }
 0xcc5   : > { %8034 = vst.msk [vmem:[%s12420_s15 + $0x18] sm:$0xff] %vm306_vm0, %v8018_v24  ;;  %v7914_v30 = vsub.f32 %v7882_v20, %v7898_v61  ;;  %v7845_v59 = vpop.xlane.xlu1 %7844 }
 0xcc6   : > { %v9730_v60 = vpop.eup %9729  ;;  %v8015_v8 = vadd.f32 %v12409_v49, %v7992_v41  ;;  %v7879_v10 = vmul.f32 0.03125, %v7845_v59  ;;  %v7779_v51 = vpop.xlane.xlu0 %7778 }
 0xcc7   : > { %v9732_v12 = vpop.eup %9731  ;;  %v7974_v38 = vmul.f32 %v9730_v60, %v7926_v26  ;;  %v7946_v55 = vadd.f32 1e-05, %v7914_v30  ;;  %v12431_v56 = vmul.f32 0.03125, %v7779_v51 }
 0xcc8   : > { %8031 = vst.msk [vmem:[%s12420_s15] sm:$0xff] %vm306_vm0, %v8015_v8  ;;  %v7970_v17 = vmul.f32 %v9732_v12, %v7922_v14  ;;  %v7911_v13 = vsub.f32 %v7879_v10, %v7895_v47  ;;  %v7927_v8 = vsub.f32 %v12286_v4, %v12412_v15 }
 0xcc9   : > { %v9734_v5 = vpop.eup %9733  ;;  %v7997_v44 = vmul.f32 %v12399_v54, %v7974_v38  ;;  %9739 = vrsqrt.f32 %v7946_v55  ;;  %v7770_v3 = vpop.xlane.xlu1 %7769  ;;  %v7900_v58 = vmul.f32 %v12431_v56, %v12431_v56  ;;  %v7932_v38 = vsub.f32 %v12310_v22, %v12431_v56 }
 0xcca   : > { %v7993_v57 = vmul.f32 %v12399_v54, %v7970_v17  ;;  %v7971_v31 = vmul.f32 %v9734_v5, %v7923_v18  ;;  %v7943_v32 = vadd.f32 1e-05, %v7911_v13  ;;  %v7801_v62 = vmul.f32 0.03125, %v7770_v3  ;;  %v7860_v50 = vpop.xlane.xlu0 %7859 }
 0xccb   : > { %v8020_v45 = vadd.f32 %v12409_v49, %v7997_v44  ;;  %v7884_v40 = vmul.f32 0.03125, %v7860_v50 }
 0xccc   : > { %v8016_v33 = vadd.f32 %v12409_v49, %v7993_v57  ;;  %v7994_v27 = vmul.f32 %v12399_v54, %v7971_v31  ;;  %9741 = vrsqrt.f32 %v7943_v32  ;;  %v7897_v7 = vmul.f32 %v7801_v62, %v7801_v62 }
 0xccd   : > { %8036 = vst.msk [vmem:[%s12420_s15 + $0x28] sm:$0xff] %vm306_vm0, %v8020_v45  ;;  %v7916_v6 = vsub.f32 %v7884_v40, %v7900_v58  ;;  %v7851_v37 = vpop.xlane.xlu1 %7850  ;;  %v7929_v18 = vsub.f32 %v12314_v48, %v7801_v62 }
 0xcce   : > { %v9736_v21 = vpop.eup %9735  ;;  %8032 = vst.msk [vmem:[%s12420_s15 + $0x8] sm:$0xff] %vm306_vm0, %v8016_v33  ;;  %v8017_v43 = vadd.f32 %v12409_v49, %v7994_v27  ;;  %v7881_v0 = vmul.f32 0.03125, %v7851_v37 }
 0xccf   : > { %v7976_v25 = vmul.f32 %v9736_v21, %v7928_v39  ;;  %v7948_v52 = vadd.f32 1e-05, %v7916_v6 }
 0xcd0   : > { %8033 = vst.msk [vmem:[%s12420_s15 + $0x10] sm:$0xff] %vm306_vm0, %v8017_v43  ;;  %v7913_v63 = vsub.f32 %v7881_v0, %v7897_v7 }
 0xcd1   : > { %v9738_v53 = vpop.eup %9737  ;;  %v7999_v23 = vmul.f32 %v12399_v54, %v7976_v25  ;;  %9743 = vrsqrt.f32 %v7948_v52  ;;  %v7776_v9 = vpop.xlane.xlu1 %7775 }
 0xcd2   : > { %v7973_v42 = vmul.f32 %v9738_v53, %v7925_v35  ;;  %v7945_v28 = vadd.f32 1e-05, %v7913_v63  ;;  %v7803_v24 = vmul.f32 0.03125, %v7776_v9 }
 0xcd3   : > { %v8022_v61 = vadd.f32 %v12409_v49, %v7999_v23 }
 0xcd4   : > { %v7996_v20 = vmul.f32 %v12399_v54, %v7973_v42  ;;  %9745 = vrsqrt.f32 %v7945_v28  ;;  %v7899_v30 = vmul.f32 %v7803_v24, %v7803_v24  ;;  %v7931_v56 = vsub.f32 %v12329_v34, %v7803_v24 }
 0xcd5   : > { %8038 = vst.msk [vmem:[%s12420_s15 + $0x38] sm:$0xff] %vm306_vm0, %v8022_v61  ;;  %v7857_v1 = vpop.xlane.xlu1 %7856 }
 0xcd6   : > { %v9740_v41 = vpop.eup %9739  ;;  %v8019_v26 = vadd.f32 %v12409_v49, %v7996_v20  ;;  %v7883_v59 = vmul.f32 0.03125, %v7857_v1 }
 0xcd7   : > { %v7978_v60 = vmul.f32 %v9740_v41, %v7930_v46 }
 0xcd8   : > { %8035 = vst.msk [vmem:[%s12420_s15 + $0x20] sm:$0xff] %vm306_vm0, %v8019_v26  ;;  %v7915_v14 = vsub.f32 %v7883_v59, %v7899_v30 }
 0xcd9   : > { %v9742_v47 = vpop.eup %9741  ;;  %v8001_v10 = vmul.f32 %v12399_v54, %v7978_v60 }
 0xcda   : > { %v7975_v51 = vmul.f32 %v9742_v47, %v7927_v8  ;;  %v7947_v2 = vadd.f32 1e-05, %v7915_v14 }
 0xcdb   : > { %v8024_v11 = vadd.f32 %v12409_v49, %v8001_v10 }
 0xcdc   : > { %v7998_v12 = vmul.f32 %v12399_v54, %v7975_v51  ;;  %9747 = vrsqrt.f32 %v7947_v2 }
 0xcdd   : > { %8040 = vst.msk [vmem:[%s12420_s15 + $0x48] sm:$0xff] %vm306_vm0, %v8024_v11 }
 0xcde   : > { %v9744_v55 = vpop.eup %9743  ;;  %v8021_v4 = vadd.f32 %v12409_v49, %v7998_v12 }
 0xcdf   : > { %v7980_v15 = vmul.f32 %v9744_v55, %v7932_v38 }
 0xce0   : > { %8037 = vst.msk [vmem:[%s12420_s15 + $0x30] sm:$0xff] %vm306_vm0, %v8021_v4 }
 0xce1   : > { %v9746_v17 = vpop.eup %9745  ;;  %v8003_v13 = vmul.f32 %v12399_v54, %v7980_v15 }
 0xce2   : > { %v7977_v5 = vmul.f32 %v9746_v17, %v7929_v18 }
 0xce3   : > { %v8026_v44 = vadd.f32 %v12409_v49, %v8003_v13 }
 0xce4   : > { %v8000_v3 = vmul.f32 %v12399_v54, %v7977_v5 }
 0xce5   : > { %8042 = vst.msk [vmem:[%s12420_s15 + $0x58] sm:$0xff] %vm306_vm0, %v8026_v44 }
 0xce6   : > { %v8023_v22 = vadd.f32 %v12409_v49, %v8000_v3 }
 0xce8   : > { %8039 = vst.msk [vmem:[%s12420_s15 + $0x40] sm:$0xff] %vm306_vm0, %v8023_v22 }
 0xce9   : > { %v9748_v57 = vpop.eup %9747 }
 0xcea   : > { %v7979_v31 = vmul.f32 %v9748_v57, %v7931_v56  ;;  %v7782_v48 = vpop.xlane.xlu1 %7781 }
 0xceb   : > { %v7805_v32 = vmul.f32 0.03125, %v7782_v48 }
 0xcec   : > { %v8002_v62 = vmul.f32 %v12399_v54, %v7979_v31 }
 0xced   : > { %v7901_v58 = vmul.f32 %v7805_v32, %v7805_v32  ;;  %v7933_v9 = vsub.f32 %v12340_v19, %v7805_v32 }
 0xcee   : > { %v8025_v50 = vadd.f32 %v12409_v49, %v8002_v62  ;;  %v7863_v45 = vpop.xlane.xlu1 %7862 }
 0xcef   : > { %v7885_v40 = vmul.f32 0.03125, %v7863_v45 }
 0xcf0   : > { %8041 = vst.msk [vmem:[%s12420_s15 + $0x50] sm:$0xff] %vm306_vm0, %v8025_v50 }
 0xcf1   : > { %v7917_v33 = vsub.f32 %v7885_v40, %v7901_v58 }
 0xcf2   : > { %v7788_v27 = vpop.xlane.xlu1 %7787 }
 0xcf3   : > { %v7949_v39 = vadd.f32 1e-05, %v7917_v33  ;;  %v7807_v6 = vmul.f32 0.03125, %v7788_v27 }
 0xcf5   : > { %9749 = vrsqrt.f32 %v7949_v39  ;;  %v7903_v34 = vmul.f32 %v7807_v6, %v7807_v6  ;;  %v7935_v59 = vsub.f32 %v12350_v29, %v7807_v6 }
 0xcf6   : > { %v7869_v37 = vpop.xlane.xlu1 %7868 }
 0xcf7   : > { %v7887_v21 = vmul.f32 0.03125, %v7869_v37 }
 0xcf8   : > { %v7785_v43 = vpop.xlane.xlu0 %7784 }
 0xcf9   : > { %v7919_v7 = vsub.f32 %v7887_v21, %v7903_v34  ;;  %v7806_v0 = vmul.f32 0.03125, %v7785_v43 }
 0xcfb   : > { %v7951_v25 = vadd.f32 1e-05, %v7919_v7  ;;  %v7902_v35 = vmul.f32 %v7806_v0, %v7806_v0  ;;  %v7934_v10 = vsub.f32 %v12359_v36, %v7806_v0 }
 0xcfc   : > { %v7866_v52 = vpop.xlane.xlu0 %7865 }
 0xcfd   : > { %9751 = vrsqrt.f32 %v7951_v25  ;;  %v7886_v63 = vmul.f32 0.03125, %v7866_v52 }
 0xcff   : > { %v7918_v53 = vsub.f32 %v7886_v63, %v7902_v35 }
 0xd00   : > { %v7791_v23 = vpop.xlane.xlu0 %7790 }
 0xd01   : > { %v7950_v42 = vadd.f32 1e-05, %v7918_v53  ;;  %v7808_v28 = vmul.f32 0.03125, %v7791_v23 }
 0xd02   : > { %v9750_v24 = vpop.eup %9749 }
 0xd03   : > { %v7981_v61 = vmul.f32 %v9750_v24, %v7933_v9  ;;  %9753 = vrsqrt.f32 %v7950_v42  ;;  %v7904_v1 = vmul.f32 %v7808_v28, %v7808_v28  ;;  %v7936_v12 = vsub.f32 %v12370_v16, %v7808_v28 }
 0xd04   : > { %v7872_v20 = vpop.xlane.xlu0 %7871 }
 0xd05   : > { %v8004_v46 = vmul.f32 %v12399_v54, %v7981_v61  ;;  %v7888_v41 = vmul.f32 0.03125, %v7872_v20 }
 0xd07   : > { %v8027_v26 = vadd.f32 %v12409_v49, %v8004_v46  ;;  %v7920_v30 = vsub.f32 %v7888_v41, %v7904_v1 }
 0xd09   : > { %8043 = vst.msk [vmem:[%s12420_s15 + $0x60] sm:$0xff] %vm306_vm0, %v8027_v26  ;;  %v7952_v19 = vadd.f32 1e-05, %v7920_v30 }
 0xd0a   : > { %v9752_v60 = vpop.eup %9751 }
 0xd0b   : > { %v7983_v8 = vmul.f32 %v9752_v60, %v7935_v59  ;;  %9755 = vrsqrt.f32 %v7952_v19 }
 0xd0d   : > { %v8006_v14 = vmul.f32 %v12399_v54, %v7983_v8 }
 0xd0f   : > { %v8029_v47 = vadd.f32 %v12409_v49, %v8006_v14 }
 0xd10   : > { %v9754_v51 = vpop.eup %9753 }
 0xd11   : > { %8045 = vst.msk [vmem:[%s12420_s15 + $0x70] sm:$0xff] %vm306_vm0, %v8029_v47  ;;  %v7982_v2 = vmul.f32 %v9754_v51, %v7934_v10 }
 0xd13   : > { %v8005_v29 = vmul.f32 %v12399_v54, %v7982_v2 }
 0xd15   : > { %v8028_v11 = vadd.f32 %v12409_v49, %v8005_v29 }
 0xd17   : > { %8044 = vst.msk [vmem:[%s12420_s15 + $0x68] sm:$0xff] %vm306_vm0, %v8028_v11 }
 0xd18   : > { %v9756_v38 = vpop.eup %9755 }
 0xd19   : > { %v7984_v55 = vmul.f32 %v9756_v38, %v7936_v12 }
 0xd1b   : > { %v8007_v36 = vmul.f32 %v12399_v54, %v7984_v55 }
 0xd1d   : > { %v8030_v4 = vadd.f32 %v12409_v49, %v8007_v36 }
 0xd1f   : > { %8046 = vst.msk [vmem:[%s12420_s15 + $0x78] sm:$0xff] %vm306_vm0, %v8030_v4 }
 0xd20   : > { %9840 = shalt.err (!%p9837_p0)
}
 0xd21   : > { %s9841_s17 = scalar_lea.hbm %s12513_s9, 2048  ;;  %s9845_s8 = scalar_lea.hbm %s12567_s5, 4096 }
 0xd22   : > { %p9842_p5 = scmp.ne.s32.totalorder %s12513_s9, %s9841_s17  ;;  %p9846_p4 = scmp.lt.s32.totalorder %s12513_s9, %s12567_s5 }
 0xd23   : > { %p9847_p6 = scmp.lt.s32.totalorder %s9845_s8, %s9841_s17 }
 0xd24   : > { %p9843_p9 = pnand %p9842_p5, %p12632_p11 }
 0xd25   : > { %p9848_p8 = por %p9847_p6, %p9846_p4 }
 0xd26   : > { %p9844_p1 = pneg %p9843_p9 }
 0xd28   : > { %p9849_p3 = pnand %p9848_p8, %p9844_p1 }
 0xd2a   : > { %9852 = shalt.err (!%p9849_p3)
}
 0xd2b   : > { %s9920_s27 = smov 128  }
 0xd2c   : > { %9395 = dma.vmem_to_hbm [thread:$0]  (%p12632_p11), %s12516_s23, 2048, %s12513_s9, %s8048_s10, %s9920_s27, %s9920_s27, %s9916_s24  }
 0xd2d PF: > { %s8076_s28 = sand.u32 1, %s9883_s18   ;;  %p12633_p7 = scmp.ne.s32.totalorder %s12575_s25, 0 }
 0xd2e   : > { %p12634_p12 = scmp.ge.s32.totalorder %s9895_s21, 2  ;;  %s8077_s16 = scalar_lea.sflag [#allocation4], %s8076_s28 }
 0xd30   : > { %p9406_p10 = pnand %p12634_p12, %p12633_p7 }
 0xd32   : > { %p9407_p2 = pneg %p9406_p10 }
 0xd34   : > { %9878 = dma.done.wait (%p9407_p2), %s8077_s16, 2048  }
 0xd35   : > { %9880 = vsyncadd (%p9407_p2), %s8077_s16, 4294965248  ;;  %p19_p13 = scmp.ge.s32.totalorder %s10005_s30, 4   ;;  %s12635_s18 = smov %s9887_s19 }
 0xd36   : > { %s12636_s19 = smov %s9891_s20  ;;  %s12637_s20 = smov %s10022_s13 }
 0xd37   : > { %s12638_s21 = smov %s10005_s30  ;;  %21 = sbr.rel (!%p19_p13) target bundleno = 6 (0x6), region = 89 }
 0xd3c   :  { %8082 = vsyncpa [#allocation3], 1 }
 0xd3d   :  { %8084 = vsyncpa [#allocation3 + $0x1], 1 }
 0xd3e   :  { %8085 = vsyncpa [#allocation6], 1 }
 0xd3f   :  { %8086 = vsyncpa [#allocation4], 1 }
 0xd40   :  { %8088 = vsyncpa [#allocation4 + $0x1], 1 }

</bundles_post_ra>
